<compile_context>
chip_gen: v7x
topology: tpu7x:2x2x1
jax: 0.10.0
libtpu: 0.0.40
codegen_flags: <defaults>
</compile_context>

<pallas_src>
import functools

import jax
import jax.numpy as jnp
from jax.experimental import pallas as pl
from jax.experimental.pallas import tpu as pltpu


# ------------------------------ fused kernel --------------------------------

def _fused_resblockup_kernel(x_ref, w1_ref, wt_ref, wsk_ref,
                             sc1_ref, sh1_ref, sc2_ref, sh2_ref,
                             sc3_ref, sh3_ref, o_ref,
                             *, H, W, Cin, planes, u):
    # x_ref : (H+2, W+2, Cin)        bf16  (spatially padded image, batch squeezed)
    # w1_ref: (9, Cin, planes)       bf16  (conv3x3 taps, index kh*3+kw)
    # wt_ref: (planes, u*u*planes)   bf16  (convT weight, columns ordered (a, b, co))
    # wsk_ref: (Cin, planes)         bf16  (1x1 skip conv)
    # sc*/sh*: (1, planes)           f32   (folded BN affines; 1/1.414 folded into 2 & 3)
    # o_ref : (H*W, u*u*planes)      f32   (columns ordered (a, b, co))
    M = H * W

    # ---- conv3x3 (pad=1): 9 shifted taps, accumulate on the MXU in f32 ----
    acc = jnp.zeros((M, planes), jnp.float32)
    x_center = None
    for kh in range(3):
        for kw in range(3):
            xs = x_ref[kh:kh + H, kw:kw + W, :].reshape(M, Cin)
            if kh == 1 and kw == 1:
                x_center = xs                      # un-padded input, reused by skip path
            acc = acc + jnp.dot(xs, w1_ref[kh * 3 + kw],
                                preferred_element_type=jnp.float32)

    # ---- BN1 + ReLU (single FMA + max on the f32 accumulator) ----
    y1 = jnp.maximum(acc * sc1_ref[...] + sh1_ref[...], 0.0).astype(jnp.bfloat16)

    # ---- ConvTranspose(k=stride=u) as one matmul: (M, planes) x (planes, u*u*planes) ----
    y2 = jnp.dot(y1, wt_ref[...], preferred_element_type=jnp.float32)

    # ---- skip path: nearest upsample + 1x1 conv + BN3 (+ folded /1.414) ----
    # nearest upsample means the residual is identical for all u*u sub-pixels of (h, w).
    res = jnp.dot(x_center, wsk_ref[...], preferred_element_type=jnp.float32)
    res = res * sc3_ref[...] + sh3_ref[...]

    # ---- BN2 (+ folded /1.414) per sub-pixel, combine with skip, ReLU ----
    outs = []
    for ab in range(u * u):
        m_ab = y2[:, ab * planes:(ab + 1) * planes] * sc2_ref[...] + sh2_ref[...]
        outs.append(jnp.maximum(m_ab + res, 0.0))
    o_ref[...] = jnp.concatenate(outs, axis=-1)


def _call_fused(xp, w1, wt, wsk, sc1, sh1, sc2, sh2, sc3, sh3,
                H, W, Cin, planes, u):
    N = xp.shape[0]
    M = H * W
    kern = functools.partial(_fused_resblockup_kernel,
                             H=H, W=W, Cin=Cin, planes=planes, u=u)

    def full(a):
        nd = a.ndim
        return pl.BlockSpec(a.shape, lambda n, _nd=nd: (0,) * _nd)

    return pl.pallas_call(
        kern,
        out_shape=jax.ShapeDtypeStruct((N, M, u * u * planes), jnp.float32),
        grid=(N,),
        in_specs=[
            pl.BlockSpec((None, H + 2, W + 2, Cin), lambda n: (n, 0, 0, 0)),
            full(w1), full(wt), full(wsk),
            full(sc1), full(sh1), full(sc2), full(sh2), full(sc3), full(sh3),
        ],
        out_specs=pl.BlockSpec((None, M, u * u * planes), lambda n: (n, 0, 0)),
        compiler_params=pltpu.CompilerParams(
            dimension_semantics=("parallel",),        # 2 TCs on v7x each take images
            vmem_limit_bytes=32 * 1024 * 1024,        # explicit, safe on v5e/v6e/v7x
        ),
    )(xp, w1, wt, wsk, sc1, sh1, sc2, sh2, sc3, sh3)


# ------------------------------ module forward -------------------------------

def _bn_fold(bn, eps=1e-5, post_scale=1.0):
    gamma, beta, mean, var = bn
    scale = gamma / jnp.sqrt(var + eps)
    shift = beta - mean * scale
    scale = scale * post_scale
    shift = shift * post_scale
    return (scale.reshape(1, -1).astype(jnp.float32),
            shift.reshape(1, -1).astype(jnp.float32))


@functools.partial(jax.jit, static_argnames=("upsample",))
def res_block_up(x_nchw, params, upsample=2):
    u = upsample
    inv = jnp.float32(1.0 / 1.414)  # matches the module's literal constant (not sqrt(2))
    N, Cin, H, W = x_nchw.shape
    planes = params["w_conv"].shape[0]

    # NHWC + spatial pad=1 for the 3x3 conv; bf16 halves HBM traffic, MXU accumulates f32.
    x = jnp.transpose(x_nchw, (0, 2, 3, 1)).astype(jnp.float32)
    xp = jnp.pad(x, ((0, 0), (1, 1), (1, 1), (0, 0))).astype(jnp.bfloat16)

    # conv3x3 weight [Co,Ci,kh,kw] -> [kh*3+kw, Ci, Co]
    w1 = jnp.transpose(params["w_conv"], (2, 3, 1, 0)).reshape(9, Cin, planes) \
            .astype(jnp.bfloat16)
    # convT weight [Ci,Co,a,b] -> [Ci, a, b, Co] -> [Ci, u*u*Co]   (no overlap: k == stride)
    wt = jnp.transpose(params["w_convt"], (0, 2, 3, 1)).reshape(planes, u * u * planes) \
            .astype(jnp.bfloat16)
    # 1x1 skip conv weight [Co,Ci,1,1] -> [Ci, Co]
    wsk = params["w_skip"][:, :, 0, 0].T.astype(jnp.bfloat16)

    sc1, sh1 = _bn_fold(params["bn1"])
    sc2, sh2 = _bn_fold(params["bn2"], post_scale=inv)   # fold 1/1.414 into BN2
    sc3, sh3 = _bn_fold(params["bn3"], post_scale=inv)   # fold 1/1.414 into BN3

    out_flat = _call_fused(xp, w1, wt, wsk, sc1, sh1, sc2, sh2, sc3, sh3,
                           H, W, Cin, planes, u)         # (N, H*W, u*u*planes)

    # Single output-layout pass: pixel-shuffle + NCHW in one XLA transpose of the final output.
    out = (out_flat.reshape(N, H, W, u, u, planes)
           .transpose(0, 5, 1, 3, 2, 4)
           .reshape(N, planes, H * u, W * u))
    return out


# ------------------------------ pure-JAX reference ---------------------------

def reference(x_nchw, params, u=2, eps=1e-5):
    x = x_nchw.astype(jnp.float32)
    N, C, H, W = x.shape

    def bn(y, p):
        g, b, m, v = p
        return (y - m[None, :, None, None]) / jnp.sqrt(v[None, :, None, None] + eps) \
            * g[None, :, None, None] + b[None, :, None, None]

    Wc = params["w_conv"]
    xp = jnp.pad(x, ((0, 0), (0, 0), (1, 1), (1, 1)))
    y = jnp.zeros((N, Wc.shape[0], H, W), jnp.float32)
    for kh in range(3):
        for kw in range(3):
            y = y + jnp.einsum("nchw,oc->nohw",
                               xp[:, :, kh:kh + H, kw:kw + W], Wc[:, :, kh, kw])
    y = jnp.maximum(bn(y, params["bn1"]), 0.0)

    Wt = params["w_convt"]                      # [Ci, Co, u, u]
    t = jnp.einsum("nchw,cokl->nohkwl", y, Wt)  # oh = h*u + k, ow = w*u + l
    main = bn(t.reshape(N, Wt.shape[1], H * u, W * u), params["bn2"])

    xu = jnp.repeat(jnp.repeat(x, u, axis=2), u, axis=3)
    res = jnp.einsum("nchw,oc->nohw", xu, params["w_skip"][:, :, 0, 0])
    res = bn(res, params["bn3"])
    return jnp.maximum((res + main) / 1.414, 0.0)


# ------------------------------ main ------------------------------------------

if __name__ == "__main__":
    N, Cin, H, W = 2, 4, 16, 16
    planes, u = 8, 2

    key = jax.random.PRNGKey(0)
    ks = jax.random.split(key, 16)

    def bn_params(k, c):
        k0, k1, k2, k3 = jax.random.split(k, 4)
        return (1.0 + 0.1 * jax.random.normal(k0, (c,)),
                0.1 * jax.random.normal(k1, (c,)),
                0.1 * jax.random.normal(k2, (c,)),
                1.0 + 0.1 * jnp.abs(jax.random.normal(k3, (c,))))

    params = {
        "w_conv": 0.1 * jax.random.normal(ks[0], (planes, Cin, 3, 3), jnp.float32),
        "w_convt": 0.1 * jax.random.normal(ks[1], (planes, planes, u, u), jnp.float32),
        "w_skip": 0.1 * jax.random.normal(ks[2], (planes, Cin, 1, 1), jnp.float32),
        "bn1": bn_params(ks[3], planes),
        "bn2": bn_params(ks[4], planes),
        "bn3": bn_params(ks[5], planes),
    }

    x = jax.random.normal(ks[6], (N, Cin, H, W), jnp.float32)

    out = jax.block_until_ready(res_block_up(x, params, upsample=u))
    ref = jax.block_until_ready(reference(x, params, u=u))

    assert out.shape == (N, planes, H * u, W * u), out.shape
    # bf16 operands (f32 accumulation) -> loosened tolerance vs the pure-f32 reference.
    assert jnp.allclose(out, ref, atol=5e-2, rtol=5e-2), \
        float(jnp.max(jnp.abs(out - ref)))

    print("KERNEL_OK")
</pallas_src>

<mosaic_0001>
module attributes {stable_mosaic.version = 11 : i64} {
  func.func @_fused_resblockup_kernel(%arg0: i32, %arg1: memref<1x18x18x4xbf16, #tpu.memory_space<vmem>>, %arg2: memref<9x4x8xbf16, #tpu.memory_space<vmem>>, %arg3: memref<8x32xbf16, #tpu.memory_space<vmem>>, %arg4: memref<4x8xbf16, #tpu.memory_space<vmem>>, %arg5: memref<1x8xf32, #tpu.memory_space<vmem>>, %arg6: memref<1x8xf32, #tpu.memory_space<vmem>>, %arg7: memref<1x8xf32, #tpu.memory_space<vmem>>, %arg8: memref<1x8xf32, #tpu.memory_space<vmem>>, %arg9: memref<1x8xf32, #tpu.memory_space<vmem>>, %arg10: memref<1x8xf32, #tpu.memory_space<vmem>>, %arg11: memref<1x256x32xf32, #tpu.memory_space<vmem>>) attributes {dimension_semantics = [#tpu.dimension_semantics<parallel>], iteration_bounds = array<i64: 2>, scalar_prefetch = 0 : i64, scratch_operands = 0 : i64, tpu.core_type = #tpu.core_type<tc>, window_params = [{transform_indices = @transform_0, window_bounds = array<i64: 1, 18, 18, 4>}, {pipeline_mode = #tpu.pipeline_mode<synchronous>, transform_indices = @transform_1, window_bounds = array<i64: 9, 4, 8>}, {pipeline_mode = #tpu.pipeline_mode<synchronous>, transform_indices = @transform_2, window_bounds = array<i64: 8, 32>}, {pipeline_mode = #tpu.pipeline_mode<synchronous>, transform_indices = @transform_3, window_bounds = array<i64: 4, 8>}, {pipeline_mode = #tpu.pipeline_mode<synchronous>, transform_indices = @transform_4, window_bounds = array<i64: 1, 8>}, {pipeline_mode = #tpu.pipeline_mode<synchronous>, transform_indices = @transform_5, window_bounds = array<i64: 1, 8>}, {pipeline_mode = #tpu.pipeline_mode<synchronous>, transform_indices = @transform_6, window_bounds = array<i64: 1, 8>}, {pipeline_mode = #tpu.pipeline_mode<synchronous>, transform_indices = @transform_7, window_bounds = array<i64: 1, 8>}, {pipeline_mode = #tpu.pipeline_mode<synchronous>, transform_indices = @transform_8, window_bounds = array<i64: 1, 8>}, {pipeline_mode = #tpu.pipeline_mode<synchronous>, transform_indices = @transform_9, window_bounds = array<i64: 1, 8>}, {transform_indices = @transform_10, window_bounds = array<i64: 1, 256, 32>}]} {
    %cst = arith.constant 0.000000e+00 : f32
    %0 = vector.broadcast %cst : f32 to vector<256x8xf32>
    %c0 = arith.constant 0 : index
    %c0_0 = arith.constant 0 : index
    %c0_1 = arith.constant 0 : index
    %c0_2 = arith.constant 0 : index
    %1 = vector.load %arg1[%c0, %c0_0, %c0_1, %c0_2] : memref<1x18x18x4xbf16, #tpu.memory_space<vmem>>, vector<1x16x16x4xbf16>
    %2 = vector.shape_cast %1 : vector<1x16x16x4xbf16> to vector<16x16x4xbf16>
    %3 = vector.shape_cast %2 : vector<16x16x4xbf16> to vector<256x4xbf16>
    %c0_3 = arith.constant 0 : index
    %c0_4 = arith.constant 0 : index
    %c0_5 = arith.constant 0 : index
    %4 = vector.load %arg2[%c0_3, %c0_4, %c0_5] : memref<9x4x8xbf16, #tpu.memory_space<vmem>>, vector<1x4x8xbf16>
    %5 = vector.shape_cast %4 : vector<1x4x8xbf16> to vector<4x8xbf16>
    %cst_6 = arith.constant dense<0.000000e+00> : vector<256x8xf32>
    %6 = tpu.matmul %3, %5, %cst_6 {dimension_numbers = #tpu.dot_dimension_numbers<[1], [0], [0], [1], [0, 0, 1, 1], [], []>} : vector<256x4xbf16>, vector<4x8xbf16>, vector<256x8xf32> -> vector<256x8xf32>
    %7 = arith.addf %0, %6 : vector<256x8xf32>
    %c0_7 = arith.constant 0 : index
    %c0_8 = arith.constant 0 : index
    %c1 = arith.constant 1 : index
    %c0_9 = arith.constant 0 : index
    %8 = vector.load %arg1[%c0_7, %c0_8, %c1, %c0_9] : memref<1x18x18x4xbf16, #tpu.memory_space<vmem>>, vector<1x16x16x4xbf16>
    %9 = vector.shape_cast %8 : vector<1x16x16x4xbf16> to vector<16x16x4xbf16>
    %10 = vector.shape_cast %9 : vector<16x16x4xbf16> to vector<256x4xbf16>
    %c1_10 = arith.constant 1 : index
    %c0_11 = arith.constant 0 : index
    %c0_12 = arith.constant 0 : index
    %11 = vector.load %arg2[%c1_10, %c0_11, %c0_12] : memref<9x4x8xbf16, #tpu.memory_space<vmem>>, vector<1x4x8xbf16>
    %12 = vector.shape_cast %11 : vector<1x4x8xbf16> to vector<4x8xbf16>
    %cst_13 = arith.constant dense<0.000000e+00> : vector<256x8xf32>
    %13 = tpu.matmul %10, %12, %cst_13 {dimension_numbers = #tpu.dot_dimension_numbers<[1], [0], [0], [1], [0, 0, 1, 1], [], []>} : vector<256x4xbf16>, vector<4x8xbf16>, vector<256x8xf32> -> vector<256x8xf32>
    %14 = arith.addf %7, %13 : vector<256x8xf32>
    %c0_14 = arith.constant 0 : index
    %c0_15 = arith.constant 0 : index
    %c2 = arith.constant 2 : index
    %c0_16 = arith.constant 0 : index
    %15 = vector.load %arg1[%c0_14, %c0_15, %c2, %c0_16] : memref<1x18x18x4xbf16, #tpu.memory_space<vmem>>, vector<1x16x16x4xbf16>
    %16 = vector.shape_cast %15 : vector<1x16x16x4xbf16> to vector<16x16x4xbf16>
    %17 = vector.shape_cast %16 : vector<16x16x4xbf16> to vector<256x4xbf16>
    %c2_17 = arith.constant 2 : index
    %c0_18 = arith.constant 0 : index
    %c0_19 = arith.constant 0 : index
    %18 = vector.load %arg2[%c2_17, %c0_18, %c0_19] : memref<9x4x8xbf16, #tpu.memory_space<vmem>>, vector<1x4x8xbf16>
    %19 = vector.shape_cast %18 : vector<1x4x8xbf16> to vector<4x8xbf16>
    %cst_20 = arith.constant dense<0.000000e+00> : vector<256x8xf32>
    %20 = tpu.matmul %17, %19, %cst_20 {dimension_numbers = #tpu.dot_dimension_numbers<[1], [0], [0], [1], [0, 0, 1, 1], [], []>} : vector<256x4xbf16>, vector<4x8xbf16>, vector<256x8xf32> -> vector<256x8xf32>
    %21 = arith.addf %14, %20 : vector<256x8xf32>
    %c0_21 = arith.constant 0 : index
    %c1_22 = arith.constant 1 : index
    %c0_23 = arith.constant 0 : index
    %c0_24 = arith.constant 0 : index
    %22 = vector.load %arg1[%c0_21, %c1_22, %c0_23, %c0_24] : memref<1x18x18x4xbf16, #tpu.memory_space<vmem>>, vector<1x16x16x4xbf16>
    %23 = vector.shape_cast %22 : vector<1x16x16x4xbf16> to vector<16x16x4xbf16>
    %24 = vector.shape_cast %23 : vector<16x16x4xbf16> to vector<256x4xbf16>
    %c3 = arith.constant 3 : index
    %c0_25 = arith.constant 0 : index
    %c0_26 = arith.constant 0 : index
    %25 = vector.load %arg2[%c3, %c0_25, %c0_26] : memref<9x4x8xbf16, #tpu.memory_space<vmem>>, vector<1x4x8xbf16>
    %26 = vector.shape_cast %25 : vector<1x4x8xbf16> to vector<4x8xbf16>
    %cst_27 = arith.constant dense<0.000000e+00> : vector<256x8xf32>
    %27 = tpu.matmul %24, %26, %cst_27 {dimension_numbers = #tpu.dot_dimension_numbers<[1], [0], [0], [1], [0, 0, 1, 1], [], []>} : vector<256x4xbf16>, vector<4x8xbf16>, vector<256x8xf32> -> vector<256x8xf32>
    %28 = arith.addf %21, %27 : vector<256x8xf32>
    %c0_28 = arith.constant 0 : index
    %c1_29 = arith.constant 1 : index
    %c1_30 = arith.constant 1 : index
    %c0_31 = arith.constant 0 : index
    %29 = vector.load %arg1[%c0_28, %c1_29, %c1_30, %c0_31] : memref<1x18x18x4xbf16, #tpu.memory_space<vmem>>, vector<1x16x16x4xbf16>
    %30 = vector.shape_cast %29 : vector<1x16x16x4xbf16> to vector<16x16x4xbf16>
    %31 = vector.shape_cast %30 : vector<16x16x4xbf16> to vector<256x4xbf16>
    %c4 = arith.constant 4 : index
    %c0_32 = arith.constant 0 : index
    %c0_33 = arith.constant 0 : index
    %32 = vector.load %arg2[%c4, %c0_32, %c0_33] : memref<9x4x8xbf16, #tpu.memory_space<vmem>>, vector<1x4x8xbf16>
    %33 = vector.shape_cast %32 : vector<1x4x8xbf16> to vector<4x8xbf16>
    %cst_34 = arith.constant dense<0.000000e+00> : vector<256x8xf32>
    %34 = tpu.matmul %31, %33, %cst_34 {dimension_numbers = #tpu.dot_dimension_numbers<[1], [0], [0], [1], [0, 0, 1, 1], [], []>} : vector<256x4xbf16>, vector<4x8xbf16>, vector<256x8xf32> -> vector<256x8xf32>
    %35 = arith.addf %28, %34 : vector<256x8xf32>
    %c0_35 = arith.constant 0 : index
    %c1_36 = arith.constant 1 : index
    %c2_37 = arith.constant 2 : index
    %c0_38 = arith.constant 0 : index
    %36 = vector.load %arg1[%c0_35, %c1_36, %c2_37, %c0_38] : memref<1x18x18x4xbf16, #tpu.memory_space<vmem>>, vector<1x16x16x4xbf16>
    %37 = vector.shape_cast %36 : vector<1x16x16x4xbf16> to vector<16x16x4xbf16>
    %38 = vector.shape_cast %37 : vector<16x16x4xbf16> to vector<256x4xbf16>
    %c5 = arith.constant 5 : index
    %c0_39 = arith.constant 0 : index
    %c0_40 = arith.constant 0 : index
    %39 = vector.load %arg2[%c5, %c0_39, %c0_40] : memref<9x4x8xbf16, #tpu.memory_space<vmem>>, vector<1x4x8xbf16>
    %40 = vector.shape_cast %39 : vector<1x4x8xbf16> to vector<4x8xbf16>
    %cst_41 = arith.constant dense<0.000000e+00> : vector<256x8xf32>
    %41 = tpu.matmul %38, %40, %cst_41 {dimension_numbers = #tpu.dot_dimension_numbers<[1], [0], [0], [1], [0, 0, 1, 1], [], []>} : vector<256x4xbf16>, vector<4x8xbf16>, vector<256x8xf32> -> vector<256x8xf32>
    %42 = arith.addf %35, %41 : vector<256x8xf32>
    %c0_42 = arith.constant 0 : index
    %c2_43 = arith.constant 2 : index
    %c0_44 = arith.constant 0 : index
    %c0_45 = arith.constant 0 : index
    %43 = vector.load %arg1[%c0_42, %c2_43, %c0_44, %c0_45] : memref<1x18x18x4xbf16, #tpu.memory_space<vmem>>, vector<1x16x16x4xbf16>
    %44 = vector.shape_cast %43 : vector<1x16x16x4xbf16> to vector<16x16x4xbf16>
    %45 = vector.shape_cast %44 : vector<16x16x4xbf16> to vector<256x4xbf16>
    %c6 = arith.constant 6 : index
    %c0_46 = arith.constant 0 : index
    %c0_47 = arith.constant 0 : index
    %46 = vector.load %arg2[%c6, %c0_46, %c0_47] : memref<9x4x8xbf16, #tpu.memory_space<vmem>>, vector<1x4x8xbf16>
    %47 = vector.shape_cast %46 : vector<1x4x8xbf16> to vector<4x8xbf16>
    %cst_48 = arith.constant dense<0.000000e+00> : vector<256x8xf32>
    %48 = tpu.matmul %45, %47, %cst_48 {dimension_numbers = #tpu.dot_dimension_numbers<[1], [0], [0], [1], [0, 0, 1, 1], [], []>} : vector<256x4xbf16>, vector<4x8xbf16>, vector<256x8xf32> -> vector<256x8xf32>
    %49 = arith.addf %42, %48 : vector<256x8xf32>
    %c0_49 = arith.constant 0 : index
    %c2_50 = arith.constant 2 : index
    %c1_51 = arith.constant 1 : index
    %c0_52 = arith.constant 0 : index
    %50 = vector.load %arg1[%c0_49, %c2_50, %c1_51, %c0_52] : memref<1x18x18x4xbf16, #tpu.memory_space<vmem>>, vector<1x16x16x4xbf16>
    %51 = vector.shape_cast %50 : vector<1x16x16x4xbf16> to vector<16x16x4xbf16>
    %52 = vector.shape_cast %51 : vector<16x16x4xbf16> to vector<256x4xbf16>
    %c7 = arith.constant 7 : index
    %c0_53 = arith.constant 0 : index
    %c0_54 = arith.constant 0 : index
    %53 = vector.load %arg2[%c7, %c0_53, %c0_54] : memref<9x4x8xbf16, #tpu.memory_space<vmem>>, vector<1x4x8xbf16>
    %54 = vector.shape_cast %53 : vector<1x4x8xbf16> to vector<4x8xbf16>
    %cst_55 = arith.constant dense<0.000000e+00> : vector<256x8xf32>
    %55 = tpu.matmul %52, %54, %cst_55 {dimension_numbers = #tpu.dot_dimension_numbers<[1], [0], [0], [1], [0, 0, 1, 1], [], []>} : vector<256x4xbf16>, vector<4x8xbf16>, vector<256x8xf32> -> vector<256x8xf32>
    %56 = arith.addf %49, %55 : vector<256x8xf32>
    %c0_56 = arith.constant 0 : index
    %c2_57 = arith.constant 2 : index
    %c2_58 = arith.constant 2 : index
    %c0_59 = arith.constant 0 : index
    %57 = vector.load %arg1[%c0_56, %c2_57, %c2_58, %c0_59] : memref<1x18x18x4xbf16, #tpu.memory_space<vmem>>, vector<1x16x16x4xbf16>
    %58 = vector.shape_cast %57 : vector<1x16x16x4xbf16> to vector<16x16x4xbf16>
    %59 = vector.shape_cast %58 : vector<16x16x4xbf16> to vector<256x4xbf16>
    %c8 = arith.constant 8 : index
    %c0_60 = arith.constant 0 : index
    %c0_61 = arith.constant 0 : index
    %60 = vector.load %arg2[%c8, %c0_60, %c0_61] : memref<9x4x8xbf16, #tpu.memory_space<vmem>>, vector<1x4x8xbf16>
    %61 = vector.shape_cast %60 : vector<1x4x8xbf16> to vector<4x8xbf16>
    %cst_62 = arith.constant dense<0.000000e+00> : vector<256x8xf32>
    %62 = tpu.matmul %59, %61, %cst_62 {dimension_numbers = #tpu.dot_dimension_numbers<[1], [0], [0], [1], [0, 0, 1, 1], [], []>} : vector<256x4xbf16>, vector<4x8xbf16>, vector<256x8xf32> -> vector<256x8xf32>
    %63 = arith.addf %56, %62 : vector<256x8xf32>
    %c0_63 = arith.constant 0 : index
    %c0_64 = arith.constant 0 : index
    %64 = vector.load %arg5[%c0_63, %c0_64] : memref<1x8xf32, #tpu.memory_space<vmem>>, vector<1x8xf32>
    %65 = vector.broadcast %64 : vector<1x8xf32> to vector<256x8xf32>
    %66 = arith.mulf %63, %65 : vector<256x8xf32>
    %c0_65 = arith.constant 0 : index
    %c0_66 = arith.constant 0 : index
    %67 = vector.load %arg6[%c0_65, %c0_66] : memref<1x8xf32, #tpu.memory_space<vmem>>, vector<1x8xf32>
    %68 = vector.broadcast %67 : vector<1x8xf32> to vector<256x8xf32>
    %69 = arith.addf %66, %68 : vector<256x8xf32>
    %cst_67 = arith.constant 0.000000e+00 : f32
    %70 = vector.broadcast %cst_67 : f32 to vector<256x8xf32>
    %71 = arith.maximumf %69, %70 : vector<256x8xf32>
    %72 = arith.truncf %71 : vector<256x8xf32> to vector<256x8xbf16>
    %c0_68 = arith.constant 0 : index
    %c0_69 = arith.constant 0 : index
    %73 = vector.load %arg3[%c0_68, %c0_69] : memref<8x32xbf16, #tpu.memory_space<vmem>>, vector<8x32xbf16>
    %cst_70 = arith.constant dense<0.000000e+00> : vector<256x32xf32>
    %74 = tpu.matmul %72, %73, %cst_70 {dimension_numbers = #tpu.dot_dimension_numbers<[1], [0], [0], [1], [0, 0, 1, 1], [], []>} : vector<256x8xbf16>, vector<8x32xbf16>, vector<256x32xf32> -> vector<256x32xf32>
    %c0_71 = arith.constant 0 : index
    %c0_72 = arith.constant 0 : index
    %75 = vector.load %arg4[%c0_71, %c0_72] : memref<4x8xbf16, #tpu.memory_space<vmem>>, vector<4x8xbf16>
    %cst_73 = arith.constant dense<0.000000e+00> : vector<256x8xf32>
    %76 = tpu.matmul %31, %75, %cst_73 {dimension_numbers = #tpu.dot_dimension_numbers<[1], [0], [0], [1], [0, 0, 1, 1], [], []>} : vector<256x4xbf16>, vector<4x8xbf16>, vector<256x8xf32> -> vector<256x8xf32>
    %c0_74 = arith.constant 0 : index
    %c0_75 = arith.constant 0 : index
    %77 = vector.load %arg9[%c0_74, %c0_75] : memref<1x8xf32, #tpu.memory_space<vmem>>, vector<1x8xf32>
    %78 = vector.broadcast %77 : vector<1x8xf32> to vector<256x8xf32>
    %79 = arith.mulf %76, %78 : vector<256x8xf32>
    %c0_76 = arith.constant 0 : index
    %c0_77 = arith.constant 0 : index
    %80 = vector.load %arg10[%c0_76, %c0_77] : memref<1x8xf32, #tpu.memory_space<vmem>>, vector<1x8xf32>
    %81 = vector.broadcast %80 : vector<1x8xf32> to vector<256x8xf32>
    %82 = arith.addf %79, %81 : vector<256x8xf32>
    %83 = vector.extract_strided_slice %74 {offsets = [0, 0], sizes = [256, 8], strides = [1, 1]} : vector<256x32xf32> to vector<256x8xf32>
    %c0_78 = arith.constant 0 : index
    %c0_79 = arith.constant 0 : index
    %84 = vector.load %arg7[%c0_78, %c0_79] : memref<1x8xf32, #tpu.memory_space<vmem>>, vector<1x8xf32>
    %85 = vector.broadcast %84 : vector<1x8xf32> to vector<256x8xf32>
    %86 = arith.mulf %83, %85 : vector<256x8xf32>
    %c0_80 = arith.constant 0 : index
    %c0_81 = arith.constant 0 : index
    %87 = vector.load %arg8[%c0_80, %c0_81] : memref<1x8xf32, #tpu.memory_space<vmem>>, vector<1x8xf32>
    %88 = vector.broadcast %87 : vector<1x8xf32> to vector<256x8xf32>
    %89 = arith.addf %86, %88 : vector<256x8xf32>
    %90 = arith.addf %89, %82 : vector<256x8xf32>
    %cst_82 = arith.constant 0.000000e+00 : f32
    %91 = vector.broadcast %cst_82 : f32 to vector<256x8xf32>
    %92 = arith.maximumf %90, %91 : vector<256x8xf32>
    %93 = vector.extract_strided_slice %74 {offsets = [0, 8], sizes = [256, 8], strides = [1, 1]} : vector<256x32xf32> to vector<256x8xf32>
    %c0_83 = arith.constant 0 : index
    %c0_84 = arith.constant 0 : index
    %94 = vector.load %arg7[%c0_83, %c0_84] : memref<1x8xf32, #tpu.memory_space<vmem>>, vector<1x8xf32>
    %95 = vector.broadcast %94 : vector<1x8xf32> to vector<256x8xf32>
    %96 = arith.mulf %93, %95 : vector<256x8xf32>
    %c0_85 = arith.constant 0 : index
    %c0_86 = arith.constant 0 : index
    %97 = vector.load %arg8[%c0_85, %c0_86] : memref<1x8xf32, #tpu.memory_space<vmem>>, vector<1x8xf32>
    %98 = vector.broadcast %97 : vector<1x8xf32> to vector<256x8xf32>
    %99 = arith.addf %96, %98 : vector<256x8xf32>
    %100 = arith.addf %99, %82 : vector<256x8xf32>
    %cst_87 = arith.constant 0.000000e+00 : f32
    %101 = vector.broadcast %cst_87 : f32 to vector<256x8xf32>
    %102 = arith.maximumf %100, %101 : vector<256x8xf32>
    %103 = vector.extract_strided_slice %74 {offsets = [0, 16], sizes = [256, 8], strides = [1, 1]} : vector<256x32xf32> to vector<256x8xf32>
    %c0_88 = arith.constant 0 : index
    %c0_89 = arith.constant 0 : index
    %104 = vector.load %arg7[%c0_88, %c0_89] : memref<1x8xf32, #tpu.memory_space<vmem>>, vector<1x8xf32>
    %105 = vector.broadcast %104 : vector<1x8xf32> to vector<256x8xf32>
    %106 = arith.mulf %103, %105 : vector<256x8xf32>
    %c0_90 = arith.constant 0 : index
    %c0_91 = arith.constant 0 : index
    %107 = vector.load %arg8[%c0_90, %c0_91] : memref<1x8xf32, #tpu.memory_space<vmem>>, vector<1x8xf32>
    %108 = vector.broadcast %107 : vector<1x8xf32> to vector<256x8xf32>
    %109 = arith.addf %106, %108 : vector<256x8xf32>
    %110 = arith.addf %109, %82 : vector<256x8xf32>
    %cst_92 = arith.constant 0.000000e+00 : f32
    %111 = vector.broadcast %cst_92 : f32 to vector<256x8xf32>
    %112 = arith.maximumf %110, %111 : vector<256x8xf32>
    %113 = vector.extract_strided_slice %74 {offsets = [0, 24], sizes = [256, 8], strides = [1, 1]} : vector<256x32xf32> to vector<256x8xf32>
    %c0_93 = arith.constant 0 : index
    %c0_94 = arith.constant 0 : index
    %114 = vector.load %arg7[%c0_93, %c0_94] : memref<1x8xf32, #tpu.memory_space<vmem>>, vector<1x8xf32>
    %115 = vector.broadcast %114 : vector<1x8xf32> to vector<256x8xf32>
    %116 = arith.mulf %113, %115 : vector<256x8xf32>
    %c0_95 = arith.constant 0 : index
    %c0_96 = arith.constant 0 : index
    %117 = vector.load %arg8[%c0_95, %c0_96] : memref<1x8xf32, #tpu.memory_space<vmem>>, vector<1x8xf32>
    %118 = vector.broadcast %117 : vector<1x8xf32> to vector<256x8xf32>
    %119 = arith.addf %116, %118 : vector<256x8xf32>
    %120 = arith.addf %119, %82 : vector<256x8xf32>
    %cst_97 = arith.constant 0.000000e+00 : f32
    %121 = vector.broadcast %cst_97 : f32 to vector<256x8xf32>
    %122 = arith.maximumf %120, %121 : vector<256x8xf32>
    %123 = tpu.concatenate %92, %102, %112, %122 in 1 : vector<256x8xf32>, vector<256x8xf32>, vector<256x8xf32>, vector<256x8xf32> -> vector<256x32xf32>
    %c0_98 = arith.constant 0 : index
    %c0_99 = arith.constant 0 : index
    %c0_100 = arith.constant 0 : index
    %124 = vector.load %arg11[%c0_98, %c0_99, %c0_100] : memref<1x256x32xf32, #tpu.memory_space<vmem>>, vector<1x256x32xf32>
    %125 = vector.shape_cast %124 : vector<1x256x32xf32> to vector<256x32xf32>
    %126 = vector.shape_cast %123 : vector<256x32xf32> to vector<1x256x32xf32>
    tpu.vector_store %arg11[%c0_98, %c0_99, %c0_100], %126 {strides = array<i32>} : memref<1x256x32xf32, #tpu.memory_space<vmem>>, vector<1x256x32xf32>,
    return
  }
  func.func @transform_0(%arg0: i32) -> (i32, i32, i32, i32) {
    %c0_i32 = arith.constant 0 : i32
    %c0_i32_0 = arith.constant 0 : i32
    %c0_i32_1 = arith.constant 0 : i32
    %c0_i32_2 = arith.constant 0 : i32
    return %arg0, %c0_i32, %c0_i32_0, %c0_i32_1 : i32, i32, i32, i32
  }
  func.func @transform_1(%arg0: i32) -> (i32, i32, i32) {
    %c0_i32 = arith.constant 0 : i32
    %c0_i32_0 = arith.constant 0 : i32
    %c0_i32_1 = arith.constant 0 : i32
    %c0_i32_2 = arith.constant 0 : i32
    return %c0_i32, %c0_i32_0, %c0_i32_1 : i32, i32, i32
  }
  func.func @transform_2(%arg0: i32) -> (i32, i32) {
    %c0_i32 = arith.constant 0 : i32
    %c0_i32_0 = arith.constant 0 : i32
    %c0_i32_1 = arith.constant 0 : i32
    return %c0_i32, %c0_i32_0 : i32, i32
  }
  func.func @transform_3(%arg0: i32) -> (i32, i32) {
    %c0_i32 = arith.constant 0 : i32
    %c0_i32_0 = arith.constant 0 : i32
    %c0_i32_1 = arith.constant 0 : i32
    return %c0_i32, %c0_i32_0 : i32, i32
  }
  func.func @transform_4(%arg0: i32) -> (i32, i32) {
    %c0_i32 = arith.constant 0 : i32
    %c0_i32_0 = arith.constant 0 : i32
    %c0_i32_1 = arith.constant 0 : i32
    return %c0_i32, %c0_i32_0 : i32, i32
  }
  func.func @transform_5(%arg0: i32) -> (i32, i32) {
    %c0_i32 = arith.constant 0 : i32
    %c0_i32_0 = arith.constant 0 : i32
    %c0_i32_1 = arith.constant 0 : i32
    return %c0_i32, %c0_i32_0 : i32, i32
  }
  func.func @transform_6(%arg0: i32) -> (i32, i32) {
    %c0_i32 = arith.constant 0 : i32
    %c0_i32_0 = arith.constant 0 : i32
    %c0_i32_1 = arith.constant 0 : i32
    return %c0_i32, %c0_i32_0 : i32, i32
  }
  func.func @transform_7(%arg0: i32) -> (i32, i32) {
    %c0_i32 = arith.constant 0 : i32
    %c0_i32_0 = arith.constant 0 : i32
    %c0_i32_1 = arith.constant 0 : i32
    return %c0_i32, %c0_i32_0 : i32, i32
  }
  func.func @transform_8(%arg0: i32) -> (i32, i32) {
    %c0_i32 = arith.constant 0 : i32
    %c0_i32_0 = arith.constant 0 : i32
    %c0_i32_1 = arith.constant 0 : i32
    return %c0_i32, %c0_i32_0 : i32, i32
  }
  func.func @transform_9(%arg0: i32) -> (i32, i32) {
    %c0_i32 = arith.constant 0 : i32
    %c0_i32_0 = arith.constant 0 : i32
    %c0_i32_1 = arith.constant 0 : i32
    return %c0_i32, %c0_i32_0 : i32, i32
  }
  func.func @transform_10(%arg0: i32) -> (i32, i32, i32) {
    %c0_i32 = arith.constant 0 : i32
    %c0_i32_0 = arith.constant 0 : i32
    %c0_i32_1 = arith.constant 0 : i32
    return %arg0, %c0_i32, %c0_i32_0 : i32, i32, i32
  }
}

</mosaic_0001>

<bundles_post_ra>
// kernel: res_block_up.1
= control target key start
LH: loop header
LB: loop body
LE: loop exit
PB: predicated region body
PF: predicated region fallthrough
CT: control target
= control target key end

     0   :  { %s8150_s13 = smov 0   ;;  %s11067_s0 = inlined_call_operand.vmem [shape: bf16[2,18,18,4], index: 0, kind: input, shape index: {}]   ;;  %s11068_s1 = inlined_call_operand.vmem [shape: bf16[9,4,8], index: 1, kind: input, shape index: {}]   ;;  %s11069_s2 = inlined_call_operand.vmem [shape: bf16[8,32], index: 2, kind: input, shape index: {}]   ;;  %s11070_s3 = inlined_call_operand.vmem [shape: bf16[4,8], index: 3, kind: input, shape index: {}]   ;;  %s11071_s4 = inlined_call_operand.vmem [shape: f32[1,8], index: 4, kind: input, shape index: {}]   ;;  %s11072_s5 = inlined_call_operand.vmem [shape: f32[1,8], index: 5, kind: input, shape index: {}]   ;;  %s11073_s6 = inlined_call_operand.vmem [shape: f32[1,8], index: 6, kind: input, shape index: {}]   ;;  %s11074_s7 = inlined_call_operand.vmem [shape: f32[1,8], index: 7, kind: input, shape index: {}]   ;;  %s11075_s8 = inlined_call_operand.vmem [shape: f32[1,8], index: 8, kind: input, shape index: {}]   ;;  %s11076_s9 = inlined_call_operand.vmem [shape: f32[1,8], index: 9, kind: input, shape index: {}]   ;;  %s11077_s10 = inlined_call_operand.vmem [shape: f32[2,256,32], index: 10, kind: output, shape index: {}]  }
   0x1 LB: > { %s6554_s14 = sadd.s32 4294967295, %s8090_s13   ;;  %p6558_p0 = scmp.ge.s32.totalorder %s8090_s13, 1  ;;  %s8090_s13 = sphi %s8150_s13, %s20_s13  }
   0x2   : > { %p312_p1 = scmp.lt.s32.totalorder %s8090_s13, 3 }
   0x4   : > { %p313_p2 = pnand %p6558_p0, %p312_p1 }
   0x6   : > { %316 = sbr.rel (%p313_p2) target bundleno = 1185 (0x4a1), region = 60 }
   0xd   : > { %vm896_vm0 = vcmask 1041408   ;;  %v6708_v0 = vld [vmem:[%s11068_s1 + $0x6] sm:$0x3]  ;;  %p350_p3 = scmp.lt.s32.totalorder %s6554_s14, 1  ;;  %v6789_v2 = vld [vmem:[%s11068_s1 + $0x8] sm:$0x3] }
   0xe   : > { %7961 = vmatprep.subr.msk.bf16.mxu0 %vm896_vm0, %v6708_v0  ;;  %v8163_v1 = vsel %vm896_vm0, %v6708_v0, 0  ;;  %v6562_v3 = vld [vmem:[%s11068_s1 + $0x2] sm:$0x3]  ;;  %v393_v5 = vld [vmem:[%s11068_s1] sm:$0x3]  ;;  %vm847_vm1 = vcmask 31744  }
   0xf   : > { %11134 = vst [vmem:[#allocation2_spill] sm:$0xff] %v8163_v1  ;;  %7429 = vmatpush3.bf16.msra.mxu0 %v8163_v1  ;;  %s11268_s14 = smov (!%p350_p3, %s6554_s14), 1  ;;  %7958 = vmatprep.subr.msk.bf16.mxu1 %vm896_vm0, %v6562_v3  ;;  %v898_v4 = vsel %vm896_vm0, %v6562_v3, 0  ;;  %vm410_vm2 = vsmask.f32 3328  ;;  %v2700_v9 = vsel %vm896_vm0, %v6789_v2, 0 }
  0x10   : > { %7963 = vmatprep.subr.msk.bf16.mxu0 %vm896_vm0, %v6789_v2  ;;  %7327 = vmatpush3.bf16.msra.mxu1 %v898_v4  ;;  %s7970_s23 = smul.u32 216, %s11268_s14  ;;  %vm411_vm3 = vsmask.f32 7440  ;;  %v6854_v7 = vld [vmem:[%s11068_s1 + $0xa] sm:$0x3]  ;;  %v11135_v35 = vmov 0 }
  0x11   : > { %7959 = vmatprep.subr.msk.bf16.mxu1 %vm896_vm0, %v393_v5  ;;  %v8211_v20 = vsel %vm896_vm0, %v6854_v7, 0  ;;  %vm8219_vm4 = vmor %vm410_vm2, %vm411_vm3  ;;  %v8225_v40 = vsel %vm896_vm0, %v393_v5, 0  ;;  %vm1401_vm5 = vcmask 1042432   ;;  %vm1402_vm6 = vcmask 1046532   ;;  %s8092_s27 = smov 8   ;;  %s8093_s30 = smov 16  }
  0x12   : > { %s8185_s26 = scalar_lea.vmem %s11067_s0, %s7970_s23  ;;  %v11136_v35 = vsel %vm8219_vm4, 4294967295, %v11135_v35  ;;  %vm8705_vm7 = vmor %vm1401_vm5, %vm1402_vm6  ;;  %vm5096_vm8 = vcmask 1043456   ;;  %s8094_s11 = smov 24   ;;  %vm5047_vm9 = vcmask 64512   ;;  %vm6400_vm10 = vcmask 130048  }
  0x13   : > { %v7982_v6 = vld [vmem:[%s8185_s26 + $0xc] sm:$0xff]   ;;  %v7983_v8 = vld [vmem:[%s8185_s26 + $0x18] sm:$0xff]   ;;  %v7984_v10 = vld [vmem:[%s8185_s26 + $0x24] sm:$0xff]   ;;  %11137 = vst [vmem:[#allocation3_spill] sm:$0xff] %v11136_v35  ;;  %s7138_s22 = sshll.u32 %s11268_s14, 8  ;;  %vm6433_vm11 = vcmask 195584  }
  0x14   : > { %7430 = vmatprep.mubr.msk.bf16.mxu0 %vm847_vm1, %v7982_v6  ;;  %v8197_v11 = vld [vmem:[%s8185_s26] sm:$0xf]  ;;  %v8200_v12 = vld [vmem:[%s8185_s26 + $0x4] sm:$0xf]  ;;  %v394_v13 = vld [vmem:[%s8185_s26 + $0x8] sm:$0x1]  ;;  %s10484_s14 = scalar_lea.vmem %s11077_s10, %s7138_s22 }
  0x15   : > { %7431 = vmatmul.mubr.msk.bf16.vlgmr.msra.gmra.mrb[0].mxu0 %vm847_vm1, %v7983_v8  ;;  %v414_v14 = vshrl.u32 %v8197_v11, 16  ;;  %v417_v15 = vshll.u32 %v8197_v11, 16  ;;  %v423_v16 = vshll.u32 %v8200_v12, 16  ;;  %v427_v17 = vshrl.u32 %v8200_v12, 16  ;;  %v7985_v19 = vld [vmem:[%s8185_s26 + $0x30] sm:$0xff]   ;;  %v7986_v26 = vld [vmem:[%s8185_s26 + $0x3c] sm:$0xff]  }
  0x16   : > { %7463 = vmatpush3.bf16.msra.mxu0 %v2700_v9  ;;  %7434 = vmatprep.mubr.msk.bf16.mxu0 %vm847_vm1, %v7984_v10  ;;  %v433_v18 = vshll.u32 %v394_v13, 16  ;;  %v363_v25 = vld [vmem:[%s8185_s26 + $0xc] sm:$0xf]  ;;  %v364_v28 = vld [vmem:[%s8185_s26 + $0x10] sm:$0xf]  ;;  %vm6466_vm12 = vcmask 261120  }
  0x17   : > { %7964 = vmatprep.subr.msk.bf16.mxu0 %vm896_vm0, %v6854_v7  ;;  %v416_v21 = vrot.slane %v414_v14, 4  ;;  %v419_v22 = vrot.slane %v417_v15, 5  ;;  %v425_v23 = vrot.slane %v423_v16, 5  ;;  %v429_v24 = vrot.slane %v427_v17, 4  ;;  %v395_v29 = vld [vmem:[%s8185_s26 + $0x14] sm:$0x1] }
  0x18   : > { %v435_v27 = vrot.slane %v433_v18, 5  ;;  %v438_v30 = vshrl.u32 %v363_v25, 16  ;;  %v441_v33 = vshll.u32 %v363_v25, 16  ;;  %v447_v34 = vshll.u32 %v364_v28, 16  ;;  %v365_v39 = vld [vmem:[%s8185_s26 + $0x18] sm:$0xf] }
  0x19   : > { %v420_v31 = vor.u32 %v419_v22, %v416_v21  ;;  %v430_v32 = vor.u32 %v429_v24, %v425_v23  ;;  %v451_v37 = vshrl.u32 %v364_v28, 16  ;;  %v457_v38 = vshll.u32 %v395_v29, 16  ;;  %v366_v45 = vld [vmem:[%s8185_s26 + $0x1c] sm:$0xf]  ;;  %v396_v48 = vld [vmem:[%s8185_s26 + $0x20] sm:$0x1] }
  0x1a   : > { %v440_v36 = vrot.slane %v438_v30, 4  ;;  %v443_v43 = vrot.slane %v441_v33, 5  ;;  %v449_v44 = vrot.slane %v447_v34, 5  ;;  %v462_v49 = vshrl.u32 %v365_v39, 16  ;;  %v7987_v59 = vld [vmem:[%s8185_s26 + $0x48] sm:$0xff]   ;;  %v7988_v14 = vld [vmem:[%s8185_s26 + $0x54] sm:$0xff]  }
  0x1b   : > { %v421_v41 = vrot.slane %v420_v31, 4  ;;  %v431_v42 = vrot.slane %v430_v32, 4  ;;  %v453_v46 = vrot.slane %v451_v37, 4  ;;  %v459_v47 = vrot.slane %v457_v38, 5  ;;  %v367_v60 = vld [vmem:[%s8185_s26 + $0x24] sm:$0xf] }
  0x1c   : > { %v444_v53 = vor.u32 %v443_v43, %v440_v36  ;;  %v465_v54 = vshll.u32 %v365_v39, 16  ;;  %v464_v57 = vrot.slane %v462_v49, 4  ;;  %v471_v58 = vshll.u32 %v366_v45, 16  ;;  %v368_v61 = vld [vmem:[%s8185_s26 + $0x28] sm:$0xf] }
  0x1d   : > { %7435 = vmatmul.mubr.msk.bf16.gmra.mrb[4].mxu0 %vm847_vm1, %v7985_v19  ;;  %v426_v51 = vsel %vm8219_vm4, %v421_v41, %v425_v23  ;;  %v436_v52 = vsel %vm8219_vm4, %v431_v42, %v435_v27  ;;  %v454_v56 = vor.u32 %v453_v46, %v449_v44  ;;  %v475_v0 = vshrl.u32 %v366_v45, 16  ;;  %v397_v3 = vld [vmem:[%s8185_s26 + $0x2c] sm:$0x1]  ;;  %v369_v19 = vld [vmem:[%s8185_s26 + $0x30] sm:$0xf] }
  0x1e   : > { %7438 = vmatprep.mubr.msk.bf16.mxu0 %vm847_vm1, %v7986_v26  ;;  %v6563_v55 = vcombine.low %v426_v51, %v436_v52  ;;  %v445_v62 = vrot.slane %v444_v53, 4  ;;  %v467_v63 = vrot.slane %v465_v54, 5  ;;  %v481_v2 = vshll.u32 %v396_v48, 16  ;;  %v370_v25 = vld [vmem:[%s8185_s26 + $0x34] sm:$0xf]  ;;  %v7989_v52 = vld [vmem:[%s8185_s26 + $0x60] sm:$0xff]  }
  0x1f   : > { %v455_v4 = vrot.slane %v454_v56, 4  ;;  %v473_v5 = vrot.slane %v471_v58, 5  ;;  %v486_v6 = vshrl.u32 %v367_v60, 16  ;;  %v489_v7 = vshll.u32 %v367_v60, 16  ;;  %v398_v26 = vld [vmem:[%s8185_s26 + $0x38] sm:$0x1] }
  0x20   : > { %7328 = vmatprep.mubr.msk.bf16.mxu1 %vm847_vm1, %v6563_v55  ;;  %v450_v8 = vsel %vm8219_vm4, %v445_v62, %v449_v44  ;;  %v468_v9 = vor.u32 %v467_v63, %v464_v57  ;;  %v477_v10 = vrot.slane %v475_v0, 4  ;;  %v483_v13 = vrot.slane %v481_v2, 5  ;;  %v371_v41 = vld [vmem:[%s8185_s26 + $0x3c] sm:$0xf]  ;;  %v372_v46 = vld [vmem:[%s8185_s26 + $0x40] sm:$0xf] }
  0x21   : > { %v460_v15 = vsel %vm8219_vm4, %v455_v4, %v459_v47  ;;  %v488_v16 = vrot.slane %v486_v6, 4  ;;  %v491_v17 = vrot.slane %v489_v7, 5  ;;  %v495_v18 = vshll.u32 %v368_v61, 16  ;;  %v6827_v35 = vld [vmem:[%s8185_s26 + $0x48] sm:$0xe] }
  0x22   : > { %v6564_v21 = vcombine.low %v450_v8, %v460_v15  ;;  %v469_v22 = vrot.slane %v468_v9, 4  ;;  %v478_v23 = vor.u32 %v477_v10, %v473_v5  ;;  %v499_v24 = vshrl.u32 %v368_v61, 16  ;;  %v6741_v61 = vld [vmem:[%s8185_s26 + $0xc] sm:$0xf] }
  0x23   : > { %v492_v27 = vor.u32 %v491_v17, %v488_v16  ;;  %v497_v28 = vrot.slane %v495_v18, 5  ;;  %v505_v29 = vshll.u32 %v397_v3, 16  ;;  %v510_v30 = vshrl.u32 %v369_v19, 16  ;;  %v6742_v3 = vld [vmem:[%s8185_s26 + $0x10] sm:$0xf] }
  0x24   : > { %7329 = vmatmul.mubr.msk.bf16.vlgmr.msra.gmra.mrb[0].mxu1 %vm847_vm1, %v6564_v21  ;;  %v474_v31 = vsel %vm8219_vm4, %v469_v22, %v473_v5  ;;  %v479_v32 = vrot.slane %v478_v23, 4  ;;  %v501_v33 = vrot.slane %v499_v24, 4  ;;  %v513_v34 = vshll.u32 %v369_v19, 16  ;;  %v6743_v16 = vld [vmem:[%s8185_s26 + $0x14] sm:$0x1] }
  0x25   : > { %7439 = vmatmul.mubr.msk.bf16.gmra.mrb[8].mxu0 %vm847_vm1, %v7987_v59  ;;  %v493_v36 = vrot.slane %v492_v27, 4  ;;  %v507_v37 = vrot.slane %v505_v29, 5  ;;  %v512_v38 = vrot.slane %v510_v30, 4  ;;  %v519_v39 = vshll.u32 %v370_v25, 16  ;;  %7361 = vmatpush3.bf16.msra.mxu1 %v8225_v40  ;;  %v399_v40 = vld [vmem:[%s8185_s26 + $0x44] sm:$0x1] }
  0x26   : > { %7442 = vmatprep.mubr.msk.bf16.mxu0 %vm847_vm1, %v7988_v14  ;;  %v484_v42 = vsel %vm8219_vm4, %v479_v32, %v483_v13  ;;  %v502_v43 = vor.u32 %v501_v33, %v497_v28  ;;  %v515_v44 = vrot.slane %v513_v34, 5  ;;  %v523_v45 = vshrl.u32 %v370_v25, 16  ;;  %v373_v19 = vld [vmem:[%s8185_s26 + $0x48] sm:$0xf]  ;;  %v374_v32 = vld [vmem:[%s8185_s26 + $0x4c] sm:$0xf] }
  0x27   : > { %v6565_v47 = vcombine.low %v474_v31, %v484_v42  ;;  %v498_v48 = vsel %vm8219_vm4, %v493_v36, %v497_v28  ;;  %v521_v49 = vrot.slane %v519_v39, 5  ;;  %v529_v51 = vshll.u32 %v398_v26, 16 }
  0x28   : > { %v503_v53 = vrot.slane %v502_v43, 4  ;;  %v516_v54 = vor.u32 %v515_v44, %v512_v38  ;;  %v525_v55 = vrot.slane %v523_v45, 4  ;;  %v534_v56 = vshrl.u32 %v371_v41, 16  ;;  %v400_v38 = vld [vmem:[%s8185_s26 + $0x50] sm:$0x1] }
  0x29   : > { %7332 = vmatprep.mubr.msk.bf16.mxu1 %vm847_vm1, %v6565_v47  ;;  %v531_v57 = vrot.slane %v529_v51, 5  ;;  %v537_v58 = vshll.u32 %v371_v41, 16  ;;  %v543_v59 = vshll.u32 %v372_v46, 16  ;;  %v547_v60 = vshrl.u32 %v372_v46, 16  ;;  %v6744_v41 = vld [vmem:[%s8185_s26 + $0x18] sm:$0xf] }
  0x2a   : > { %v508_v62 = vsel %vm8219_vm4, %v503_v53, %v507_v37  ;;  %v517_v63 = vrot.slane %v516_v54, 4  ;;  %v526_v0 = vor.u32 %v525_v55, %v521_v49  ;;  %v536_v2 = vrot.slane %v534_v56, 4  ;;  %v6745_v53 = vld [vmem:[%s8185_s26 + $0x1c] sm:$0xf] }
  0x2b   : > { %v6566_v4 = vcombine.low %v498_v48, %v508_v62  ;;  %v539_v5 = vrot.slane %v537_v58, 5  ;;  %v545_v6 = vrot.slane %v543_v59, 5  ;;  %v549_v7 = vrot.slane %v547_v60, 4  ;;  %v6746_v59 = vld [vmem:[%s8185_s26 + $0x20] sm:$0x1] }
  0x2c   : > { %v522_v8 = vsel %vm8219_vm4, %v517_v63, %v521_v49  ;;  %v527_v9 = vrot.slane %v526_v0, 4  ;;  %v553_v10 = vshll.u32 %v399_v40, 16  ;;  %v2218_v13 = vshrl.u32 %v6741_v61, 16  ;;  %v375_v60 = vld [vmem:[%s8185_s26 + $0x54] sm:$0xf] }
  0x2d   : > { %7443 = vmatmul.mubr.msk.bf16.gmra.mrb[12].mxu0 %vm847_vm1, %v7989_v52  ;;  %7333 = vmatmul.mubr.msk.bf16.gmra.mrb[4].mxu1 %vm847_vm1, %v6566_v4  ;;  %v540_v14 = vor.u32 %v539_v5, %v536_v2  ;;  %v550_v15 = vor.u32 %v549_v7, %v545_v6  ;;  %v2221_v17 = vshll.u32 %v6741_v61, 16  ;;  %v2227_v18 = vshll.u32 %v6742_v3, 16 }
  0x2e   : > { %v532_v21 = vsel %vm8219_vm4, %v527_v9, %v531_v57  ;;  %v555_v22 = vrot.slane %v553_v10, 5  ;;  %v2220_v23 = vrot.slane %v2218_v13, 4  ;;  %v2231_v24 = vshrl.u32 %v6742_v3, 16  ;;  %v376_v9 = vld [vmem:[%s8185_s26 + $0x58] sm:$0xf] }
  0x2f   : > { %v6567_v25 = vcombine.low %v522_v8, %v532_v21  ;;  %v541_v26 = vrot.slane %v540_v14, 4  ;;  %v551_v27 = vrot.slane %v550_v15, 4  ;;  %v2223_v28 = vrot.slane %v2221_v17, 5 }
  0x30   : > { %v2229_v29 = vrot.slane %v2227_v18, 5  ;;  %v2233_v30 = vrot.slane %v2231_v24, 4  ;;  %v2237_v31 = vshll.u32 %v6743_v16, 16  ;;  %v558_v33 = vshrl.u32 %v373_v19, 16  ;;  %v401_v16 = vld [vmem:[%s8185_s26 + $0x5c] sm:$0x1] }
  0x31   : > { %7336 = vmatprep.mubr.msk.bf16.mxu1 %vm847_vm1, %v6567_v25  ;;  %v546_v34 = vsel %vm8219_vm4, %v541_v26, %v545_v6  ;;  %v556_v36 = vsel %vm8219_vm4, %v551_v27, %v555_v22  ;;  %v2224_v37 = vor.u32 %v2223_v28, %v2220_v23  ;;  %v561_v39 = vshll.u32 %v373_v19, 16  ;;  %v6747_v23 = vld [vmem:[%s8185_s26 + $0x24] sm:$0xf]  ;;  %v6748_v28 = vld [vmem:[%s8185_s26 + $0x28] sm:$0xf] }
  0x32   : > { %v6568_v42 = vcombine.low %v546_v34, %v556_v36  ;;  %v2234_v43 = vor.u32 %v2233_v30, %v2229_v29  ;;  %v2239_v44 = vrot.slane %v2237_v31, 5  ;;  %v560_v45 = vrot.slane %v558_v33, 4 }
  0x33   : > { %v2225_v46 = vrot.slane %v2224_v37, 4  ;;  %v563_v47 = vrot.slane %v561_v39, 5  ;;  %v567_v48 = vshll.u32 %v374_v32, 16  ;;  %v571_v49 = vshrl.u32 %v374_v32, 16  ;;  %v6749_v37 = vld [vmem:[%s8185_s26 + $0x2c] sm:$0x1] }
  0x34   : > { %v2235_v51 = vrot.slane %v2234_v43, 4  ;;  %v577_v52 = vshll.u32 %v400_v38, 16  ;;  %v2242_v54 = vshrl.u32 %v6744_v41, 16  ;;  %v2245_v55 = vshll.u32 %v6744_v41, 16 }
  0x35   : > { %7337 = vmatmul.mubr.msk.bf16.gmra.mrb[8].mxu1 %vm847_vm1, %v6568_v42  ;;  %v2230_v40 = vsel %vm8219_vm4, %v2225_v46, %v2229_v29  ;;  %v564_v56 = vor.u32 %v563_v47, %v560_v45  ;;  %v569_v57 = vrot.slane %v567_v48, 5  ;;  %v573_v58 = vrot.slane %v571_v49, 4  ;;  %v377_v48 = vld [vmem:[%s8185_s26 + $0x60] sm:$0xf] }
  0x36   : > { %v2240_v61 = vsel %vm8219_vm4, %v2235_v51, %v2239_v44  ;;  %v579_v62 = vrot.slane %v577_v52, 5  ;;  %v2244_v63 = vrot.slane %v2242_v54, 4  ;;  %v2247_v0 = vrot.slane %v2245_v55, 5  ;;  %v378_v54 = vld [vmem:[%s8185_s26 + $0x64] sm:$0xf] }
  0x37   : > { %v8293_v2 = vcombine.low %v2230_v40, %v2240_v61  ;;  %v565_v3 = vrot.slane %v564_v56, 4  ;;  %v574_v4 = vor.u32 %v573_v58, %v569_v57  ;;  %v2251_v5 = vshll.u32 %v6745_v53, 16 }
  0x38   : > { %v2248_v6 = vor.u32 %v2247_v0, %v2244_v63  ;;  %v2255_v7 = vshrl.u32 %v6745_v53, 16  ;;  %v2261_v8 = vshll.u32 %v6746_v59, 16  ;;  %v582_v10 = vshrl.u32 %v375_v60, 16 }
  0x39   : > { %11138 = vst [vmem:[#allocation4_spill] sm:$0xff] %v8293_v2  ;;  %7464 = vmatprep.mubr.msk.bf16.mxu0 %vm847_vm1, %v8293_v2  ;;  %v570_v13 = vsel %vm8219_vm4, %v565_v3, %v569_v57  ;;  %v575_v14 = vrot.slane %v574_v4, 4  ;;  %v2253_v15 = vrot.slane %v2251_v5, 5  ;;  %v585_v17 = vshll.u32 %v375_v60, 16  ;;  %v402_v60 = vld [vmem:[%s8185_s26 + $0x68] sm:$0x1] }
  0x3a   : > { %v2249_v18 = vrot.slane %v2248_v6, 4  ;;  %v2257_v19 = vrot.slane %v2255_v7, 4  ;;  %v2263_v21 = vrot.slane %v2261_v8, 5  ;;  %v584_v22 = vrot.slane %v582_v10, 4  ;;  %v6750_v5 = vld [vmem:[%s8185_s26 + $0x30] sm:$0xf] }
  0x3b   : > { %v580_v24 = vsel %vm8219_vm4, %v575_v14, %v579_v62  ;;  %v587_v25 = vrot.slane %v585_v17, 5  ;;  %v591_v26 = vshll.u32 %v376_v9, 16  ;;  %v595_v27 = vshrl.u32 %v376_v9, 16  ;;  %v6751_v10 = vld [vmem:[%s8185_s26 + $0x34] sm:$0xf] }
  0x3c   : > { %v6569_v29 = vcombine.low %v570_v13, %v580_v24  ;;  %v2254_v30 = vsel %vm8219_vm4, %v2249_v18, %v2253_v15  ;;  %v2258_v31 = vor.u32 %v2257_v19, %v2253_v15  ;;  %v601_v32 = vshll.u32 %v401_v16, 16  ;;  %v6752_v19 = vld [vmem:[%s8185_s26 + $0x38] sm:$0x1]  ;;  %v8646_v2 = vld [vmem:[%s8185_s26 + $0xbc] sm:$0x1] }
  0x3d   : > { %v588_v33 = vor.u32 %v587_v25, %v584_v22  ;;  %v593_v34 = vrot.slane %v591_v26, 5  ;;  %v597_v36 = vrot.slane %v595_v27, 4  ;;  %v2266_v38 = vshrl.u32 %v6747_v23, 16  ;;  %v379_v26 = vld [vmem:[%s8185_s26 + $0x6c] sm:$0xf]  ;;  %11152 = vst [vmem:[#allocation17_spill] sm:$0xff] %v8646_v2 }
  0x3e   : > { %7340 = vmatprep.mubr.msk.bf16.mxu1 %vm847_vm1, %v6569_v29  ;;  %v2259_v39 = vrot.slane %v2258_v31, 4  ;;  %v603_v41 = vrot.slane %v601_v32, 5  ;;  %v2269_v42 = vshll.u32 %v6747_v23, 16  ;;  %v2275_v43 = vshll.u32 %v6748_v28, 16  ;;  %v380_v31 = vld [vmem:[%s8185_s26 + $0x70] sm:$0xf] }
  0x3f   : > { %v589_v44 = vrot.slane %v588_v33, 4  ;;  %v598_v45 = vor.u32 %v597_v36, %v593_v34  ;;  %v2268_v46 = vrot.slane %v2266_v38, 4  ;;  %v2279_v47 = vshrl.u32 %v6748_v28, 16 }
  0x40   : > { %v2264_v49 = vsel %vm8219_vm4, %v2259_v39, %v2263_v21  ;;  %v2271_v51 = vrot.slane %v2269_v42, 5  ;;  %v2277_v52 = vrot.slane %v2275_v43, 5  ;;  %v2285_v53 = vshll.u32 %v6749_v37, 16  ;;  %v403_v39 = vld [vmem:[%s8185_s26 + $0x74] sm:$0x1] }
  0x41   : > { %v8313_v55 = vcombine.low %v2254_v30, %v2264_v49  ;;  %v594_v40 = vsel %vm8219_vm4, %v589_v44, %v593_v34  ;;  %v599_v56 = vrot.slane %v598_v45, 4  ;;  %v2281_v57 = vrot.slane %v2279_v47, 4  ;;  %v6753_v47 = vld [vmem:[%s8185_s26 + $0x3c] sm:$0xf] }
  0x42   : > { %v2272_v58 = vor.u32 %v2271_v51, %v2268_v46  ;;  %v2287_v59 = vrot.slane %v2285_v53, 5  ;;  %v606_v61 = vshrl.u32 %v377_v48, 16  ;;  %v609_v62 = vshll.u32 %v377_v48, 16  ;;  %v8344_v53 = vld [vmem:[%s8185_s26 + $0x40] sm:$0xf] }
  0x43   : > { %11139 = vst [vmem:[#allocation5_spill] sm:$0xff] %v8313_v55  ;;  %7465 = vmatmul.mubr.msk.bf16.vlgmr.msra.gmra.mrb[0].mxu0 %vm847_vm1, %v8313_v55  ;;  %v604_v63 = vsel %vm8219_vm4, %v599_v56, %v603_v41  ;;  %v2282_v0 = vor.u32 %v2281_v57, %v2277_v52  ;;  %v615_v3 = vshll.u32 %v378_v54, 16  ;;  %v619_v4 = vshrl.u32 %v378_v54, 16 }
  0x44   : > { %7497 = vmatpush3.bf16.msra.mxu0 %v8211_v20  ;;  %v6570_v6 = vcombine.low %v594_v40, %v604_v63  ;;  %v2273_v7 = vrot.slane %v2272_v58, 4  ;;  %v608_v8 = vrot.slane %v606_v61, 4  ;;  %v611_v9 = vrot.slane %v609_v62, 5 }
  0x45   : > { %v2283_v13 = vrot.slane %v2282_v0, 4  ;;  %v617_v14 = vrot.slane %v615_v3, 5  ;;  %v621_v15 = vrot.slane %v619_v4, 4  ;;  %v625_v16 = vshll.u32 %v402_v60, 16  ;;  %v8350_v60 = vld [vmem:[%s8185_s26 + $0x44] sm:$0x1] }
  0x46   : > { %7341 = vmatmul.mubr.msk.bf16.gmra.mrb[12].mxu1 %vm847_vm1, %v6570_v6  ;;  %v2278_v17 = vsel %vm8219_vm4, %v2273_v7, %v2277_v52  ;;  %v612_v18 = vor.u32 %v611_v9, %v608_v8  ;;  %v2290_v21 = vshrl.u32 %v6750_v5, 16  ;;  %v2293_v20 = vshll.u32 %v6750_v5, 16  ;;  %v8355_v9 = vld [vmem:[%s8185_s26 + $0x78] sm:$0xf] }
  0x47   : > { %v2288_v22 = vsel %vm8219_vm4, %v2283_v13, %v2287_v59  ;;  %v622_v23 = vor.u32 %v621_v15, %v617_v14  ;;  %v627_v24 = vrot.slane %v625_v16, 5  ;;  %v2299_v25 = vshll.u32 %v6751_v10, 16  ;;  %v8361_v16 = vld [vmem:[%s8185_s26 + $0x7c] sm:$0xf] }
  0x48   : > { %v8332_v27 = vcombine.low %v2278_v17, %v2288_v22  ;;  %v613_v28 = vrot.slane %v612_v18, 4  ;;  %v2292_v29 = vrot.slane %v2290_v21, 4  ;;  %v2295_v30 = vrot.slane %v2293_v20, 5  ;;  %v404_v20 = vld [vmem:[%s8185_s26 + $0x80] sm:$0x1] }
  0x49   : > { %v623_v32 = vrot.slane %v622_v23, 4  ;;  %v2301_v33 = vrot.slane %v2299_v25, 5  ;;  %v2303_v34 = vshrl.u32 %v6751_v10, 16  ;;  %v2309_v36 = vshll.u32 %v6752_v19, 16 }
  0x4a   : > { %11140 = vst [vmem:[#allocation6_spill] sm:$0xff] %v8332_v27  ;;  %7468 = vmatprep.mubr.msk.bf16.mxu0 %vm847_vm1, %v8332_v27  ;;  %v618_v37 = vsel %vm8219_vm4, %v613_v28, %v617_v14  ;;  %v2296_v38 = vor.u32 %v2295_v30, %v2292_v29  ;;  %v630_v41 = vshrl.u32 %v379_v26, 16  ;;  %v633_v42 = vshll.u32 %v379_v26, 16 }
  0x4b   : > { %v628_v43 = vsel %vm8219_vm4, %v623_v32, %v627_v24  ;;  %v2305_v44 = vrot.slane %v2303_v34, 4  ;;  %v2311_v45 = vrot.slane %v2309_v36, 5  ;;  %v639_v46 = vshll.u32 %v380_v31, 16 }
  0x4c   : > { %v6571_v48 = vcombine.low %v618_v37, %v628_v43  ;;  %v2297_v49 = vrot.slane %v2296_v38, 4  ;;  %v632_v51 = vrot.slane %v630_v41, 4  ;;  %v635_v52 = vrot.slane %v633_v42, 5  ;;  %v8378_v37 = vld [vmem:[%s8185_s26 + $0x4c] sm:$0xf] }
  0x4d   : > { %v2306_v54 = vor.u32 %v2305_v44, %v2301_v33  ;;  %v641_v40 = vrot.slane %v639_v46, 5  ;;  %v643_v56 = vshrl.u32 %v380_v31, 16  ;;  %v649_v57 = vshll.u32 %v403_v39, 16  ;;  %v6756_v31 = vld [vmem:[%s8185_s26 + $0x48] sm:$0xf] }
  0x4e   : > { %7344 = vmatprep.mubr.msk.bf16.mxu1 %vm847_vm1, %v6571_v48  ;;  %v2302_v58 = vsel %vm8219_vm4, %v2297_v49, %v2301_v33  ;;  %v636_v59 = vor.u32 %v635_v52, %v632_v51  ;;  %v2314_v61 = vshrl.u32 %v6753_v47, 16  ;;  %v2317_v62 = vshll.u32 %v6753_v47, 16  ;;  %v8383_v46 = vld [vmem:[%s8185_s26 + $0x50] sm:$0x1] }
  0x4f   : > { %v2307_v63 = vrot.slane %v2306_v54, 4  ;;  %v645_v0 = vrot.slane %v643_v56, 4  ;;  %v651_v3 = vrot.slane %v649_v57, 5  ;;  %v2323_v4 = vshll.u32 %v8344_v53, 16  ;;  %v8391_v54 = vld [vmem:[%s8185_s26 + $0x84] sm:$0xf] }
  0x50   : > { %v637_v5 = vrot.slane %v636_v59, 4  ;;  %v2316_v6 = vrot.slane %v2314_v61, 4  ;;  %v2319_v7 = vrot.slane %v2317_v62, 5  ;;  %v2327_v8 = vshrl.u32 %v8344_v53, 16  ;;  %v8396_v59 = vld [vmem:[%s8185_s26 + $0x88] sm:$0xf] }
  0x51   : > { %v2312_v10 = vsel %vm8219_vm4, %v2307_v63, %v2311_v45  ;;  %v646_v13 = vor.u32 %v645_v0, %v641_v40  ;;  %v2325_v14 = vrot.slane %v2323_v4, 5  ;;  %v2333_v15 = vshll.u32 %v8350_v60, 16 }
  0x52   : > { %v8363_v17 = vcombine.low %v2302_v58, %v2312_v10  ;;  %v642_v18 = vsel %vm8219_vm4, %v637_v5, %v641_v40  ;;  %v2320_v19 = vor.u32 %v2319_v7, %v2316_v6  ;;  %v2329_v21 = vrot.slane %v2327_v8, 4 }
  0x53   : > { %v647_v22 = vrot.slane %v646_v13, 4  ;;  %v2335_v23 = vrot.slane %v2333_v15, 5  ;;  %v654_v24 = vshrl.u32 %v8355_v9, 16  ;;  %v657_v25 = vshll.u32 %v8355_v9, 16  ;;  %v405_v13 = vld [vmem:[%s8185_s26 + $0x8c] sm:$0x1] }
  0x54   : > { %11141 = vst [vmem:[#allocation7_spill] sm:$0xff] %v8363_v17  ;;  %7469 = vmatmul.mubr.msk.bf16.gmra.mrb[4].mxu0 %vm847_vm1, %v8363_v17  ;;  %v2321_v26 = vrot.slane %v2320_v19, 4  ;;  %v2330_v28 = vor.u32 %v2329_v21, %v2325_v14  ;;  %v663_v29 = vshll.u32 %v8361_v16, 16  ;;  %v667_v30 = vshrl.u32 %v8361_v16, 16  ;;  %v6759_v15 = vld [vmem:[%s8185_s26 + $0x54] sm:$0xf] }
  0x55   : > { %v652_v32 = vsel %vm8219_vm4, %v647_v22, %v651_v3  ;;  %v656_v33 = vrot.slane %v654_v24, 4  ;;  %v659_v34 = vrot.slane %v657_v25, 5  ;;  %v673_v36 = vshll.u32 %v404_v20, 16  ;;  %v8412_v22 = vld [vmem:[%s8185_s26 + $0x58] sm:$0xf] }
  0x56   : > { %v6572_v38 = vcombine.low %v642_v18, %v652_v32  ;;  %v2326_v39 = vsel %vm8219_vm4, %v2321_v26, %v2325_v14  ;;  %v2331_v41 = vrot.slane %v2330_v28, 4  ;;  %v665_v42 = vrot.slane %v663_v29, 5  ;;  %v8032_v17 = vld [vmem:[%s8185_s26 + $0x18] sm:$0xf] }
  0x57   : > { %v660_v43 = vor.u32 %v659_v34, %v656_v33  ;;  %v669_v44 = vrot.slane %v667_v30, 4  ;;  %v675_v45 = vrot.slane %v673_v36, 5  ;;  %v2338_v47 = vshrl.u32 %v6756_v31, 16  ;;  %v8420_v34 = vld [vmem:[%s8185_s26 + $0x5c] sm:$0x1] }
  0x58   : > { %7345 = vmatmul.mubr.msk.bf16.gmra.mrb[16].mxu1 %vm847_vm1, %v6572_v38  ;;  %v2336_v48 = vsel %vm8219_vm4, %v2331_v41, %v2335_v23  ;;  %v2341_v49 = vshll.u32 %v6756_v31, 16  ;;  %v2347_v51 = vshll.u32 %v8378_v37, 16  ;;  %v2351_v52 = vshrl.u32 %v8378_v37, 16 }
  0x59   : > { %v8393_v40 = vcombine.low %v2326_v39, %v2336_v48  ;;  %v661_v56 = vrot.slane %v660_v43, 4  ;;  %v670_v57 = vor.u32 %v669_v44, %v665_v42  ;;  %v2340_v58 = vrot.slane %v2338_v47, 4  ;;  %v8424_v39 = vld [vmem:[%s8185_s26 + $0x90] sm:$0xf]  ;;  %v8434_v47 = vld [vmem:[%s11068_s1 + $0xc] sm:$0x3] }
  0x5a   : > { %v2343_v61 = vrot.slane %v2341_v49, 5  ;;  %v2349_v62 = vrot.slane %v2347_v51, 5  ;;  %v2353_v63 = vrot.slane %v2351_v52, 4  ;;  %v2357_v0 = vshll.u32 %v8383_v46, 16  ;;  %7965 = vmatprep.subr.msk.bf16.mxu0 %vm896_vm0, %v8434_v47 }
  0x5b   : > { %11142 = vst [vmem:[#allocation8_spill] sm:$0xff] %v8393_v40  ;;  %7472 = vmatprep.mubr.msk.bf16.mxu0 %vm847_vm1, %v8393_v40  ;;  %v666_v3 = vsel %vm8219_vm4, %v661_v56, %v665_v42  ;;  %v671_v4 = vrot.slane %v670_v57, 4  ;;  %v678_v5 = vshrl.u32 %v8391_v54, 16  ;;  %v681_v6 = vshll.u32 %v8391_v54, 16 }
  0x5c   : > { %v2344_v7 = vor.u32 %v2343_v61, %v2340_v58  ;;  %v2354_v8 = vor.u32 %v2353_v63, %v2349_v62  ;;  %v2359_v10 = vrot.slane %v2357_v0, 5  ;;  %v687_v14 = vshll.u32 %v8396_v59, 16  ;;  %v406_v61 = vld [vmem:[%s8185_s26 + $0x98] sm:$0x1] }
  0x5d   : > { %v676_v18 = vsel %vm8219_vm4, %v671_v4, %v675_v45  ;;  %v680_v19 = vrot.slane %v678_v5, 4  ;;  %v683_v21 = vrot.slane %v681_v6, 5  ;;  %v691_v20 = vshrl.u32 %v8396_v59, 16  ;;  %v8429_v45 = vld [vmem:[%s8185_s26 + $0x94] sm:$0xf] }
  0x5e   : > { %v6573_v23 = vcombine.low %v666_v3, %v676_v18  ;;  %v2345_v24 = vrot.slane %v2344_v7, 4  ;;  %v2355_v25 = vrot.slane %v2354_v8, 4  ;;  %v689_v26 = vrot.slane %v687_v14, 5  ;;  %v6762_v5 = vld [vmem:[%s8185_s26 + $0x60] sm:$0xf] }
  0x5f   : > { %v684_v28 = vor.u32 %v683_v21, %v680_v19  ;;  %v693_v29 = vrot.slane %v691_v20, 4  ;;  %v697_v30 = vshll.u32 %v405_v13, 16  ;;  %v2362_v31 = vshrl.u32 %v6759_v15, 16  ;;  %v8453_v19 = vld [vmem:[%s8185_s26 + $0x64] sm:$0xf] }
  0x60   : > { %7348 = vmatprep.mubr.msk.bf16.mxu1 %vm847_vm1, %v6573_v23  ;;  %v2350_v32 = vsel %vm8219_vm4, %v2345_v24, %v2349_v62  ;;  %v2360_v33 = vsel %vm8219_vm4, %v2355_v25, %v2359_v10  ;;  %v2365_v36 = vshll.u32 %v6759_v15, 16  ;;  %v2371_v38 = vshll.u32 %v8412_v22, 16 }
  0x61   : > { %v8426_v41 = vcombine.low %v2350_v32, %v2360_v33  ;;  %v685_v42 = vrot.slane %v684_v28, 4  ;;  %v694_v43 = vor.u32 %v693_v29, %v689_v26  ;;  %v699_v44 = vrot.slane %v697_v30, 5  ;;  %v8459_v29 = vld [vmem:[%s8185_s26 + $0x68] sm:$0x1] }
  0x62   : > { %v2364_v48 = vrot.slane %v2362_v31, 4  ;;  %v2367_v49 = vrot.slane %v2365_v36, 5  ;;  %v2373_v51 = vrot.slane %v2371_v38, 5  ;;  %v2375_v52 = vshrl.u32 %v8412_v22, 16  ;;  %v8462_v31 = vld [vmem:[%s8185_s26 + $0x9c] sm:$0xf] }
  0x63   : > { %11143 = vst [vmem:[#allocation9_spill] sm:$0xff] %v8426_v41  ;;  %7473 = vmatmul.mubr.msk.bf16.gmra.mrb[8].mxu0 %vm847_vm1, %v8426_v41  ;;  %v690_v56 = vsel %vm8219_vm4, %v685_v42, %v689_v26  ;;  %v695_v57 = vrot.slane %v694_v43, 4  ;;  %v2381_v58 = vshll.u32 %v8420_v34, 16  ;;  %v702_v62 = vshrl.u32 %v8424_v39, 16  ;;  %v8468_v42 = vld [vmem:[%s11068_s1 + $0x4] sm:$0x3] }
  0x64   : > { %v2368_v63 = vor.u32 %v2367_v49, %v2364_v48  ;;  %v2377_v0 = vrot.slane %v2375_v52, 4  ;;  %v705_v3 = vshll.u32 %v8424_v39, 16  ;;  %v711_v4 = vshll.u32 %v8429_v45, 16  ;;  %7960 = vmatprep.subr.msk.bf16.mxu1 %vm896_vm0, %v8468_v42  ;;  %v8599_v41 = vld [vmem:[%s8185_s26 + $0x10] sm:$0xf] }
  0x65   : > { %v700_v6 = vsel %vm8219_vm4, %v695_v57, %v699_v44  ;;  %v2383_v7 = vrot.slane %v2381_v58, 5  ;;  %v704_v8 = vrot.slane %v702_v62, 4  ;;  %v715_v10 = vshrl.u32 %v8429_v45, 16 }
  0x66   : > { %v6574_v13 = vcombine.low %v690_v56, %v700_v6  ;;  %v2369_v14 = vrot.slane %v2368_v63, 4  ;;  %v2378_v15 = vor.u32 %v2377_v0, %v2373_v51  ;;  %v707_v18 = vrot.slane %v705_v3, 5  ;;  %v407_v0 = vld [vmem:[%s8185_s26 + $0xa4] sm:$0x1] }
  0x67   : > { %v713_v21 = vrot.slane %v711_v4, 5  ;;  %v717_v20 = vrot.slane %v715_v10, 4  ;;  %v721_v23 = vshll.u32 %v406_v61, 16  ;;  %v2386_v24 = vshrl.u32 %v6762_v5, 16 }
  0x68   : > { %7349 = vmatmul.mubr.msk.bf16.gmra.mrb[20].mxu1 %vm847_vm1, %v6574_v13  ;;  %v2374_v25 = vsel %vm8219_vm4, %v2369_v14, %v2373_v51  ;;  %v2379_v26 = vrot.slane %v2378_v15, 4  ;;  %v708_v28 = vor.u32 %v707_v18, %v704_v8  ;;  %v2389_v30 = vshll.u32 %v6762_v5, 16  ;;  %v8474_v51 = vld [vmem:[%s8185_s26 + $0xa0] sm:$0xf]  ;;  %v6765_v8 = vld [vmem:[%s8185_s26 + $0x6c] sm:$0xf] }
  0x69   : > { %v718_v32 = vor.u32 %v717_v20, %v713_v21  ;;  %v723_v33 = vrot.slane %v721_v23, 5  ;;  %v2388_v36 = vrot.slane %v2386_v24, 4  ;;  %v2395_v38 = vshll.u32 %v8453_v19, 16  ;;  %v8493_v18 = vld [vmem:[%s8185_s26 + $0x70] sm:$0xf] }
  0x6a   : > { %v2384_v43 = vsel %vm8219_vm4, %v2379_v26, %v2383_v7  ;;  %v709_v44 = vrot.slane %v708_v28, 4  ;;  %v2391_v48 = vrot.slane %v2389_v30, 5  ;;  %v2399_v49 = vshrl.u32 %v8453_v19, 16  ;;  %v8500_v28 = vld [vmem:[%s8185_s26 + $0x74] sm:$0x1] }
  0x6b   : > { %v8478_v52 = vcombine.low %v2374_v25, %v2384_v43  ;;  %v719_v56 = vrot.slane %v718_v32, 4  ;;  %v2397_v57 = vrot.slane %v2395_v38, 5  ;;  %v2405_v58 = vshll.u32 %v8459_v29, 16 }
  0x6c   : > { %v714_v61 = vsel %vm8219_vm4, %v709_v44, %v713_v21  ;;  %v2392_v62 = vor.u32 %v2391_v48, %v2388_v36  ;;  %v2401_v63 = vrot.slane %v2399_v49, 4  ;;  %v726_v3 = vshrl.u32 %v8462_v31, 16  ;;  %v8504_v44 = vld [vmem:[%s8185_s26 + $0xa8] sm:$0xf] }
  0x6d   : > { %11144 = vst [vmem:[#allocation10_spill] sm:$0xff] %v8478_v52  ;;  %7476 = vmatprep.mubr.msk.bf16.mxu0 %vm847_vm1, %v8478_v52  ;;  %v724_v4 = vsel %vm8219_vm4, %v719_v56, %v723_v33  ;;  %v2407_v5 = vrot.slane %v2405_v58, 5  ;;  %v729_v6 = vshll.u32 %v8462_v31, 16  ;;  %v735_v7 = vshll.u32 %v8474_v51, 16  ;;  %v8510_v58 = vld [vmem:[%s8185_s26 + $0xac] sm:$0xf] }
  0x6e   : > { %v6575_v10 = vcombine.low %v714_v61, %v724_v4  ;;  %v2393_v13 = vrot.slane %v2392_v62, 4  ;;  %v2402_v14 = vor.u32 %v2401_v63, %v2397_v57  ;;  %v728_v15 = vrot.slane %v726_v3, 4  ;;  %v408_v3 = vld [vmem:[%s8185_s26 + $0xb0] sm:$0x1]  ;;  %v8030_v52 = vld [vmem:[%s8185_s26 + $0xc] sm:$0xf] }
  0x6f   : > { %v731_v21 = vrot.slane %v729_v6, 5  ;;  %v737_v20 = vrot.slane %v735_v7, 5  ;;  %v739_v23 = vshrl.u32 %v8474_v51, 16  ;;  %v745_v24 = vshll.u32 %v407_v0, 16 }
  0x70   : > { %7352 = vmatprep.mubr.msk.bf16.mxu1 %vm847_vm1, %v6575_v10  ;;  %v2398_v25 = vsel %vm8219_vm4, %v2393_v13, %v2397_v57  ;;  %v2403_v26 = vrot.slane %v2402_v14, 4  ;;  %v2410_v30 = vshrl.u32 %v6765_v8, 16  ;;  %v2413_v32 = vshll.u32 %v6765_v8, 16 }
  0x71   : > { %v732_v33 = vor.u32 %v731_v21, %v728_v15  ;;  %v741_v36 = vrot.slane %v739_v23, 4  ;;  %v747_v38 = vrot.slane %v745_v24, 5  ;;  %v2419_v43 = vshll.u32 %v8493_v18, 16  ;;  %v6768_v15 = vld [vmem:[%s8185_s26 + $0x78] sm:$0xf] }
  0x72   : > { %v2408_v48 = vsel %vm8219_vm4, %v2403_v26, %v2407_v5  ;;  %v2412_v49 = vrot.slane %v2410_v30, 4  ;;  %v2415_v56 = vrot.slane %v2413_v32, 5  ;;  %v2423_v57 = vshrl.u32 %v8493_v18, 16  ;;  %v8525_v26 = vld [vmem:[%s8185_s26 + $0x7c] sm:$0xf] }
  0x73   : > { %v8512_v61 = vcombine.low %v2398_v25, %v2408_v48  ;;  %v733_v62 = vrot.slane %v732_v33, 4  ;;  %v742_v63 = vor.u32 %v741_v36, %v737_v20  ;;  %v2421_v0 = vrot.slane %v2419_v43, 5  ;;  %v8531_v36 = vld [vmem:[%s8185_s26 + $0x80] sm:$0x1] }
  0x74   : > { %v2416_v4 = vor.u32 %v2415_v56, %v2412_v49  ;;  %v2425_v6 = vrot.slane %v2423_v57, 4  ;;  %v2429_v7 = vshll.u32 %v8500_v28, 16  ;;  %v750_v5 = vshrl.u32 %v8504_v44, 16  ;;  %v8536_v57 = vld [vmem:[%s8185_s26 + $0xb4] sm:$0xf] }
  0x75   : > { %11145 = vst [vmem:[#allocation11_spill] sm:$0xff] %v8512_v61  ;;  %7477 = vmatmul.mubr.msk.bf16.gmra.mrb[12].mxu0 %vm847_vm1, %v8512_v61  ;;  %v738_v8 = vsel %vm8219_vm4, %v733_v62, %v737_v20  ;;  %v743_v10 = vrot.slane %v742_v63, 4  ;;  %v753_v13 = vshll.u32 %v8504_v44, 16  ;;  %v759_v14 = vshll.u32 %v8510_v58, 16 }
  0x76   : > { %v2417_v21 = vrot.slane %v2416_v4, 4  ;;  %v2426_v23 = vor.u32 %v2425_v6, %v2421_v0  ;;  %v2431_v24 = vrot.slane %v2429_v7, 5  ;;  %v752_v25 = vrot.slane %v750_v5, 4 }
  0x77   : > { %v748_v30 = vsel %vm8219_vm4, %v743_v10, %v747_v38  ;;  %v755_v32 = vrot.slane %v753_v13, 5  ;;  %v761_v33 = vrot.slane %v759_v14, 5  ;;  %v763_v20 = vshrl.u32 %v8510_v58, 16  ;;  %v8546_v14 = vld [vmem:[%s8185_s26 + $0xb8] sm:$0xf] }
  0x78   : > { %v6576_v43 = vcombine.low %v738_v8, %v748_v30  ;;  %v2422_v48 = vsel %vm8219_vm4, %v2417_v21, %v2421_v0  ;;  %v2427_v49 = vrot.slane %v2426_v23, 4  ;;  %v769_v56 = vshll.u32 %v408_v3, 16 }
  0x79   : > { %v756_v62 = vor.u32 %v755_v32, %v752_v25  ;;  %v765_v63 = vrot.slane %v763_v20, 4  ;;  %v2434_v4 = vshrl.u32 %v6768_v15, 16  ;;  %v2437_v38 = vshll.u32 %v6768_v15, 16 }
  0x7a   : > { %7353 = vmatmul.mubr.msk.bf16.gmra.mrb[24].mxu1 %vm847_vm1, %v6576_v43  ;;  %v2432_v6 = vsel %vm8219_vm4, %v2427_v49, %v2431_v24  ;;  %v771_v7 = vrot.slane %v769_v56, 5  ;;  %v2443_v5 = vshll.u32 %v8525_v26, 16  ;;  %v2447_v0 = vshrl.u32 %v8525_v26, 16  ;;  %v409_v24 = vld [vmem:[%s8185_s26 + $0xbc] sm:$0x1] }
  0x7b   : > { %v8543_v8 = vcombine.low %v2422_v48, %v2432_v6  ;;  %v757_v3 = vrot.slane %v756_v62, 4  ;;  %v766_v10 = vor.u32 %v765_v63, %v761_v33  ;;  %v2436_v13 = vrot.slane %v2434_v4, 4  ;;  %v6771_v48 = vld [vmem:[%s8185_s26 + $0x84] sm:$0xf] }
  0x7c   : > { %v2439_v21 = vrot.slane %v2437_v38, 5  ;;  %v2445_v15 = vrot.slane %v2443_v5, 5  ;;  %v2449_v23 = vrot.slane %v2447_v0, 4  ;;  %v2453_v25 = vshll.u32 %v8531_v36, 16 }
  0x7d   : > { %11146 = vst [vmem:[#allocation12_spill] sm:$0xff] %v8543_v8  ;;  %7480 = vmatprep.mubr.msk.bf16.mxu0 %vm847_vm1, %v8543_v8  ;;  %v762_v30 = vsel %vm8219_vm4, %v757_v3, %v761_v33  ;;  %v767_v32 = vrot.slane %v766_v10, 4  ;;  %v774_v20 = vshrl.u32 %v8536_v57, 16  ;;  %v777_v43 = vshll.u32 %v8536_v57, 16  ;;  %v8562_v33 = vld [vmem:[%s8185_s26 + $0x88] sm:$0xf] }
  0x7e   : > { %v2440_v49 = vor.u32 %v2439_v21, %v2436_v13  ;;  %v2450_v56 = vor.u32 %v2449_v23, %v2445_v15  ;;  %v2455_v62 = vrot.slane %v2453_v25, 5  ;;  %v783_v63 = vshll.u32 %v8546_v14, 16  ;;  %v8565_v13 = vld [vmem:[%s8185_s26 + $0x8c] sm:$0x1] }
  0x7f   : > { %v772_v4 = vsel %vm8219_vm4, %v767_v32, %v771_v7  ;;  %v776_v38 = vrot.slane %v774_v20, 4  ;;  %v779_v6 = vrot.slane %v777_v43, 5  ;;  %v787_v5 = vshrl.u32 %v8546_v14, 16  ;;  %v6774_v43 = vld [vmem:[%s8185_s26 + $0x90] sm:$0xf] }
  0x80   : > { %v6577_v0 = vcombine.low %v762_v30, %v772_v4  ;;  %v2441_v3 = vrot.slane %v2440_v49, 4  ;;  %v2451_v10 = vrot.slane %v2450_v56, 4  ;;  %v785_v50 = vrot.slane %v783_v63, 5 }
  0x81   : > { %v780_v21 = vor.u32 %v779_v6, %v776_v38  ;;  %v789_v23 = vrot.slane %v787_v5, 4  ;;  %v793_v25 = vshll.u32 %v409_v24, 16  ;;  %v2458_v8 = vshrl.u32 %v6771_v48, 16  ;;  %v8577_v24 = vld [vmem:[%s8185_s26 + $0x94] sm:$0xf] }
  0x82   : > { %7356 = vmatprep.mubr.msk.bf16.mxu1 %vm847_vm1, %v6577_v0  ;;  %v2446_v7 = vsel %vm8219_vm4, %v2441_v3, %v2445_v15  ;;  %v2456_v32 = vsel %vm8219_vm4, %v2451_v10, %v2455_v62  ;;  %v2461_v30 = vshll.u32 %v6771_v48, 16  ;;  %v2467_v20 = vshll.u32 %v8562_v33, 16  ;;  %v8581_v0 = vld [vmem:[%s8185_s26 + $0x98] sm:$0x1] }
  0x83   : > { %v8574_v49 = vcombine.low %v2446_v7, %v2456_v32  ;;  %v781_v56 = vrot.slane %v780_v21, 4  ;;  %v790_v63 = vor.u32 %v789_v23, %v785_v50  ;;  %v795_v4 = vrot.slane %v793_v25, 5  ;;  %v6777_v7 = vld [vmem:[%s8185_s26 + $0x9c] sm:$0xf] }
  0x84   : > { %v2460_v38 = vrot.slane %v2458_v8, 4  ;;  %v2463_v6 = vrot.slane %v2461_v30, 5  ;;  %v2469_v5 = vrot.slane %v2467_v20, 5  ;;  %v2471_v15 = vshrl.u32 %v8562_v33, 16 }
  0x85   : > { %11147 = vst [vmem:[#allocation13_spill] sm:$0xff] %v8574_v49  ;;  %7481 = vmatmul.mubr.msk.bf16.gmra.mrb[16].mxu0 %vm847_vm1, %v8574_v49  ;;  %v786_v48 = vsel %vm8219_vm4, %v781_v56, %v785_v50  ;;  %v791_v62 = vrot.slane %v790_v63, 4  ;;  %v2477_v3 = vshll.u32 %v8565_v13, 16  ;;  %v2482_v10 = vshrl.u32 %v6774_v43, 16 }
  0x86   : > { %v2464_v21 = vor.u32 %v2463_v6, %v2460_v38  ;;  %v2473_v23 = vrot.slane %v2471_v15, 4  ;;  %v2485_v8 = vshll.u32 %v6774_v43, 16  ;;  %v2491_v25 = vshll.u32 %v8577_v24, 16  ;;  %v8594_v6 = vld [vmem:[%s8185_s26 + $0xa0] sm:$0xf] }
  0x87   : > { %v796_v32 = vsel %vm8219_vm4, %v791_v62, %v795_v4  ;;  %v2479_v30 = vrot.slane %v2477_v3, 5  ;;  %v2484_v20 = vrot.slane %v2482_v10, 4  ;;  %v2495_v50 = vshrl.u32 %v8577_v24, 16  ;;  %v8603_v62 = vld [vmem:[%s8185_s26 + $0xa4] sm:$0x1] }
  0x88   : > { %v6578_v56 = vcombine.low %v786_v48, %v796_v32  ;;  %v2465_v63 = vrot.slane %v2464_v21, 4  ;;  %v2474_v49 = vor.u32 %v2473_v23, %v2469_v5  ;;  %v2487_v38 = vrot.slane %v2485_v8, 5  ;;  %v6780_v23 = vld [vmem:[%s8185_s26 + $0xa8] sm:$0xf] }
  0x89   : > { %v2493_v43 = vrot.slane %v2491_v25, 5  ;;  %v2497_v15 = vrot.slane %v2495_v50, 4  ;;  %v2501_v61 = vshll.u32 %v8581_v0, 16  ;;  %v6596_v4 = vcombine.low %v8030_v52, %v8599_v41 }
  0x8a   : > { %7357 = vmatmul.mubr.msk.bf16.gmra.mrb[28].mxu1 %vm847_vm1, %v6578_v56  ;;  %v2470_v48 = vsel %vm8219_vm4, %v2465_v63, %v2469_v5  ;;  %v2475_v3 = vrot.slane %v2474_v49, 4  ;;  %v2488_v10 = vor.u32 %v2487_v38, %v2484_v20  ;;  %v2506_v21 = vshrl.u32 %v6777_v7, 16  ;;  %v8615_v56 = vld [vmem:[%s8185_s26 + $0xac] sm:$0xf] }
  0x8b   : > { %v11148_v8 = vcombine.low %v8197_v11, %v8200_v12  ;;  %v2498_v25 = vor.u32 %v2497_v15, %v2493_v43  ;;  %v2503_v32 = vrot.slane %v2501_v61, 5  ;;  %v2509_v52 = vshll.u32 %v6777_v7, 16  ;;  %v8623_v7 = vld [vmem:[%s8185_s26 + $0xb0] sm:$0x1] }
  0x8c   : > { %v2515_v50 = vshll.u32 %v8594_v6, 16  ;;  %v2480_v49 = vsel %vm8219_vm4, %v2475_v3, %v2479_v30  ;;  %v2489_v5 = vrot.slane %v2488_v10, 4  ;;  %v2508_v20 = vrot.slane %v2506_v21, 4  ;;  %v8630_v30 = vld [vmem:[%s8185_s26 + $0x1c] sm:$0xf] }
  0x8d   : > { %7362 = vmatprep.mubr.msk.bf16.mxu1 %vm847_vm1, %v11148_v8  ;;  %v2519_v63 = vshrl.u32 %v8594_v6, 16  ;;  %v8620_v11 = vcombine.low %v2470_v48, %v2480_v49  ;;  %v2499_v12 = vrot.slane %v2498_v25, 4  ;;  %v2511_v61 = vrot.slane %v2509_v52, 5  ;;  %v6783_v48 = vld [vmem:[%s8185_s26 + $0xb4] sm:$0xf] }
  0x8e   : > { %v2517_v38 = vrot.slane %v2515_v50, 5  ;;  %v2494_v15 = vsel %vm8219_vm4, %v2489_v5, %v2493_v43  ;;  %v2525_v40 = vshll.u32 %v8603_v62, 16  ;;  %v6597_v3 = vcombine.low %v8032_v17, %v8630_v30  ;;  %v8639_v43 = vld [vmem:[%s8185_s26 + $0xb8] sm:$0xf] }
  0x8f   : > { %11149 = vst [vmem:[#allocation14_spill] sm:$0xff] %v8620_v11  ;;  %v2521_v8 = vrot.slane %v2519_v63, 4  ;;  %7484 = vmatprep.mubr.msk.bf16.mxu0 %vm847_vm1, %v8620_v11  ;;  %v2504_v10 = vsel %vm8219_vm4, %v2499_v12, %v2503_v32  ;;  %v2512_v21 = vor.u32 %v2511_v61, %v2508_v20  ;;  %v2530_v25 = vshrl.u32 %v6780_v23, 16  ;;  %11150 = vst [vmem:[#allocation15_spill] sm:$0xff] %v8639_v43  ;;  %v8654_v12 = vld [vmem:[%s8185_s26 + $0x28] sm:$0xf] }
  0x90   : > { %v2533_v52 = vshll.u32 %v6780_v23, 16  ;;  %v8641_v50 = vcombine.low %v2494_v15, %v2504_v10  ;;  %v2527_v5 = vrot.slane %v2525_v40, 5  ;;  %v2539_v17 = vshll.u32 %v8615_v56, 16  ;;  %v8034_v40 = vld [vmem:[%s8185_s26 + $0x24] sm:$0xf] }
  0x91   : > { %v2522_v49 = vor.u32 %v2521_v8, %v2517_v38  ;;  %v2513_v63 = vrot.slane %v2512_v21, 4  ;;  %v2532_v27 = vrot.slane %v2530_v25, 4  ;;  %v2543_v11 = vshrl.u32 %v8615_v56, 16 }
  0x92   : > { %11151 = vst [vmem:[#allocation16_spill] sm:$0xff] %v8641_v50  ;;  %v2535_v55 = vrot.slane %v2533_v52, 5  ;;  %7485 = vmatmul.mubr.msk.bf16.gmra.mrb[20].mxu0 %vm847_vm1, %v8641_v50  ;;  %7363 = vmatmul.mubr.msk.bf16.vlgmr.msra.gmra.mrb[0].mxu1 %vm847_vm1, %v6596_v4  ;;  %v2541_v32 = vrot.slane %v2539_v17, 5  ;;  %v2549_v20 = vshll.u32 %v8623_v7, 16  ;;  %v6598_v61 = vcombine.low %v8034_v40, %v8654_v12  ;;  %v6786_v17 = vld [vmem:[%s8185_s26 + $0xc0] sm:$0xf] }
  0x93   : > { %v2523_v23 = vrot.slane %v2522_v49, 4  ;;  %v2518_v15 = vsel %vm8219_vm4, %v2513_v63, %v2517_v38  ;;  %7366 = vmatprep.mubr.msk.bf16.mxu1 %vm847_vm1, %v6597_v3  ;;  %v2545_v10 = vrot.slane %v2543_v11, 4  ;;  %v2554_v4 = vshrl.u32 %v6783_v48, 16  ;;  %v8667_v3 = vld [vmem:[%s8185_s26 + $0xc4] sm:$0xf] }
  0x94   : > { %v2536_v8 = vor.u32 %v2535_v55, %v2532_v27  ;;  %v2551_v25 = vrot.slane %v2549_v20, 5  ;;  %v2557_v52 = vshll.u32 %v6783_v48, 16  ;;  %v2563_v49 = vshll.u32 %v8639_v43, 16  ;;  %v8672_v48 = vld [vmem:[%s8185_s26 + $0xc8] sm:$0x1] }
  0x95   : > { %v2528_v21 = vsel %vm8219_vm4, %v2523_v23, %v2527_v5  ;;  %v2546_v38 = vor.u32 %v2545_v10, %v2541_v32  ;;  %v2556_v63 = vrot.slane %v2554_v4, 4  ;;  %v2567_v11 = vshrl.u32 %v8639_v43, 16 }
  0x96   : > { %v8664_v40 = vcombine.low %v2518_v15, %v2528_v21  ;;  %v2537_v50 = vrot.slane %v2536_v8, 4  ;;  %v2559_v55 = vrot.slane %v2557_v52, 5  ;;  %v2565_v27 = vrot.slane %v2563_v49, 5  ;;  %v8036_v15 = vld [vmem:[%s8185_s26 + $0x30] sm:$0xf] }
  0x97   : > { %v2573_v5 = vshll.u32 %v8646_v2, 16  ;;  %v2547_v20 = vrot.slane %v2546_v38, 4  ;;  %v8680_v8 = vld [vmem:[%s8185_s26 + $0x34] sm:$0xf]  ;;  %v2578_v4 = vshrl.u32 %v6786_v17, 16  ;;  %v2569_v52 = vrot.slane %v2567_v11, 4 }
  0x98   : > { %11153 = vst [vmem:[#allocation18_spill] sm:$0xff] %v8664_v40  ;;  %7488 = vmatprep.mubr.msk.bf16.mxu0 %vm847_vm1, %v8664_v40  ;;  %v2542_v23 = vsel %vm8219_vm4, %v2537_v50, %v2541_v32  ;;  %v6599_v10 = vcombine.low %v8036_v15, %v8680_v8  ;;  %v2560_v21 = vor.u32 %v2559_v55, %v2556_v63  ;;  %v2581_v1 = vshll.u32 %v6786_v17, 16  ;;  %v6822_v2 = vld [vmem:[%s8185_s26 + $0xc] sm:$0xe] }
  0x99   : > { %v2575_v49 = vrot.slane %v2573_v5, 5  ;;  %v2552_v40 = vsel %vm8219_vm4, %v2547_v20, %v2551_v25  ;;  %v2580_v43 = vrot.slane %v2578_v4, 4  ;;  %v2587_v50 = vshll.u32 %v8667_v3, 16  ;;  %v8038_v25 = vld [vmem:[%s8185_s26 + $0x3c] sm:$0xf] }
  0x9a   : > { %v2591_v32 = vshrl.u32 %v8667_v3, 16  ;;  %v8688_v38 = vcombine.low %v2542_v23, %v2552_v40  ;;  %7367 = vmatmul.mubr.msk.bf16.gmra.mrb[4].mxu1 %vm847_vm1, %v6598_v61  ;;  %v2561_v15 = vrot.slane %v2560_v21, 4  ;;  %v2570_v63 = vor.u32 %v2569_v52, %v2565_v27  ;;  %v8695_v20 = vld [vmem:[%s8185_s26 + $0x40] sm:$0xf]  ;;  %v6823_v52 = vld [vmem:[%s8185_s26 + $0x18] sm:$0xe] }
  0x9b   : > { %v2583_v55 = vrot.slane %v2581_v1, 5  ;;  %7370 = vmatprep.mubr.msk.bf16.mxu1 %vm847_vm1, %v6599_v10  ;;  %v2589_v17 = vrot.slane %v2587_v50, 5  ;;  %v2597_v5 = vshll.u32 %v8672_v48, 16  ;;  %11155 = vst [vmem:[#allocation20_spill] sm:$0xff] %v8695_v20  ;;  %v6600_v4 = vcombine.low %v8038_v25, %v8695_v20 }
  0x9c   : > { %11154 = vst [vmem:[#allocation19_spill] sm:$0xff] %v8688_v38  ;;  %v2593_v11 = vrot.slane %v2591_v32, 4  ;;  %7489 = vmatmul.mubr.msk.bf16.gmra.mrb[24].mxu0 %vm847_vm1, %v8688_v38  ;;  %v2566_v1 = vsel %vm8219_vm4, %v2561_v15, %v2565_v27  ;;  %v2571_v61 = vrot.slane %v2570_v63, 4  ;;  %v6838_v21 = vrot.slane %v6822_v2, 9  ;;  %v8040_v27 = vld [vmem:[%s8185_s26 + $0x10] sm:$0xf] }
  0x9d   : > { %v2584_v40 = vor.u32 %v2583_v55, %v2580_v43  ;;  %v2599_v10 = vrot.slane %v2597_v5, 5  ;;  %v2961_v43 = vrot.slane %v8040_v27, 5  ;;  %v8041_v15 = vld [vmem:[%s8185_s26 + $0x14] sm:$0x1]  ;;  %v8042_v2 = vld [vmem:[%s8185_s26 + $0x48] sm:$0xf] }
  0x9e   : > { %v2594_v23 = vor.u32 %v2593_v11, %v2589_v17  ;;  %v2576_v50 = vsel %vm8219_vm4, %v2571_v61, %v2575_v49  ;;  %v2964_v63 = vrot.slane %v8041_v15, 5  ;;  %v8715_v5 = vld [vmem:[%s8185_s26 + $0x4c] sm:$0xf]  ;;  %v8044_v27 = vld [vmem:[%s8185_s26 + $0x1c] sm:$0xf] }
  0x9f   : > { %v2585_v32 = vrot.slane %v2584_v40, 4  ;;  %v8711_v55 = vcombine.low %v2566_v1, %v2576_v50  ;;  %v6601_v38 = vcombine.low %v8042_v2, %v8715_v5  ;;  %v2962_v61 = vsel %vm8705_vm7, %v6838_v21, %v2961_v43  ;;  %v6824_v15 = vld [vmem:[%s8185_s26 + $0x24] sm:$0xe]  ;;  %v8045_v50 = vld [vmem:[%s8185_s26 + $0x20] sm:$0x1] }
  0xa0   : > { %v2595_v11 = vrot.slane %v2594_v23, 4  ;;  %v2963_v40 = vrot.slane %v2961_v43, 4  ;;  %v2968_v20 = vrot.slane %v8044_v27, 5  ;;  %v6839_v23 = vrot.slane %v6823_v52, 9  ;;  %v6825_v43 = vld [vmem:[%s8185_s26 + $0x30] sm:$0xe] }
  0xa1   : > { %11158 = vst [vmem:[#allocation21_spill] sm:$0xff] %v8711_v55  ;;  %v2590_v49 = vsel %vm8219_vm4, %v2585_v32, %v2589_v17  ;;  %7492 = vmatprep.mubr.msk.bf16.mxu0 %vm847_vm1, %v8711_v55  ;;  %v2971_v2 = vrot.slane %v8045_v50, 5  ;;  %v6840_v55 = vrot.slane %v6824_v15, 9  ;;  %v8049_v15 = vld [vmem:[%s8185_s26 + $0x54] sm:$0xf] }
  0xa2   : > { %v2600_v1 = vsel %vm8219_vm4, %v2595_v11, %v2599_v10  ;;  %7371 = vmatmul.mubr.msk.bf16.gmra.mrb[8].mxu1 %vm847_vm1, %v6600_v4  ;;  %v2965_v21 = vsel %vm8705_vm7, %v2963_v40, %v2964_v63  ;;  %v2970_v32 = vrot.slane %v2968_v20, 4  ;;  %v8046_v10 = vld [vmem:[%s8185_s26 + $0x28] sm:$0xf]  ;;  %v8047_v11 = vld [vmem:[%s8185_s26 + $0x2c] sm:$0x1]  ;;  %v6841_v40 = vrot.slane %v6825_v43, 9 }
  0xa3   : > { %v8729_v17 = vcombine.low %v2590_v49, %v2600_v1  ;;  %v6855_v27 = vcombine.low %v2962_v61, %v2965_v21  ;;  %7374 = vmatprep.mubr.msk.bf16.mxu1 %vm847_vm1, %v6601_v38  ;;  %v2975_v52 = vrot.slane %v8046_v10, 5  ;;  %v2978_v50 = vrot.slane %v8047_v11, 5  ;;  %v8048_v4 = vld [vmem:[%s8185_s26 + $0x34] sm:$0xf]  ;;  %v8748_v1 = vld [vmem:[%s8185_s26 + $0x58] sm:$0xf] }
  0xa4   : > { %v2982_v63 = vrot.slane %v8048_v4, 5  ;;  %v2969_v49 = vsel %vm8705_vm7, %v6839_v23, %v2968_v20  ;;  %v2972_v38 = vsel %vm8705_vm7, %v2970_v32, %v2971_v2  ;;  %v6602_v21 = vcombine.low %v8049_v15, %v8748_v1  ;;  %v8051_v4 = vld [vmem:[%s8185_s26 + $0x38] sm:$0x1]  ;;  %v8052_v23 = vld [vmem:[%s8185_s26 + $0x60] sm:$0xf] }
  0xa5   : > { %11159 = vst [vmem:[#allocation22_spill] sm:$0xff] %v8729_v17  ;;  %7493 = vmatmul.mubr.msk.bf16.gmra.mrb[28].mxu0 %vm847_vm1, %v8729_v17  ;;  %v2977_v61 = vrot.slane %v2975_v52, 4  ;;  %v2976_v10 = vsel %vm8705_vm7, %v6840_v55, %v2975_v52  ;;  %v6826_v17 = vld [vmem:[%s8185_s26 + $0x3c] sm:$0xe]  ;;  %v8759_v2 = vld [vmem:[%s8185_s26 + $0x64] sm:$0xf]  ;;  %v6856_v15 = vcombine.low %v2969_v49, %v2972_v38 }
  0xa6   : > { %7498 = vmatprep.mubr.msk.bf16.mxu0 %vm847_vm1, %v6855_v27  ;;  %v2984_v11 = vrot.slane %v2982_v63, 4  ;;  %v2985_v27 = vrot.slane %v8051_v4, 5  ;;  %11160 = vst [vmem:[#allocation23_spill] sm:$0xff] %v8759_v2  ;;  %v6603_v32 = vcombine.low %v8052_v23, %v8759_v2  ;;  %v2989_v43 = vrot.slane %v8344_v53, 5  ;;  %v6830_v49 = vld [vmem:[%s8185_s26 + $0x6c] sm:$0xe] }
  0xa7   : > { %v2979_v20 = vsel %vm8705_vm7, %v2977_v61, %v2978_v50  ;;  %v3529_v55 = vsel %vm896_vm0, %v8434_v47, 0  ;;  %v2983_v4 = vsel %vm8705_vm7, %v6841_v40, %v2982_v63  ;;  %v6842_v50 = vrot.slane %v6826_v17, 9  ;;  %v8778_v17 = vld [vmem:[%s11068_s1 + $0xe] sm:$0x3]  ;;  %v8783_v38 = vld [vmem:[%s8185_s26 + $0x70] sm:$0xf] }
  0xa8   : > { %v6857_v52 = vcombine.low %v2976_v10, %v2979_v20  ;;  %v2986_v61 = vsel %vm8705_vm7, %v2984_v11, %v2985_v27  ;;  %v2991_v23 = vrot.slane %v2989_v43, 4  ;;  %v2992_v53 = vrot.slane %v8350_v60, 5  ;;  %v8054_v63 = vld [vmem:[%s8185_s26 + $0x6c] sm:$0xf]  ;;  %v6828_v10 = vld [vmem:[%s8185_s26 + $0x54] sm:$0xe] }
  0xa9   : > { %v6843_v2 = vrot.slane %v6827_v35, 9  ;;  %v2996_v47 = vrot.slane %v8378_v37, 5  ;;  %v6604_v60 = vcombine.low %v8054_v63, %v8783_v38  ;;  %v6858_v35 = vcombine.low %v2983_v4, %v2986_v61  ;;  %v6831_v11 = vld [vmem:[%s8185_s26 + $0x78] sm:$0xe] }
  0xaa   : > { %7375 = vmatmul.mubr.msk.bf16.gmra.mrb[12].mxu1 %vm847_vm1, %v6602_v21  ;;  %v2990_v37 = vsel %vm8705_vm7, %v6842_v50, %v2989_v43  ;;  %v6605_v40 = vcombine.low %v8355_v9, %v8361_v16  ;;  %v2999_v21 = vrot.slane %v8383_v46, 5  ;;  %v2993_v27 = vsel %vm8705_vm7, %v2991_v23, %v2992_v53 }
  0xab   : > { %7378 = vmatprep.mubr.msk.bf16.mxu1 %vm847_vm1, %v6603_v32  ;;  %v8798_v20 = vsel %vm8705_vm7, %v6843_v2, %v2996_v47  ;;  %v3003_v32 = vrot.slane %v8412_v22, 5  ;;  %v2998_v43 = vrot.slane %v2996_v47, 4  ;;  %v6606_v9 = vcombine.low %v8391_v54, %v8396_v59  ;;  %v6832_v22 = vld [vmem:[%s8185_s26 + $0x84] sm:$0xe] }
  0xac   : > { %v3017_v16 = vrot.slane %v8493_v18, 5  ;;  %v3020_v46 = vrot.slane %v8500_v28, 5  ;;  %v6847_v2 = vrot.slane %v6831_v11, 9  ;;  %v3024_v4 = vrot.slane %v8525_v26, 5  ;;  %v6833_v26 = vld [vmem:[%s8185_s26 + $0x90] sm:$0xe] }
  0xad   : > { %7499 = vmatmul.mubr.msk.bf16.vlgmr.msra.gmra.mrb[0].mxu0 %vm847_vm1, %v6856_v15  ;;  %v6846_v15 = vrot.slane %v6830_v49, 9  ;;  %v6859_v50 = vcombine.low %v2990_v37, %v2993_v27  ;;  %v3027_v54 = vrot.slane %v8531_v36, 5  ;;  %v3005_v59 = vrot.slane %v3003_v32, 4 }
  0xae   : > { %7531 = vmatpush3.bf16.msra.mxu0 %v3529_v55  ;;  %7502 = vmatprep.mubr.msk.bf16.mxu0 %vm847_vm1, %v6857_v52  ;;  %v6844_v55 = vrot.slane %v6828_v10, 9  ;;  %v3006_v52 = vrot.slane %v8420_v34, 5  ;;  %v3019_v23 = vrot.slane %v3017_v16, 4  ;;  %v8818_v18 = vsel %vm8705_vm7, %v6847_v2, %v3024_v4  ;;  %v6834_v10 = vld [vmem:[%s8185_s26 + $0x9c] sm:$0xe] }
  0xaf   : > { %7966 = vmatprep.subr.msk.bf16.mxu0 %vm896_vm0, %v8778_v17  ;;  %v8812_v61 = vsel %vm8705_vm7, %v6846_v15, %v3017_v16  ;;  %v3026_v34 = vrot.slane %v3024_v4, 4  ;;  %v1615_v28 = vsel %vm896_vm0, %v8468_v42, 0  ;;  %v6848_v36 = vrot.slane %v6832_v22, 9 }
  0xb0   : > { %v8826_v53 = vsel %vm8705_vm7, %v3019_v23, %v3020_v46  ;;  %7395 = vmatpush3.bf16.msra.mxu1 %v1615_v28  ;;  %v3031_v47 = vrot.slane %v8562_v33, 5  ;;  %v3034_v49 = vrot.slane %v8565_v13, 5  ;;  %v3000_v63 = vsel %vm8705_vm7, %v2998_v43, %v2999_v21  ;;  %v8056_v33 = vld [vmem:[%s11068_s1 + $0x6] sm:$0x3] }
  0xb1   : > { %v3010_v42 = vrot.slane %v8453_v19, 5  ;;  %v6863_v37 = vcombine.low %v8812_v61, %v8826_v53  ;;  %7962 = vmatprep.subr.msk.bf16.mxu1 %vm896_vm0, %v8056_v33  ;;  %v6849_v21 = vrot.slane %v6833_v26, 9  ;;  %v3004_v11 = vsel %vm8705_vm7, %v6844_v55, %v3003_v32 }
  0xb2   : > { %7379 = vmatmul.mubr.msk.bf16.gmra.mrb[16].mxu1 %vm847_vm1, %v6604_v60  ;;  %v6829_v60 = vld [vmem:[%s8185_s26 + $0x60] sm:$0xe]  ;;  %v8851_v19 = vsel %vm8705_vm7, %v6848_v36, %v3031_v47  ;;  %v3007_v27 = vsel %vm8705_vm7, %v3005_v59, %v3006_v52  ;;  %v3038_v15 = vrot.slane %v8577_v24, 5  ;;  %v3041_v43 = vrot.slane %v8581_v0, 5 }
  0xb3   : > { %7382 = vmatprep.mubr.msk.bf16.mxu1 %vm847_vm1, %v6605_v40  ;;  %v8839_v40 = vsel %vm8705_vm7, %v3026_v34, %v3027_v54  ;;  %v6607_v16 = vcombine.low %v8424_v39, %v8429_v45  ;;  %v6845_v46 = vrot.slane %v6829_v60, 9  ;;  %v6850_v4 = vrot.slane %v6834_v10, 9 }
  0xb4   : > { %v6864_v13 = vcombine.low %v8818_v18, %v8839_v40  ;;  %v6860_v22 = vcombine.low %v8798_v20, %v3000_v63  ;;  %v8870_v24 = vsel %vm8705_vm7, %v6849_v21, %v3038_v15  ;;  %v3040_v0 = vrot.slane %v3038_v15, 4  ;;  %v11161_v18 = vld [vmem:[#allocation15_spill] sm:$0xff] }
  0xb5   : > { %7503 = vmatmul.mubr.msk.bf16.gmra.mrb[4].mxu0 %vm847_vm1, %v6858_v35  ;;  %v3033_v35 = vrot.slane %v3031_v47, 4  ;;  %v6861_v55 = vcombine.low %v3004_v11, %v3007_v27  ;;  %v3012_v52 = vrot.slane %v3010_v42, 4  ;;  %v3013_v39 = vrot.slane %v8459_v29, 5  ;;  %v1353_v47 = vld [vmem:[%s8185_s26] sm:$0xe] }
  0xb6   : > { %7506 = vmatprep.mubr.msk.bf16.mxu0 %vm847_vm1, %v6859_v50  ;;  %v3045_v45 = vrot.slane %v8594_v6, 5  ;;  %v6835_v50 = vld [vmem:[%s8185_s26 + $0xa8] sm:$0xe]  ;;  %v8878_v20 = vsel %vm8705_vm7, %v3040_v0, %v3041_v43  ;;  %v3048_v23 = vrot.slane %v8603_v62, 5  ;;  %v3052_v28 = vrot.slane %v8615_v56, 5 }
  0xb7   : > { %v8863_v2 = vsel %vm8705_vm7, %v3033_v35, %v3034_v49  ;;  %v6866_v54 = vcombine.low %v8870_v24, %v8878_v20  ;;  %v6851_v34 = vrot.slane %v6835_v50, 9  ;;  %v3055_v62 = vrot.slane %v8623_v7, 5  ;;  %v8060_v50 = vld [vmem:[%s8185_s26 + $0x20] sm:$0x1] }
  0xb8   : > { %v6865_v32 = vcombine.low %v8851_v19, %v8863_v2  ;;  %v8886_v29 = vsel %vm8705_vm7, %v6850_v4, %v3045_v45  ;;  %v3047_v6 = vrot.slane %v3045_v45, 4  ;;  %v3011_v26 = vsel %vm8705_vm7, %v6845_v46, %v3010_v42  ;;  %v8058_v42 = vld [vmem:[%s8185_s26 + $0x8] sm:$0x1]  ;;  %v1354_v46 = vld [vmem:[%s8185_s26 + $0xc] sm:$0xe] }
  0xb9   : > { %v3014_v36 = vsel %vm8705_vm7, %v3012_v52, %v3013_v39  ;;  %v6608_v63 = vcombine.low %v8462_v31, %v8474_v51  ;;  %v8908_v7 = vsel %vm8705_vm7, %v6851_v34, %v3052_v28  ;;  %v3054_v60 = vrot.slane %v3052_v28, 4  ;;  %v6837_v51 = vld [vmem:[%s8185_s26 + $0xc0] sm:$0xe]  ;;  %v1356_v28 = vld [vmem:[%s8185_s26 + $0x24] sm:$0xe] }
  0xba   : > { %7383 = vmatmul.mubr.msk.bf16.gmra.mrb[20].mxu1 %vm847_vm1, %v6606_v9  ;;  %v8057_v9 = vld [vmem:[%s8185_s26 + $0x4] sm:$0xf]  ;;  %v8900_v49 = vsel %vm8705_vm7, %v3047_v6, %v3048_v23  ;;  %v1409_v10 = vrot.slane %v8058_v42, 5  ;;  %v6609_v33 = vcombine.low %v8504_v44, %v8510_v58  ;;  %v6862_v35 = vcombine.low %v3011_v26, %v3014_v36  ;;  %v6836_v42 = vld [vmem:[%s8185_s26 + $0xb4] sm:$0xe] }
  0xbb   : > { %7386 = vmatprep.mubr.msk.bf16.mxu1 %vm847_vm1, %v6607_v16  ;;  %v1406_v59 = vrot.slane %v8057_v9, 5  ;;  %v6867_v56 = vcombine.low %v8886_v29, %v8900_v49  ;;  %v6627_v21 = vrot.slane %v1353_v47, 9  ;;  %v8915_v31 = vsel %vm8705_vm7, %v3054_v60, %v3055_v62  ;;  %v8064_v29 = vld [vmem:[%s8185_s26 + $0x50] sm:$0x1] }
  0xbc   : > { %v6868_v27 = vcombine.low %v8908_v7, %v8915_v31  ;;  %v1413_v15 = vrot.slane %v8599_v41, 5  ;;  %v6853_v44 = vrot.slane %v6837_v51, 9  ;;  %v3066_v58 = vrot.slane %v8667_v3, 5  ;;  %v1355_v41 = vld [vmem:[%s8185_s26 + $0x18] sm:$0xe] }
  0xbd   : > { %7507 = vmatmul.mubr.msk.bf16.gmra.mrb[8].mxu0 %vm847_vm1, %v6860_v22  ;;  %v1408_v11 = vrot.slane %v1406_v59, 4  ;;  %v1407_v43 = vsel %vm8705_vm7, %v6627_v21, %v1406_v59  ;;  %v1420_v4 = vrot.slane %v8630_v30, 5  ;;  %v3069_v22 = vrot.slane %v8672_v48, 5 }
  0xbe   : > { %7510 = vmatprep.mubr.msk.bf16.mxu0 %vm847_vm1, %v6861_v55  ;;  %v8939_v3 = vsel %vm8705_vm7, %v6853_v44, %v3066_v58  ;;  %v3068_v0 = vrot.slane %v3066_v58, 4  ;;  %v8059_v55 = vld [vmem:[%s8185_s26 + $0x14] sm:$0x1]  ;;  %v6610_v39 = vcombine.low %v8536_v57, %v8546_v14  ;;  %v6628_v30 = vrot.slane %v1354_v46, 9  ;;  %v11164_v58 = vld [vmem:[#allocation2_spill] sm:$0xff] }
  0xbf   : > { %v1410_v16 = vsel %vm8705_vm7, %v1408_v11, %v1409_v10  ;;  %v1416_v52 = vrot.slane %v8059_v55, 5  ;;  %v1415_v48 = vrot.slane %v1413_v15, 4  ;;  %v6629_v53 = vrot.slane %v1355_v41, 9  ;;  %v1358_v46 = vld [vmem:[%s8185_s26 + $0x3c] sm:$0xe] }
  0xc0   : > { %v6644_v45 = vcombine.low %v1407_v43, %v1410_v16  ;;  %v8946_v61 = vsel %vm8705_vm7, %v3068_v0, %v3069_v22  ;;  %v1423_v23 = vrot.slane %v8060_v50, 5  ;;  %v1414_v57 = vsel %vm8705_vm7, %v6628_v30, %v1413_v15  ;;  %v11163_v15 = vld [vmem:[#allocation20_spill] sm:$0xff]  ;;  %v1359_v22 = vld [vmem:[%s8185_s26 + $0x48] sm:$0xe] }
  0xc1   : > { %v6870_v6 = vcombine.low %v8939_v3, %v8946_v61  ;;  %v1417_v14 = vsel %vm8705_vm7, %v1415_v48, %v1416_v52  ;;  %v1427_v9 = vrot.slane %v8654_v12, 5  ;;  %v1421_v59 = vsel %vm8705_vm7, %v6629_v53, %v1420_v4  ;;  %v1357_v12 = vld [vmem:[%s8185_s26 + $0x30] sm:$0xe]  ;;  %v8063_v52 = vld [vmem:[%s8185_s26 + $0x44] sm:$0x1] }
  0xc2   : > { %7387 = vmatmul.mubr.msk.bf16.gmra.mrb[24].mxu1 %vm847_vm1, %v6608_v63  ;;  %v1434_v62 = vrot.slane %v8680_v8, 5  ;;  %v6645_v26 = vcombine.low %v1414_v57, %v1417_v14  ;;  %v3059_v40 = vrot.slane %v11161_v18, 5  ;;  %v6630_v36 = vrot.slane %v1356_v28, 9  ;;  %v8061_v63 = vld [vmem:[%s8185_s26 + $0x2c] sm:$0x1]  ;;  %v8006_v18 = vld [vmem:[%s8185_s26 + $0x18] sm:$0xff]  }
  0xc3   : > { %7390 = vmatprep.mubr.msk.bf16.mxu1 %vm847_vm1, %v6609_v33  ;;  %v1429_v47 = vrot.slane %v1427_v9, 4  ;;  %v1430_v60 = vrot.slane %v8061_v63, 5  ;;  %v6631_v10 = vrot.slane %v1357_v12, 9  ;;  %v6852_v19 = vrot.slane %v6836_v42, 9  ;;  %v11165_v57 = vld [vmem:[#allocation23_spill] sm:$0xff] }
  0xc4   : > { %v1436_v33 = vrot.slane %v1434_v62, 4  ;;  %v3061_v2 = vrot.slane %v3059_v40, 4  ;;  %v1428_v11 = vsel %vm8705_vm7, %v6630_v36, %v1427_v9  ;;  %v1441_v44 = vrot.slane %v11163_v15, 5  ;;  %v8066_v12 = vld [vmem:[%s8185_s26 + $0x68] sm:$0x1] }
  0xc5   : > { %7511 = vmatmul.mubr.msk.bf16.gmra.mrb[12].mxu0 %vm847_vm1, %v6862_v35  ;;  %v8062_v35 = vld [vmem:[%s8185_s26 + $0x38] sm:$0x1]  ;;  %v1431_v51 = vsel %vm8705_vm7, %v1429_v47, %v1430_v60  ;;  %v1435_v43 = vsel %vm8705_vm7, %v6631_v10, %v1434_v62  ;;  %v3060_v24 = vsel %vm8705_vm7, %v6852_v19, %v3059_v40  ;;  %v6632_v0 = vrot.slane %v1358_v46, 9  ;;  %v1363_v36 = vld [vmem:[%s8185_s26 + $0x78] sm:$0xe] }
  0xc6   : > { %7514 = vmatprep.mubr.msk.bf16.mxu0 %vm847_vm1, %v6863_v37  ;;  %v1422_v37 = vrot.slane %v1420_v4, 4  ;;  %v1437_v8 = vrot.slane %v8062_v35, 5  ;;  %v1448_v4 = vrot.slane %v8715_v5, 5  ;;  %v6647_v41 = vcombine.low %v1428_v11, %v1431_v51  ;;  %v8067_v47 = vld [vmem:[%s8185_s26 + $0x7c] sm:$0xf] }
  0xc7   : > { %v1443_v55 = vrot.slane %v1441_v44, 4  ;;  %v6633_v5 = vrot.slane %v1359_v22, 9  ;;  %v1451_v49 = vrot.slane %v8064_v29, 5  ;;  %v1442_v30 = vsel %vm8705_vm7, %v6632_v0, %v1441_v44  ;;  %v8069_v3 = vld [vmem:[%s8185_s26 + $0x80] sm:$0x1]  ;;  %v8007_v44 = vld [vmem:[%s8185_s26 + $0x24] sm:$0xff]  }
  0xc8   : > { %v1424_v34 = vsel %vm8705_vm7, %v1422_v37, %v1423_v23  ;;  %v1438_v16 = vsel %vm8705_vm7, %v1436_v33, %v1437_v8  ;;  %v1455_v53 = vrot.slane %v8748_v1, 5  ;;  %v1360_v23 = vld [vmem:[%s8185_s26 + $0x54] sm:$0xe]  ;;  %v1462_v14 = vrot.slane %v11165_v57, 5  ;;  %v1361_v1 = vld [vmem:[%s8185_s26 + $0x60] sm:$0xe] }
  0xc9   : > { %v1449_v37 = vsel %vm8705_vm7, %v6633_v5, %v1448_v4  ;;  %v6634_v9 = vrot.slane %v1360_v23, 9  ;;  %v6635_v28 = vrot.slane %v1361_v1, 9  ;;  %v1469_v40 = vrot.slane %v8783_v38, 5  ;;  %v8068_v8 = vld [vmem:[%s8185_s26 + $0x74] sm:$0x1] }
  0xca   : > { %7391 = vmatmul.mubr.msk.bf16.gmra.mrb[28].mxu1 %vm847_vm1, %v6610_v39  ;;  %v1444_v39 = vrot.slane %v8063_v52, 5  ;;  %v1464_v62 = vrot.slane %v1462_v14, 4  ;;  %v1476_v63 = vrot.slane %v8067_v47, 5  ;;  %v1472_v19 = vrot.slane %v8068_v8, 5  ;;  %v8070_v11 = vld [vmem:[%s8185_s26 + $0x88] sm:$0xf] }
  0xcb   : > { %7396 = vmatprep.mubr.msk.bf16.mxu1 %vm847_vm1, %v6644_v45  ;;  %v1450_v45 = vrot.slane %v1448_v4, 4  ;;  %v1456_v60 = vsel %vm8705_vm7, %v6634_v9, %v1455_v53  ;;  %v1463_v38 = vsel %vm8705_vm7, %v6635_v28, %v1462_v14  ;;  %v1471_v35 = vrot.slane %v1469_v40, 4  ;;  %v8072_v0 = vld [vmem:[%s8185_s26 + $0x94] sm:$0xf]  ;;  %v1366_v52 = vld [vmem:[%s8185_s26 + $0x9c] sm:$0xe] }
  0xcc   : > { %v1445_v48 = vsel %vm8705_vm7, %v1443_v55, %v1444_v39  ;;  %v1479_v61 = vrot.slane %v8069_v3, 5  ;;  %v1483_v51 = vrot.slane %v8070_v11, 5  ;;  %v1490_v55 = vrot.slane %v8072_v0, 5  ;;  %v9073_v39 = vld [vmem:[%s11068_s1 + $0x10] sm:$0x3] }
  0xcd   : > { %7515 = vmatmul.mubr.msk.bf16.gmra.mrb[16].mxu0 %vm847_vm1, %v6864_v13  ;;  %v6646_v13 = vcombine.low %v1421_v59, %v1424_v34  ;;  %v1452_v50 = vsel %vm8705_vm7, %v1450_v45, %v1451_v49  ;;  %v6649_v7 = vcombine.low %v1442_v30, %v1445_v48  ;;  %v8065_v59 = vld [vmem:[%s8185_s26 + $0x5c] sm:$0x1]  ;;  %v1473_v46 = vsel %vm8705_vm7, %v1471_v35, %v1472_v19  ;;  %v6952_v45 = vld [vmem:[%s8185_s26 + $0x18] sm:$0xf]  ;;  %v8074_v1 = vld [vmem:[%s8185_s26 + $0xa0] sm:$0xf] }
  0xce   : > { %7518 = vmatprep.mubr.msk.bf16.mxu0 %vm847_vm1, %v6865_v32  ;;  %v11162_v32 = vld [vmem:[#allocation17_spill] sm:$0xff]  ;;  %v6650_v31 = vcombine.low %v1449_v37, %v1452_v50  ;;  %v1458_v34 = vrot.slane %v8065_v59, 5  ;;  %v6955_v37 = vld [vmem:[%s8185_s26 + $0x24] sm:$0xf]  ;;  %v6956_v50 = vld [vmem:[%s8185_s26 + $0x28] sm:$0xf] }
  0xcf   : > { %v3062_v21 = vrot.slane %v11162_v32, 5  ;;  %v6953_v29 = vld [vmem:[%s8185_s26 + $0x1c] sm:$0xf]  ;;  %v8073_v48 = vld [vmem:[%s8185_s26 + $0x98] sm:$0x1]  ;;  %v1492_v57 = vrot.slane %v1490_v55, 4 }
  0xd0   : > { %v6640_v14 = vrot.slane %v1366_v52, 9  ;;  %v3776_v9 = vshll.u32 %v6952_v45, 16  ;;  %v3786_v59 = vshrl.u32 %v6953_v29, 16  ;;  %v3797_v28 = vshrl.u32 %v6955_v37, 16  ;;  %v9120_v11 = vld [vmem:[%s8185_s26 + $0x34] sm:$0xf] }
  0xd1   : > { %v3063_v20 = vsel %vm8705_vm7, %v3061_v2, %v3062_v21  ;;  %v6637_v2 = vrot.slane %v1363_v36, 9  ;;  %v1478_v21 = vrot.slane %v1476_v63, 4  ;;  %v3830_v0 = vshll.u32 %v9120_v11, 16  ;;  %v8011_v52 = vld [vmem:[%s8185_s26 + $0x54] sm:$0xff]  }
  0xd2   : > { %7397 = vmatmul.mubr.msk.bf16.vlgmr.msra.gmra.mrb[0].mxu1 %vm847_vm1, %v6645_v26  ;;  %v1465_v26 = vrot.slane %v8066_v12, 5  ;;  %v3806_v12 = vshll.u32 %v6956_v50, 16  ;;  %v3778_v8 = vrot.slane %v3776_v9, 5 }
  0xd3   : > { %7400 = vmatprep.mubr.msk.bf16.mxu1 %vm847_vm1, %v6646_v13  ;;  %7701 = vmatpush3.bf16.msra.mxu1 %v11164_v58  ;;  %v1362_v13 = vld [vmem:[%s8185_s26 + $0x6c] sm:$0xe]  ;;  %v4255_v58 = vsel %vm896_vm0, %v8778_v17, 0  ;;  %v1477_v4 = vsel %vm8705_vm7, %v6637_v2, %v1476_v63  ;;  %v8071_v17 = vld [vmem:[%s8185_s26 + $0x8c] sm:$0x1]  ;;  %v3788_v2 = vrot.slane %v3786_v59, 4 }
  0xd4   : > { %v1466_v10 = vsel %vm8705_vm7, %v1464_v62, %v1465_v26  ;;  %v6636_v33 = vrot.slane %v1362_v13, 9  ;;  %v3800_v62 = vshll.u32 %v6955_v37, 16  ;;  %v3810_v26 = vshrl.u32 %v6956_v50, 16  ;;  %v8075_v63 = vld [vmem:[%s8185_s26 + $0xa4] sm:$0x1] }
  0xd5   : > { %7519 = vmatmul.mubr.msk.bf16.gmra.mrb[20].mxu0 %vm847_vm1, %v6866_v54  ;;  %v6648_v54 = vcombine.low %v1435_v43, %v1438_v16  ;;  %v6652_v15 = vcombine.low %v1463_v38, %v1466_v10  ;;  %v8008_v43 = vld [vmem:[%s8185_s26 + $0x30] sm:$0xff]   ;;  %v8076_v38 = vld [vmem:[%s8185_s26 + $0xac] sm:$0xf]  ;;  %v9146_v9 = vrot.slane %v3830_v0, 5  ;;  %v6961_v59 = vld [vmem:[%s8185_s26 + $0x3c] sm:$0xf] }
  0xd6   : > { %7522 = vmatprep.mubr.msk.bf16.mxu0 %vm847_vm1, %v6867_v56  ;;  %v6869_v56 = vcombine.low %v3060_v24, %v3063_v20  ;;  %v1470_v16 = vsel %vm8705_vm7, %v6636_v33, %v1469_v40  ;;  %v1485_v24 = vrot.slane %v1483_v51, 4  ;;  %v1486_v20 = vrot.slane %v8071_v17, 5  ;;  %v9110_v33 = vld [vmem:[%s8185_s26 + $0x20] sm:$0x1] }
  0xd7   : > { %v6653_v5 = vcombine.low %v1470_v16, %v1473_v46  ;;  %v1504_v10 = vrot.slane %v8076_v38, 5  ;;  %v3802_v3 = vrot.slane %v3800_v62, 5  ;;  %v9126_v46 = vld [vmem:[%s8185_s26 + $0x2c] sm:$0x1]  ;;  %v9197_v0 = vsel %vm896_vm0, %v9073_v39, 0 }
  0xd8   : > { %v9088_v23 = vsel %vm8705_vm7, %v1485_v24, %v1486_v20 }
  0xda   : > { %7401 = vmatmul.mubr.msk.bf16.gmra.mrb[4].mxu1 %vm847_vm1, %v6647_v41  ;;  %v1480_v41 = vsel %vm8705_vm7, %v1478_v21, %v1479_v61  ;;  %v3799_v21 = vrot.slane %v3797_v28, 4  ;;  %v9117_v61 = vrot.slane %v3806_v12, 5 }
  0xdb   : > { %7404 = vmatprep.mubr.msk.bf16.mxu1 %vm847_vm1, %v6648_v54  ;;  %v1365_v54 = vld [vmem:[%s8185_s26 + $0x90] sm:$0xe]  ;;  %v6654_v49 = vcombine.low %v1477_v4, %v1480_v41  ;;  %v1368_v41 = vld [vmem:[%s8185_s26 + $0xb4] sm:$0xe] }
  0xdc   : > { %v6639_v30 = vrot.slane %v1365_v54, 9  ;;  %v3792_v54 = vshll.u32 %v9110_v33, 16 }
  0xdd   : > { %7523 = vmatmul.mubr.msk.bf16.gmra.mrb[24].mxu0 %vm847_vm1, %v6868_v27  ;;  %v1457_v27 = vrot.slane %v1455_v53, 4  ;;  %v1493_v53 = vrot.slane %v8073_v48, 5 }
  0xde   : > { %7526 = vmatprep.mubr.msk.bf16.mxu0 %vm847_vm1, %v6869_v56  ;;  %v1491_v13 = vsel %vm8705_vm7, %v6639_v30, %v1490_v55  ;;  %v3834_v55 = vshrl.u32 %v9120_v11, 16 }
  0xdf   : > { %v1459_v42 = vsel %vm8705_vm7, %v1457_v27, %v1458_v34  ;;  %v3782_v27 = vshll.u32 %v6953_v29, 16  ;;  %v8009_v34 = vld [vmem:[%s8185_s26 + $0x3c] sm:$0xff]   ;;  %v1494_v36 = vsel %vm8705_vm7, %v1492_v57, %v1493_v53  ;;  %v6642_v53 = vrot.slane %v1368_v41, 9  ;;  %v9184_v41 = vld [vmem:[%s8185_s26 + $0x44] sm:$0x1] }
  0xe0   : > { %v6651_v32 = vcombine.low %v1456_v60, %v1459_v42  ;;  %v1500_v60 = vrot.slane %v8075_v63, 5  ;;  %v1367_v42 = vld [vmem:[%s8185_s26 + $0xa8] sm:$0xe]  ;;  %v6656_v4 = vcombine.low %v1491_v13, %v1494_v36  ;;  %v9160_v36 = vld [vmem:[%s8185_s26 + $0x40] sm:$0xf]  ;;  %v3845_v63 = vshrl.u32 %v6961_v59, 16 }
  0xe1   : > { %v9113_v19 = vrot.slane %v3782_v27, 5  ;;  %v3836_v27 = vrot.slane %v3834_v55, 4  ;;  %v6967_v55 = vld [vmem:[%s8185_s26 + $0x54] sm:$0xf] }
  0xe2   : > { %7405 = vmatmul.mubr.msk.bf16.gmra.mrb[8].mxu1 %vm847_vm1, %v6649_v7  ;;  %v1497_v7 = vrot.slane %v8074_v1, 5 }
  0xe3   : > { %7408 = vmatprep.mubr.msk.bf16.mxu1 %vm847_vm1, %v6650_v31  ;;  %v3773_v31 = vshrl.u32 %v6952_v45, 16  ;;  %v3803_v45 = vor.u32 %v3802_v3, %v3799_v21 }
  0xe4   : > { %v9104_v47 = vsel %vm8705_vm7, %v6640_v14, %v1497_v7 }
  0xe5   : > { %7527 = vmatmul.mubr.msk.bf16.gmra.mrb[28].mxu0 %vm847_vm1, %v6870_v6  ;;  %v1364_v6 = vld [vmem:[%s8185_s26 + $0x84] sm:$0xe]  ;;  %v3775_v35 = vrot.slane %v3773_v31, 4  ;;  %v3794_v31 = vrot.slane %v3792_v54, 5  ;;  %v3804_v28 = vrot.slane %v3803_v45, 4 }
  0xe6   : > { %7532 = vmatprep.mubr.msk.bf16.mxu0 %vm847_vm1, %v8006_v18  ;;  %v6638_v22 = vrot.slane %v1364_v6, 9  ;;  %v8010_v18 = vld [vmem:[%s8185_s26 + $0x48] sm:$0xff]   ;;  %v3812_v6 = vrot.slane %v3810_v26, 4  ;;  %v9151_v26 = vld [vmem:[%s8185_s26 + $0x38] sm:$0x1] }
  0xe7   : > { %v3779_v20 = vor.u32 %v3778_v8, %v3775_v35  ;;  %v3837_v35 = vor.u32 %v3836_v27, %v9146_v9  ;;  %v3840_v8 = vshll.u32 %v9151_v26, 16  ;;  %v3809_v3 = vsel %vm8219_vm4, %v3804_v28, %v9117_v61  ;;  %v8016_v28 = vld [vmem:[%s8185_s26 + $0x90] sm:$0xff]  }
  0xe8   : > { %v9081_v56 = vsel %vm8705_vm7, %v6638_v22, %v1483_v51  ;;  %v1499_v51 = vrot.slane %v1497_v7, 4  ;;  %v1506_v22 = vrot.slane %v1504_v10, 4  ;;  %v3813_v29 = vor.u32 %v3812_v6, %v9117_v61 }
  0xe9   : > { %v6655_v40 = vcombine.low %v9081_v56, %v9088_v23  ;;  %v8012_v56 = vld [vmem:[%s8185_s26 + $0x60] sm:$0xff]   ;;  %v8079_v23 = vld [vmem:[%s8185_s26 + $0xbc] sm:$0x1]  ;;  %v3780_v7 = vrot.slane %v3779_v20, 4  ;;  %v3838_v61 = vrot.slane %v3837_v35, 4 }
  0xea   : > { %7409 = vmatmul.mubr.msk.bf16.gmra.mrb[12].mxu1 %vm847_vm1, %v6651_v32  ;;  %v6958_v32 = vld [vmem:[%s8185_s26 + $0x30] sm:$0xf]  ;;  %v1501_v30 = vsel %vm8705_vm7, %v1499_v51, %v1500_v60  ;;  %v1514_v57 = vrot.slane %v8079_v23, 5  ;;  %v3814_v62 = vrot.slane %v3813_v29, 4  ;;  %v3848_v60 = vshll.u32 %v6961_v59, 16  ;;  %v8014_v51 = vld [vmem:[%s8185_s26 + $0x78] sm:$0xff]  }
  0xeb   : > { %7412 = vmatprep.mubr.msk.bf16.mxu1 %vm847_vm1, %v6652_v15  ;;  %v6641_v15 = vrot.slane %v1367_v42, 9  ;;  %v3821_v24 = vshrl.u32 %v6958_v32, 16  ;;  %v3824_v17 = vshll.u32 %v6958_v32, 16  ;;  %v6964_v42 = vld [vmem:[%s8185_s26 + $0x48] sm:$0xf]  ;;  %v3785_v32 = vsel %vm8219_vm4, %v3780_v7, %v9113_v19  ;;  %v8017_v23 = vld [vmem:[%s8185_s26 + $0x6c] sm:$0xff]  }
  0xec   : > { %v3896_v7 = vshll.u32 %v6967_v55, 16 }
  0xed   : > { %7533 = vmatmul.mubr.msk.bf16.vlgmr.msra.gmra.mrb[0].mxu0 %vm847_vm1, %v8007_v44  ;;  %v8077_v44 = vld [vmem:[%s8185_s26 + $0xb0] sm:$0x1]  ;;  %v1505_v48 = vsel %vm8705_vm7, %v6641_v15, %v1504_v10  ;;  %v3823_v14 = vrot.slane %v3821_v24, 4  ;;  %v3826_v1 = vrot.slane %v3824_v17, 5  ;;  %v3854_v15 = vshll.u32 %v9160_v36, 16 }
  0xee   : > { %7565 = vmatpush3.bf16.msra.mxu0 %v4255_v58  ;;  %7536 = vmatprep.mubr.msk.bf16.mxu0 %vm847_vm1, %v8008_v43  ;;  %v1507_v58 = vrot.slane %v8077_v44, 5  ;;  %v8078_v43 = vld [vmem:[%s8185_s26 + $0xb8] sm:$0xf]  ;;  %v3858_v44 = vshrl.u32 %v9160_v36, 16  ;;  %v9187_v24 = vld [vmem:[%s8185_s26 + $0x4c] sm:$0xf] }
  0xef   : > { %7967 = vmatprep.subr.msk.bf16.mxu0 %vm896_vm0, %v9073_v39  ;;  %v1511_v16 = vrot.slane %v8078_v43, 5  ;;  %v3827_v13 = vor.u32 %v3826_v1, %v3823_v14  ;;  %v3864_v39 = vshll.u32 %v9184_v41, 16  ;;  %v3882_v14 = vshrl.u32 %v9187_v24, 16 }
  0xf0   : > { %v1508_v50 = vsel %vm8705_vm7, %v1506_v22, %v1507_v58  ;;  %v3869_v58 = vshrl.u32 %v6964_v42, 16  ;;  %v3842_v22 = vrot.slane %v3840_v8, 5  ;;  %v3860_v45 = vrot.slane %v3858_v44, 4  ;;  %v9242_v8 = vld [vmem:[%s8185_s26 + $0x5c] sm:$0x1] }
  0xf1   : > { %v1513_v37 = vrot.slane %v1511_v16, 4  ;;  %v6658_v38 = vcombine.low %v1505_v48, %v1508_v50  ;;  %v3828_v43 = vrot.slane %v3827_v13, 4  ;;  %v8015_v50 = vld [vmem:[%s8185_s26 + $0x84] sm:$0xff]   ;;  %v3893_v1 = vshrl.u32 %v6967_v55, 16 }
  0xf2   : > { %7413 = vmatmul.mubr.msk.bf16.gmra.mrb[16].mxu1 %vm847_vm1, %v6653_v5  ;;  %v3789_v5 = vor.u32 %v3788_v2, %v9113_v19  ;;  %v3872_v19 = vshll.u32 %v6964_v42, 16  ;;  %v3871_v29 = vrot.slane %v3869_v58, 4  ;;  %v6976_v58 = vld [vmem:[%s8185_s26 + $0x78] sm:$0xf] }
  0xf3   : > { %7416 = vmatprep.mubr.msk.bf16.mxu1 %vm847_vm1, %v6654_v49  ;;  %v3816_v49 = vshll.u32 %v9126_v46, 16  ;;  %v1515_v10 = vsel %vm8705_vm7, %v1513_v37, %v1514_v57  ;;  %v9213_v37 = vld [vmem:[%s8185_s26 + $0x64] sm:$0xf]  ;;  %v3843_v57 = vsel %vm8219_vm4, %v3838_v61, %v3842_v22 }
  0xf5   : > { %7537 = vmatmul.mubr.msk.bf16.gmra.mrb[4].mxu0 %vm847_vm1, %v8009_v34  ;;  %v3790_v34 = vrot.slane %v3789_v5, 4  ;;  %v3818_v12 = vrot.slane %v3816_v49, 5  ;;  %v9204_v5 = vrot.slane %v3854_v15, 5  ;;  %v3874_v49 = vrot.slane %v3872_v19, 5 }
  0xf6   : > { %7540 = vmatprep.mubr.msk.bf16.mxu0 %vm847_vm1, %v8010_v18  ;;  %v6657_v18 = vcombine.low %v9104_v47, %v1501_v30  ;;  %v8013_v47 = vld [vmem:[%s8185_s26 + $0x6c] sm:$0xff]   ;;  %v3833_v30 = vsel %vm8219_vm4, %v3828_v43, %v9146_v9 }
  0xf7   : > { %v3795_v21 = vsel %vm8219_vm4, %v3790_v34, %v3794_v31  ;;  %v3819_v6 = vsel %vm8219_vm4, %v3814_v62, %v3818_v12  ;;  %v9221_v31 = vld [vmem:[%s8185_s26 + $0x50] sm:$0x1]  ;;  %v3861_v62 = vor.u32 %v3860_v45, %v9204_v5  ;;  %v3875_v12 = vor.u32 %v3874_v49, %v3871_v29  ;;  %v9265_v29 = vld [vmem:[%s8185_s26 + $0x7c] sm:$0xf]  ;;  %v8021_v49 = vld [vmem:[%s8185_s26 + $0x84] sm:$0xff]  }
  0xf8   : > { %v9191_v20 = vcombine.low %v3785_v32, %v3795_v21  ;;  %v9193_v54 = vcombine.low %v3809_v3, %v3819_v6  ;;  %v9230_v13 = vcombine.low %v3833_v30, %v3843_v57  ;;  %v3888_v35 = vshll.u32 %v9221_v31, 16  ;;  %v9245_v21 = vld [vmem:[%s8185_s26 + $0x70] sm:$0xf]  ;;  %v8019_v3 = vld [vmem:[%s8185_s26 + $0x78] sm:$0xff]  }
  0xf9   : > { %v3898_v32 = vrot.slane %v3896_v7, 5  ;;  %v9253_v19 = vrot.slane %v3861_v62, 4  ;;  %v9255_v43 = vrot.slane %v3875_v12, 4  ;;  %v3950_v55 = vshll.u32 %v9245_v21, 16  ;;  %v8020_v7 = vld [vmem:[%s8185_s26 + $0xa8] sm:$0xff]  }
  0xfa   : > { %7417 = vmatmul.mubr.msk.bf16.gmra.mrb[20].mxu1 %vm847_vm1, %v6655_v40  ;;  %v9157_v40 = vsel %vm8705_vm7, %v6642_v53, %v1511_v16  ;;  %v3847_v16 = vrot.slane %v3845_v63, 4  ;;  %v3878_v53 = vshll.u32 %v9187_v24, 16  ;;  %v3954_v45 = vshrl.u32 %v9245_v21, 16 }
  0xfb   : > { %7420 = vmatprep.mubr.msk.bf16.mxu1 %vm847_vm1, %v6656_v4  ;;  %v3850_v4 = vrot.slane %v3848_v60, 5  ;;  %v6659_v17 = vcombine.low %v9157_v40, %v1515_v10  ;;  %v3930_v40 = vshrl.u32 %v9213_v37, 16  ;;  %v9234_v60 = vrot.slane %v3864_v39, 5 }
  0xfc   : > { %v9236_v42 = vrot.slane %v3878_v53, 5  ;;  %v3884_v10 = vrot.slane %v3882_v14, 4  ;;  %v9269_v30 = vrot.slane %v3888_v35, 5  ;;  %v3968_v39 = vshll.u32 %v6976_v58, 16  ;;  %v8018_v53 = vld [vmem:[%s8185_s26 + $0x9c] sm:$0xff]  }
  0xfd   : > { %7541 = vmatmul.mubr.msk.bf16.gmra.mrb[8].mxu0 %vm847_vm1, %v8011_v52  ;;  %v9201_v52 = vld [vmem:[%s8185_s26 + $0x58] sm:$0xf]  ;;  %v3851_v48 = vor.u32 %v3850_v4, %v3847_v16  ;;  %v9258_v16 = vld [vmem:[%s8185_s26 + $0x68] sm:$0x1]  ;;  %v3932_v61 = vrot.slane %v3930_v40, 4  ;;  %v3912_v57 = vshll.u32 %v9242_v8, 16 }
  0xfe   : > { %7544 = vmatprep.mubr.msk.bf16.mxu0 %vm847_vm1, %v8012_v56  ;;  %v6970_v56 = vld [vmem:[%s8185_s26 + $0x60] sm:$0xf]  ;;  %v3902_v9 = vshll.u32 %v9201_v52, 16  ;;  %v3906_v27 = vshrl.u32 %v9201_v52, 16  ;;  %v9281_v12 = vrot.slane %v3950_v55, 5 }
  0xff   : > { %v3917_v59 = vshrl.u32 %v6970_v56, 16  ;;  %v3920_v34 = vshll.u32 %v6970_v56, 16  ;;  %v9232_v63 = vrot.slane %v3851_v48, 4  ;;  %v3885_v56 = vor.u32 %v3884_v10, %v9236_v42  ;;  %v9285_v40 = vld [vmem:[%s8185_s26 + $0x74] sm:$0x1] }
 0x100   : > { %v9249_v6 = vrot.slane %v3902_v9, 5  ;;  %v3965_v48 = vshrl.u32 %v6976_v58, 16  ;;  %v3970_v10 = vrot.slane %v3968_v39, 5  ;;  %v8025_v39 = vld [vmem:[%s8185_s26 + $0x9c] sm:$0xff]  }
 0x101   : > { %v3919_v15 = vrot.slane %v3917_v59, 4  ;;  %v3922_v44 = vrot.slane %v3920_v34, 5  ;;  %v3974_v59 = vshll.u32 %v9265_v29, 16  ;;  %v3978_v34 = vshrl.u32 %v9265_v29, 16 }
 0x102   : > { %7421 = vmatmul.mubr.msk.bf16.gmra.mrb[24].mxu1 %vm847_vm1, %v6657_v18  ;;  %v3926_v18 = vshll.u32 %v9213_v37, 16 }
 0x103   : > { %7424 = vmatprep.mubr.msk.bf16.mxu1 %vm847_vm1, %v6658_v38  ;;  %v6973_v38 = vld [vmem:[%s8185_s26 + $0x6c] sm:$0xf]  ;;  %v3923_v14 = vor.u32 %v3922_v44, %v3919_v15  ;;  %v3914_v15 = vrot.slane %v3912_v57, 5 }
 0x104   : > { %v9260_v4 = vrot.slane %v3926_v18, 5  ;;  %v3941_v22 = vshrl.u32 %v6973_v38, 16  ;;  %v3956_v18 = vrot.slane %v3954_v45, 4 }
 0x105   : > { %7545 = vmatmul.mubr.msk.bf16.gmra.mrb[12].mxu0 %vm847_vm1, %v8013_v47  ;;  %v3895_v47 = vrot.slane %v3893_v1, 4  ;;  %v6979_v1 = vld [vmem:[%s8185_s26 + $0x84] sm:$0xf]  ;;  %v3924_v44 = vrot.slane %v3923_v14, 4  ;;  %v8022_v14 = vld [vmem:[%s8185_s26 + $0xb4] sm:$0xff]  }
 0x106   : > { %7548 = vmatprep.mubr.msk.bf16.mxu0 %vm847_vm1, %v8014_v51  ;;  %v3908_v51 = vrot.slane %v3906_v27, 4  ;;  %v3933_v9 = vor.u32 %v3932_v61, %v9260_v4  ;;  %v3936_v27 = vshll.u32 %v9258_v16, 16  ;;  %v3989_v35 = vshrl.u32 %v6979_v1, 16 }
 0x107   : > { %v9289_v61 = vrot.slane %v3974_v59, 5 }
 0x108   : > { %v3938_v58 = vrot.slane %v3936_v27, 5  ;;  %v3934_v55 = vrot.slane %v3933_v9, 4  ;;  %v8024_v27 = vld [vmem:[%s8185_s26 + $0xc0] sm:$0xff]  }
 0x10a   : > { %7425 = vmatmul.mubr.msk.bf16.gmra.mrb[28].mxu1 %vm847_vm1, %v6659_v17  ;;  %v3944_v17 = vshll.u32 %v6973_v38, 16  ;;  %v3967_v38 = vrot.slane %v3965_v48, 4  ;;  %v9295_v48 = vld [vmem:[%s8185_s26 + $0x80] sm:$0x1] }
 0x10b   : > { %7446 = vmatprep.mubr.msk.bf16.mxu1 %vm847_vm1, %v8017_v23  ;;  %v3909_v23 = vor.u32 %v3908_v51, %v9249_v6 }
 0x10c   : > { %v3946_v62 = vrot.slane %v3944_v17, 5  ;;  %v8023_v17 = vld [vmem:[%s8185_s26 + $0x90] sm:$0xff]  }
 0x10d   : > { %7549 = vmatmul.mubr.msk.bf16.gmra.mrb[16].mxu0 %vm847_vm1, %v8015_v50  ;;  %v3899_v50 = vor.u32 %v3898_v32, %v3895_v47  ;;  %v3992_v47 = vshll.u32 %v6979_v1, 16  ;;  %v3886_v32 = vrot.slane %v3885_v56, 4  ;;  %v3910_v51 = vrot.slane %v3909_v23, 4 }
 0x10e   : > { %7552 = vmatprep.mubr.msk.bf16.mxu0 %vm847_vm1, %v8016_v28  ;;  %v3943_v28 = vrot.slane %v3941_v22, 4  ;;  %v3980_v22 = vrot.slane %v3978_v34, 4  ;;  %v3960_v56 = vshll.u32 %v9285_v40, 16  ;;  %v3991_v23 = vrot.slane %v3989_v35, 4  ;;  %v9347_v35 = vld [vmem:[%s8185_s26 + $0x94] sm:$0xf] }
 0x10f   : > { %v3994_v57 = vrot.slane %v3992_v47, 5  ;;  %v3867_v1 = vsel %vm8219_vm4, %v9253_v19, %v9234_v60  ;;  %v3891_v9 = vsel %vm8219_vm4, %v3886_v32, %v9269_v30  ;;  %v3915_v59 = vsel %vm8219_vm4, %v3910_v51, %v3914_v15  ;;  %v6982_v30 = vld [vmem:[%s8185_s26 + $0x90] sm:$0xf] }
 0x110   : > { %v3947_v45 = vor.u32 %v3946_v62, %v3943_v28  ;;  %v3929_v60 = vsel %vm8219_vm4, %v3924_v44, %v9260_v4  ;;  %v3984_v19 = vshll.u32 %v9295_v48, 16  ;;  %v9339_v62 = vrot.slane %v3960_v56, 5 }
 0x111   : > { %v4013_v51 = vshrl.u32 %v6982_v30, 16 }
 0x112   : > { %7447 = vmatmul.mubr.msk.bf16.vlgmr.msra.gmra.mrb[16].mxu1 %vm847_vm1, %v8019_v3  ;;  %v3900_v3 = vrot.slane %v3899_v50, 4  ;;  %v3971_v50 = vor.u32 %v3970_v10, %v3967_v38  ;;  %v9335_v34 = vrot.slane %v3947_v45, 4 }
 0x113   : > { %7450 = vmatprep.mubr.msk.bf16.mxu1 %vm847_vm1, %v8021_v49  ;;  %v3957_v49 = vor.u32 %v3956_v18, %v9281_v12  ;;  %v3995_v18 = vor.u32 %v3994_v57, %v3991_v23  ;;  %v8028_v23 = vld [vmem:[%s8185_s26 + $0xb4] sm:$0xff]  }
 0x114   : > { %v9342_v4 = vrot.slane %v3971_v50, 4  ;;  %v8026_v50 = vld [vmem:[%s8185_s26 + $0xcc] sm:$0xff]  }
 0x115   : > { %7553 = vmatmul.mubr.msk.bf16.gmra.mrb[20].mxu0 %vm847_vm1, %v8018_v53  ;;  %v3857_v53 = vsel %vm8219_vm4, %v9232_v63, %v9204_v5  ;;  %v3905_v5 = vsel %vm8219_vm4, %v3900_v3, %v9249_v6  ;;  %v9318_v63 = vld [vmem:[%s8185_s26 + $0x88] sm:$0xf]  ;;  %v3939_v6 = vsel %vm8219_vm4, %v3934_v55, %v3938_v58  ;;  %v9337_v28 = vrot.slane %v3957_v49, 4  ;;  %v9546_v49 = vld [vmem:[%s8185_s26 + $0xb8] sm:$0xf] }
 0x116   : > { %7556 = vmatprep.mubr.msk.bf16.mxu0 %vm847_vm1, %v8020_v7  ;;  %v3881_v7 = vsel %vm8219_vm4, %v9255_v43, %v9236_v42  ;;  %v3981_v42 = vor.u32 %v3980_v22, %v9289_v61  ;;  %v9329_v43 = vld [vmem:[%s8185_s26 + $0x8c] sm:$0x1]  ;;  %v3998_v38 = vshll.u32 %v9318_v63, 16  ;;  %v4002_v10 = vshrl.u32 %v9318_v63, 16 }
 0x117   : > { %v9350_v47 = vcombine.low %v3857_v53, %v3867_v1  ;;  %v9352_v32 = vcombine.low %v3881_v7, %v3891_v9  ;;  %v4008_v3 = vshll.u32 %v9329_v43, 16  ;;  %v9356_v15 = vcombine.low %v3905_v5, %v3915_v59  ;;  %v8027_v55 = vld [vmem:[%s8185_s26 + $0xa8] sm:$0xff]   ;;  %v7036_v53 = vld [vmem:[%s8185_s26 + $0x3c] sm:$0xe] }
 0x118   : > { %v9358_v44 = vrot.slane %v3981_v42, 4  ;;  %v9360_v58 = vrot.slane %v3984_v19, 5  ;;  %v4016_v22 = vshll.u32 %v6982_v30, 16  ;;  %v9364_v45 = vcombine.low %v3929_v60, %v3939_v6  ;;  %v7037_v60 = vld [vmem:[%s8185_s26 + $0x48] sm:$0xe] }
 0x119   : > { %v9384_v1 = vrot.slane %v3998_v38, 5  ;;  %v9386_v7 = vrot.slane %v4002_v10, 4  ;;  %v9388_v9 = vrot.slane %v4008_v3, 5  ;;  %v9390_v5 = vrot.slane %v4013_v51, 4  ;;  %v9568_v10 = vld [vmem:[%s8185_s26 + $0xc4] sm:$0xf] }
 0x11a   : > { %7451 = vmatmul.mubr.msk.bf16.gmra.mrb[20].mxu1 %vm847_vm1, %v8023_v17  ;;  %v7035_v17 = vld [vmem:[%s8185_s26 + $0x30] sm:$0xe]  ;;  %v4530_v59 = vrot.slane %v9120_v11, 5  ;;  %v9398_v19 = vrot.slane %v4016_v22, 5  ;;  %v4533_v30 = vrot.slane %v9151_v26, 5  ;;  %v7052_v6 = vrot.slane %v7036_v53, 9 }
 0x11b   : > { %7454 = vmatprep.mubr.msk.bf16.mxu1 %vm847_vm1, %v8025_v39  ;;  %v4022_v39 = vshll.u32 %v9347_v35, 16  ;;  %v4537_v26 = vrot.slane %v9160_v36, 5  ;;  %v4540_v22 = vrot.slane %v9184_v41, 5  ;;  %v4544_v53 = vrot.slane %v9187_v24, 5  ;;  %v8029_v24 = vld [vmem:[%s8185_s26 + $0xc0] sm:$0xff]  }
 0x11c   : > { %v4532_v3 = vrot.slane %v4530_v59, 4  ;;  %v7041_v36 = vld [vmem:[%s8185_s26 + $0x78] sm:$0xe] }
 0x11d   : > { %7557 = vmatmul.mubr.msk.bf16.gmra.mrb[24].mxu0 %vm847_vm1, %v8022_v14  ;;  %v9382_v14 = vrot.slane %v3995_v18, 4  ;;  %v7038_v18 = vld [vmem:[%s8185_s26 + $0x54] sm:$0xe]  ;;  %v9403_v38 = vrot.slane %v4022_v39, 5  ;;  %v9429_v41 = vsel %vm8705_vm7, %v7052_v6, %v4537_v26 }
 0x11e   : > { %7560 = vmatprep.mubr.msk.bf16.mxu0 %vm847_vm1, %v8024_v27  ;;  %v7051_v27 = vrot.slane %v7035_v17, 9  ;;  %v7053_v17 = vrot.slane %v7037_v60, 9  ;;  %v9419_v39 = vsel %vm8705_vm7, %v4532_v3, %v4533_v30  ;;  %v7040_v60 = vld [vmem:[%s8185_s26 + $0x6c] sm:$0xe]  ;;  %v4546_v30 = vrot.slane %v4544_v53, 4 }
 0x120   : > { %v9408_v11 = vsel %vm8705_vm7, %v7051_v27, %v4530_v59  ;;  %v7054_v27 = vrot.slane %v7038_v18, 9  ;;  %v4551_v59 = vrot.slane %v9201_v52, 5 }
 0x122   : > { %7455 = vmatmul.mubr.msk.bf16.gmra.mrb[24].mxu1 %vm847_vm1, %v8027_v55  ;;  %v7039_v55 = vld [vmem:[%s8185_s26 + $0x60] sm:$0xe]  ;;  %v9445_v6 = vsel %vm8705_vm7, %v7054_v27, %v4551_v59  ;;  %v4553_v52 = vrot.slane %v4551_v59, 4  ;;  %v7043_v27 = vld [vmem:[%s8185_s26 + $0x90] sm:$0xe] }
 0x123   : > { %7458 = vmatprep.mubr.msk.bf16.mxu1 %vm847_vm1, %v8028_v23  ;;  %v4547_v23 = vrot.slane %v9221_v31, 5  ;;  %v9436_v31 = vsel %vm8705_vm7, %v7053_v17, %v4544_v53  ;;  %v7055_v18 = vrot.slane %v7039_v55, 9  ;;  %v4561_v55 = vrot.slane %v9258_v16, 5  ;;  %v7042_v53 = vld [vmem:[%s8185_s26 + $0x84] sm:$0xe] }
 0x124   : > { %v7047_v16 = vld [vmem:[%s8185_s26 + $0xc0] sm:$0xe] }
 0x125   : > { %7561 = vmatmul.mubr.msk.bf16.gmra.mrb[28].mxu0 %vm847_vm1, %v8026_v50  ;;  %v4539_v50 = vrot.slane %v4537_v26, 4  ;;  %v4558_v26 = vrot.slane %v9213_v37, 5 }
 0x126   : > { %7566 = vmatprep.mubr.msk.bf16.mxu0 %vm847_vm1, %v9191_v20  ;;  %v4554_v20 = vrot.slane %v9242_v8, 5  ;;  %v9453_v8 = vsel %vm8705_vm7, %v4546_v30, %v4547_v23  ;;  %v4565_v23 = vrot.slane %v9245_v21, 5  ;;  %v7057_v30 = vrot.slane %v7041_v36, 9  ;;  %v9525_v21 = vld [vmem:[%s8185_s26 + $0xac] sm:$0xf] }
 0x127   : > { %v9441_v3 = vsel %vm8705_vm7, %v4539_v50, %v4540_v22  ;;  %v7056_v22 = vrot.slane %v7040_v60, 9  ;;  %v9465_v37 = vsel %vm8705_vm7, %v7055_v18, %v4558_v26  ;;  %v4560_v59 = vrot.slane %v4558_v26, 4 }
 0x128   : > { %v9461_v50 = vsel %vm8705_vm7, %v4553_v52, %v4554_v20  ;;  %v4568_v60 = vrot.slane %v9285_v40, 5  ;;  %v4572_v18 = vrot.slane %v9265_v29, 5  ;;  %v4575_v52 = vrot.slane %v9295_v48, 5  ;;  %v7044_v29 = vld [vmem:[%s8185_s26 + $0x9c] sm:$0xe] }
 0x129   : > { %v9475_v20 = vsel %vm8705_vm7, %v4560_v59, %v4561_v55  ;;  %v9485_v40 = vsel %vm8705_vm7, %v7056_v22, %v4565_v23  ;;  %v4567_v36 = vrot.slane %v4565_v23, 4  ;;  %v4579_v26 = vrot.slane %v9318_v63, 5  ;;  %v9501_v63 = vld [vmem:[%s8185_s26 + $0xa0] sm:$0xf] }
 0x12a   : > { %7459 = vmatmul.mubr.msk.bf16.gmra.mrb[28].mxu1 %vm847_vm1, %v8029_v24  ;;  %v7058_v24 = vrot.slane %v7042_v53, 9  ;;  %v4574_v48 = vrot.slane %v4572_v18, 4  ;;  %v4582_v55 = vrot.slane %v9329_v43, 5  ;;  %v7059_v22 = vrot.slane %v7043_v27, 9  ;;  %v9498_v53 = vld [vmem:[%s8185_s26 + $0x98] sm:$0x1] }
 0x12b   : > { %v4581_v59 = vrot.slane %v4579_v26, 4  ;;  %v4586_v23 = vrot.slane %v9347_v35, 5  ;;  %v4593_v17 = vrot.slane %v9501_v63, 5  ;;  %v11188_v25 = vcombine.low %v9445_v6, %v9461_v50 }
 0x12c   : > { %v9520_v27 = vsel %vm8705_vm7, %v4574_v48, %v4575_v52 }
 0x12d   : > { %7567 = vmatmul.mubr.msk.bf16.vlgmr.msra.gmra.mrb[0].mxu0 %vm847_vm1, %v9193_v54  ;;  %v9494_v54 = vsel %vm8705_vm7, %v7057_v30, %v4572_v18  ;;  %v7045_v30 = vld [vmem:[%s8185_s26 + $0xa8] sm:$0xe]  ;;  %v9514_v18 = vld [vmem:[%s8185_s26 + $0xa4] sm:$0x1]  ;;  %11169 = vst [vmem:[#allocation20_spill] sm:$0xff] %v9520_v27  ;;  %v9534_v43 = vsel %vm8705_vm7, %v4581_v59, %v4582_v55  ;;  %v9538_v52 = vsel %vm8705_vm7, %v7059_v22, %v4586_v23  ;;  %v4588_v48 = vrot.slane %v4586_v23, 4 }
 0x12e   : > { %7599 = vmatpush3.bf16.msra.mxu0 %v9197_v0  ;;  %7570 = vmatprep.mubr.msk.bf16.mxu0 %vm847_vm1, %v9230_v13  ;;  %11167 = vst [vmem:[#allocation15_spill] sm:$0xff] %v9494_v54  ;;  %v9505_v0 = vsel %vm8705_vm7, %v4567_v36, %v4568_v60  ;;  %v9509_v13 = vsel %vm8705_vm7, %v7058_v24, %v4579_v26  ;;  %v4589_v60 = vrot.slane %v9498_v53, 5  ;;  %v7060_v36 = vrot.slane %v7044_v29, 9  ;;  %v7046_v24 = vld [vmem:[%s8185_s26 + $0xb4] sm:$0xe] }
 0x12f   : > { %11168 = vst [vmem:[#allocation17_spill] sm:$0xff] %v9509_v13  ;;  %v9528_v26 = vld [vmem:[%s8185_s26 + $0xb0] sm:$0x1]  ;;  %11170 = vst [vmem:[#allocation2_spill] sm:$0xff] %v9534_v43  ;;  %v4596_v57 = vrot.slane %v9514_v18, 5  ;;  %v7061_v42 = vrot.slane %v7045_v30, 9 }
 0x130   : > { %11171 = vst [vmem:[#allocation23_spill] sm:$0xff] %v9538_v52  ;;  %v9550_v55 = vsel %vm8705_vm7, %v4588_v48, %v4589_v60  ;;  %v4600_v22 = vrot.slane %v9525_v21, 5  ;;  %v4603_v59 = vrot.slane %v9528_v26, 5  ;;  %v7062_v23 = vrot.slane %v7046_v24, 9  ;;  %v9555_v29 = vld [vmem:[%s8185_s26 + $0xbc] sm:$0x1] }
 0x131   : > { %11172 = vst [vmem:[#allocation3_spill] sm:$0xff] %v9550_v55  ;;  %v9561_v30 = vsel %vm8705_vm7, %v7060_v36, %v4593_v17  ;;  %v4595_v51 = vrot.slane %v4593_v17, 4  ;;  %v4607_v60 = vrot.slane %v9546_v49, 5  ;;  %v7048_v48 = vld [vmem:[%s8185_s26 + $0xcc] sm:$0xe]  ;;  %v4610_v36 = vrot.slane %v9555_v29, 5 }
 0x132   : > { %11173 = vst [vmem:[#allocation24_spill] sm:$0xff] %v9561_v30  ;;  %v9572_v24 = vsel %vm8705_vm7, %v7061_v42, %v4600_v22  ;;  %v4602_v56 = vrot.slane %v4600_v22, 4  ;;  %v7063_v55 = vrot.slane %v7047_v16, 9  ;;  %v9578_v17 = vld [vmem:[%s8185_s26 + $0xc8] sm:$0x1]  ;;  %v4614_v22 = vrot.slane %v9568_v10, 5 }
 0x133   : > { %11174 = vst [vmem:[#allocation25_spill] sm:$0xff] %v9572_v24  ;;  %v9586_v52 = vsel %vm8705_vm7, %v7062_v23, %v4607_v60  ;;  %v4609_v42 = vrot.slane %v4607_v60, 4  ;;  %v6985_v43 = vld [vmem:[%s8185_s26 + $0x9c] sm:$0xf]  ;;  %v4617_v13 = vrot.slane %v9578_v17, 5  ;;  %v11179_v23 = vshrl.u32 %v9347_v35, 16 }
 0x134   : > { %11176 = vst [vmem:[#allocation27_spill] sm:$0xff] %v9586_v52  ;;  %v9601_v27 = vld [vmem:[%s8185_s26 + $0xd4] sm:$0x1]  ;;  %v9611_v16 = vsel %vm8705_vm7, %v7063_v55, %v4614_v22  ;;  %v4046_v35 = vshll.u32 %v9501_v63, 16 }
 0x135   : > { %7571 = vmatmul.mubr.msk.bf16.gmra.mrb[4].mxu0 %vm847_vm1, %v9350_v47  ;;  %v9582_v47 = vsel %vm8705_vm7, %v4595_v51, %v4596_v57  ;;  %v7064_v57 = vrot.slane %v7048_v48, 9  ;;  %v9598_v51 = vld [vmem:[%s8185_s26 + $0xd0] sm:$0xf]  ;;  %v9607_v60 = vsel %vm8705_vm7, %v4609_v42, %v4610_v36  ;;  %v4624_v54 = vrot.slane %v9601_v27, 5 }
 0x136   : > { %7574 = vmatprep.mubr.msk.bf16.mxu0 %vm847_vm1, %v9352_v32  ;;  %11175 = vst [vmem:[#allocation26_spill] sm:$0xff] %v9582_v47  ;;  %v9594_v32 = vsel %vm8705_vm7, %v4602_v56, %v4603_v59  ;;  %11178 = vst [vmem:[#allocation29_spill] sm:$0xff] %v9607_v60  ;;  %v4616_v56 = vrot.slane %v4614_v22, 4  ;;  %v4032_v59 = vshll.u32 %v9498_v53, 16  ;;  %v6988_v47 = vld [vmem:[%s8185_s26 + $0xa8] sm:$0xf]  ;;  %v11180_v53 = vor.u32 %v9386_v7, %v9384_v1 }
 0x137   : > { %11177 = vst [vmem:[#allocation28_spill] sm:$0xff] %v9594_v32  ;;  %v4621_v30 = vrot.slane %v9598_v51, 5  ;;  %v4028_v32 = vrot.slane %v11179_v23, 4  ;;  %v4037_v36 = vshrl.u32 %v6985_v43, 16  ;;  %v4040_v42 = vshll.u32 %v6985_v43, 16  ;;  %v11192_v6 = vld [vmem:[#allocation20_spill] sm:$0xff] }
 0x138   : > { %v9623_v55 = vsel %vm8705_vm7, %v4616_v56, %v4617_v13  ;;  %v4006_v22 = vrot.slane %v11180_v53, 4  ;;  %v4050_v43 = vshrl.u32 %v9501_v63, 16  ;;  %v4061_v23 = vshrl.u32 %v6988_v47, 16  ;;  %v11194_v50 = vld [vmem:[#allocation17_spill] sm:$0xff] }
 0x139   : > { %v7080_v48 = vcombine.low %v9611_v16, %v9623_v55  ;;  %v9632_v60 = vsel %vm8705_vm7, %v7064_v57, %v4621_v30  ;;  %v4623_v52 = vrot.slane %v4621_v30, 4  ;;  %v4064_v24 = vshll.u32 %v6988_v47, 16 }
 0x13a   : > { %v4019_v7 = vor.u32 %v9398_v19, %v9390_v5  ;;  %v4070_v13 = vshll.u32 %v9525_v21, 16  ;;  %v4074_v56 = vshrl.u32 %v9525_v21, 16  ;;  %v4029_v63 = vor.u32 %v4028_v32, %v9403_v38 }
 0x13b   : > { %v9644_v57 = vsel %vm8705_vm7, %v4623_v52, %v4624_v54  ;;  %v4039_v30 = vrot.slane %v4037_v36, 4  ;;  %v4042_v47 = vrot.slane %v4040_v42, 5  ;;  %v11181_v5 = vsel %vm8219_vm4, %v9337_v28, %v9339_v62  ;;  %v6991_v42 = vld [vmem:[%s8185_s26 + $0xb4] sm:$0xf] }
 0x13c   : > { %v11182_v19 = vsel %vm8219_vm4, %v9335_v34, %v9281_v12  ;;  %v4011_v54 = vsel %vm8219_vm4, %v4006_v22, %v9388_v9  ;;  %v9668_v52 = vrot.slane %v4046_v35, 5  ;;  %v4052_v32 = vrot.slane %v4050_v43, 4 }
 0x13d   : > { %7575 = vmatmul.mubr.msk.bf16.gmra.mrb[8].mxu0 %vm847_vm1, %v9356_v15  ;;  %v7081_v15 = vcombine.low %v9632_v60, %v9644_v57  ;;  %v7008_v21 = vcombine.low %v11182_v19, %v11181_v5  ;;  %v4063_v36 = vrot.slane %v4061_v23, 4  ;;  %v4066_v28 = vrot.slane %v4064_v24, 5  ;;  %v6994_v19 = vld [vmem:[%s8185_s26 + $0xc0] sm:$0xf] }
 0x13e   : > { %7578 = vmatprep.mubr.msk.bf16.mxu0 %vm847_vm1, %v9364_v45  ;;  %v4001_v45 = vsel %vm8219_vm4, %v9382_v14, %v9384_v1  ;;  %v11183_v12 = vsel %vm8219_vm4, %v9358_v44, %v9360_v58  ;;  %v11184_v34 = vsel %vm8219_vm4, %v9342_v4, %v9289_v61  ;;  %v4034_v14 = vrot.slane %v4032_v59, 5 }
 0x13f   : > { %v7009_v62 = vcombine.low %v11184_v34, %v11183_v12  ;;  %v4072_v1 = vrot.slane %v4070_v13, 5  ;;  %v4076_v9 = vrot.slane %v4074_v56, 4  ;;  %v4020_v53 = vrot.slane %v4019_v7, 4 }
 0x140   : > { %v4030_v22 = vrot.slane %v4029_v63, 4  ;;  %v4043_v35 = vor.u32 %v4042_v47, %v4039_v30  ;;  %v4056_v24 = vshll.u32 %v9514_v18, 16  ;;  %v7010_v43 = vcombine.low %v4001_v45, %v4011_v54 }
 0x141   : > { %v4053_v23 = vor.u32 %v4052_v32, %v9668_v52  ;;  %v4067_v5 = vor.u32 %v4066_v28, %v4063_v36  ;;  %v4080_v44 = vshll.u32 %v9528_v26, 16  ;;  %v4085_v58 = vshrl.u32 %v6991_v42, 16 }
 0x142   : > { %v4077_v61 = vor.u32 %v4076_v9, %v4072_v1  ;;  %v4088_v4 = vshll.u32 %v6991_v42, 16  ;;  %v4094_v59 = vshll.u32 %v9546_v49, 16  ;;  %v4098_v7 = vshrl.u32 %v9546_v49, 16 }
 0x143   : > { %v4025_v18 = vsel %vm8219_vm4, %v4020_v53, %v9403_v38  ;;  %v4035_v13 = vsel %vm8219_vm4, %v4030_v22, %v4034_v14  ;;  %v4044_v26 = vrot.slane %v4043_v35, 4  ;;  %v4058_v56 = vrot.slane %v4056_v24, 5  ;;  %v6997_v53 = vld [vmem:[%s8185_s26 + $0xcc] sm:$0xf] }
 0x144   : > { %v4109_v63 = vshrl.u32 %v6994_v19, 16  ;;  %v4112_v30 = vshll.u32 %v6994_v19, 16  ;;  %v4118_v47 = vshll.u32 %v9568_v10, 16  ;;  %v4054_v45 = vrot.slane %v4053_v23, 4 }
 0x145   : > { %7579 = vmatmul.mubr.msk.bf16.gmra.mrb[12].mxu0 %vm847_vm1, %v7008_v21  ;;  %v4122_v21 = vshrl.u32 %v9568_v10, 16  ;;  %v4068_v49 = vrot.slane %v4067_v5, 4  ;;  %v4082_v54 = vrot.slane %v4080_v44, 5  ;;  %v4087_v32 = vrot.slane %v4085_v58, 4 }
 0x146   : > { %7582 = vmatprep.mubr.msk.bf16.mxu0 %vm847_vm1, %v7009_v62  ;;  %v4078_v36 = vrot.slane %v4077_v61, 4  ;;  %v4090_v28 = vrot.slane %v4088_v4, 5  ;;  %v4096_v12 = vrot.slane %v4094_v59, 5  ;;  %v4100_v38 = vrot.slane %v4098_v7, 4 }
 0x147   : > { %v7011_v34 = vcombine.low %v4025_v18, %v4035_v13  ;;  %v4111_v62 = vrot.slane %v4109_v63, 4  ;;  %v4114_v14 = vrot.slane %v4112_v30, 5  ;;  %v4120_v9 = vrot.slane %v4118_v47, 5 }
 0x148   : > { %v4124_v42 = vrot.slane %v4122_v21, 4  ;;  %v4049_v22 = vsel %vm8219_vm4, %v4044_v26, %v9668_v52  ;;  %v4059_v10 = vsel %vm8219_vm4, %v4054_v45, %v4058_v56  ;;  %v4104_v35 = vshll.u32 %v9555_v29, 16 }
 0x149   : > { %v4073_v24 = vsel %vm8219_vm4, %v4068_v49, %v4072_v1  ;;  %v4083_v23 = vsel %vm8219_vm4, %v4078_v36, %v4082_v54  ;;  %v4091_v5 = vor.u32 %v4090_v28, %v4087_v32  ;;  %v4101_v44 = vor.u32 %v4100_v38, %v4096_v12  ;;  %v8080_v38 = vld [vmem:[%s8185_s26 + $0x1c] sm:$0xf] }
 0x14a   : > { %v4133_v58 = vshrl.u32 %v6997_v53, 16  ;;  %v4136_v19 = vshll.u32 %v6997_v53, 16  ;;  %v4142_v52 = vshll.u32 %v9598_v51, 16  ;;  %v4146_v61 = vshrl.u32 %v9598_v51, 16 }
 0x14b   : > { %v4115_v4 = vor.u32 %v4114_v14, %v4111_v62  ;;  %v4125_v29 = vor.u32 %v4124_v42, %v4120_v9  ;;  %v7012_v59 = vcombine.low %v4049_v22, %v4059_v10  ;;  %v7013_v7 = vcombine.low %v4073_v24, %v4083_v23  ;;  %v7033_v62 = vld [vmem:[%s8185_s26 + $0x18] sm:$0xe]  ;;  %v8081_v23 = vld [vmem:[%s8185_s26 + $0x28] sm:$0xf] }
 0x14c   : > { %v4092_v1 = vrot.slane %v4091_v5, 4  ;;  %v4102_v18 = vrot.slane %v4101_v44, 4  ;;  %v4106_v13 = vrot.slane %v4104_v35, 5  ;;  %v4135_v26 = vrot.slane %v4133_v58, 4 }
 0x14d   : > { %7583 = vmatmul.mubr.msk.bf16.gmra.mrb[16].mxu0 %vm847_vm1, %v7010_v43  ;;  %v4128_v43 = vshll.u32 %v9578_v17, 16  ;;  %v4138_v56 = vrot.slane %v4136_v19, 5  ;;  %v4144_v63 = vrot.slane %v4142_v52, 5  ;;  %v4148_v30 = vrot.slane %v4146_v61, 4  ;;  %v7034_v19 = vld [vmem:[%s8185_s26 + $0x24] sm:$0xe] }
 0x14e   : > { %7586 = vmatprep.mubr.msk.bf16.mxu0 %vm847_vm1, %v7011_v34  ;;  %v4116_v47 = vrot.slane %v4115_v4, 4  ;;  %v4126_v21 = vrot.slane %v4125_v29, 4  ;;  %v4097_v51 = vsel %vm8219_vm4, %v4092_v1, %v4096_v12  ;;  %v4107_v17 = vsel %vm8219_vm4, %v4102_v18, %v4106_v13  ;;  %v11197_v18 = vld [vmem:[#allocation23_spill] sm:$0xff] }
 0x14f   : > { %v4130_v45 = vrot.slane %v4128_v43, 5  ;;  %v4139_v49 = vor.u32 %v4138_v56, %v4135_v26  ;;  %v4149_v54 = vor.u32 %v4148_v30, %v4144_v63  ;;  %v4152_v32 = vshll.u32 %v9601_v27, 16  ;;  %v11198_v13 = vld [vmem:[#allocation3_spill] sm:$0xff]  ;;  %v11200_v56 = vld [vmem:[#allocation24_spill] sm:$0xff] }
 0x150   : > { %v4121_v36 = vsel %vm8219_vm4, %v4116_v47, %v4120_v9  ;;  %v4516_v34 = vrot.slane %v8080_v38, 5  ;;  %v7014_v12 = vcombine.low %v4097_v51, %v4107_v17  ;;  %v7049_v10 = vrot.slane %v7033_v62, 9  ;;  %v11204_v30 = vld [vmem:[#allocation28_spill] sm:$0xff] }
 0x151   : > { %v4131_v28 = vsel %vm8219_vm4, %v4126_v21, %v4130_v45  ;;  %v4140_v42 = vrot.slane %v4139_v49, 4  ;;  %v4150_v53 = vrot.slane %v4149_v54, 4  ;;  %v4154_v22 = vrot.slane %v4152_v32, 5  ;;  %v11206_v21 = vld [vmem:[#allocation27_spill] sm:$0xff]  ;;  %v11207_v45 = vld [vmem:[#allocation29_spill] sm:$0xff] }
 0x152   : > { %v7015_v14 = vcombine.low %v4121_v36, %v4131_v28  ;;  %v4518_v35 = vrot.slane %v4516_v34, 4  ;;  %v4519_v27 = vrot.slane %v9110_v33, 5  ;;  %v4523_v5 = vrot.slane %v8081_v23, 5 }
 0x153   : > { %v4145_v9 = vsel %vm8219_vm4, %v4140_v42, %v4144_v63  ;;  %v4155_v24 = vsel %vm8219_vm4, %v4150_v53, %v4154_v22  ;;  %v4517_v44 = vsel %vm8705_vm7, %v7049_v10, %v4516_v34  ;;  %v7050_v61 = vrot.slane %v7034_v19, 9  ;;  %v11201_v63 = vld [vmem:[#allocation26_spill] sm:$0xff] }
 0x154   : > { %v4520_v58 = vsel %vm8705_vm7, %v4518_v35, %v4519_v27  ;;  %v7016_v33 = vcombine.low %v4145_v9, %v4155_v24  ;;  %v4525_v4 = vrot.slane %v4523_v5, 4  ;;  %v4526_v29 = vrot.slane %v9126_v46, 5 }
 0x155   : > { %7587 = vmatmul.mubr.msk.bf16.gmra.mrb[20].mxu0 %vm847_vm1, %v7012_v59  ;;  %v7066_v52 = vcombine.low %v4517_v44, %v4520_v58  ;;  %v4524_v2 = vsel %vm8705_vm7, %v7050_v61, %v4523_v5  ;;  %v11186_v46 = vcombine.low %v9429_v41, %v9441_v3  ;;  %v11187_v1 = vcombine.low %v9436_v31, %v9453_v8  ;;  %v11191_v3 = vld [vmem:[#allocation15_spill] sm:$0xff] }
 0x156   : > { %7590 = vmatprep.mubr.msk.bf16.mxu0 %vm847_vm1, %v7013_v7  ;;  %v4527_v43 = vsel %vm8705_vm7, %v4525_v4, %v4526_v29  ;;  %v11185_v7 = vcombine.low %v9408_v11, %v9419_v39  ;;  %v11189_v11 = vcombine.low %v9465_v37, %v9475_v20  ;;  %v5046_v39 = vld [vmem:[%s11069_s2] sm:$0xf]  ;;  %v11190_v31 = vcombine.low %v9485_v40, %v9505_v0  ;;  %v11203_v0 = vld [vmem:[#allocation25_spill] sm:$0xff] }
 0x157   : > { %v7067_v59 = vcombine.low %v4524_v2, %v4527_v43  ;;  %7968 = vmatprep.subr.msk.bf16.mxu1 %vm5096_vm8, %v5046_v39  ;;  %v5098_v41 = vsel %vm5096_vm8, %v5046_v39, 0  ;;  %v11193_v8 = vcombine.low %v11191_v3, %v11192_v6  ;;  %v11195_v37 = vld [vmem:[#allocation2_spill] sm:$0xff]  ;;  %v11199_v26 = vcombine.low %v11197_v18, %v11198_v13 }
 0x158   : > { %7633 = vmatpush3.bf16.msra.mxu1 %v5098_v41  ;;  %v11196_v20 = vcombine.low %v11194_v50, %v11195_v37  ;;  %v11202_v40 = vcombine.low %v11200_v56, %v11201_v63  ;;  %v11205_v47 = vcombine.low %v11203_v0, %v11204_v30  ;;  %v11208_v51 = vcombine.low %v11206_v21, %v11207_v45  ;;  %v9869_v4 = vld [vmem:[%s11073_s6] ss:$0 sm:$0xff] }
 0x159   : > { %5646 = vrot.lane.b32.xlu0 %v9869_v4, %s8092_s27  ;;  %v9876_v29 = vld [vmem:[%s11074_s7] ss:$0 sm:$0xff] }
 0x15a   : > { %5943 = vrot.lane.b32.xlu1 %v9876_v29, %s8093_s30  ;;  %v9891_v43 = vld [vmem:[%s11071_s4] ss:$0 sm:$0xff] }
 0x15d   : > { %7591 = vmatmul.mubr.msk.bf16.gmra.mrb[24].mxu0 %vm847_vm1, %v7014_v12  ;;  %5681 = vrot.lane.b32.xlu0 %v9876_v29, %s8092_s27 }
 0x15e   : > { %7594 = vmatprep.mubr.msk.bf16.mxu0 %vm847_vm1, %v7015_v14  ;;  %v9830_v14 = vld [vmem:[%s11070_s3] sm:$0x3]  ;;  %6173 = vrot.lane.b32.xlu1 %v9876_v29, %s8094_s11 }
 0x15f   : > { %7969 = vmatprep.subr.msk.bf16.mxu1 %vm896_vm0, %v9830_v14 }
 0x161   : > { %5908 = vrot.lane.b32.xlu0 %v9869_v4, %s8093_s30 }
 0x165   : > { %7595 = vmatmul.mubr.msk.bf16.gmra.mrb[28].mxu0 %vm847_vm1, %v7016_v33  ;;  %6138 = vrot.lane.b32.xlu0 %v9869_v4, %s8094_s11 }
 0x166   : > { %7600 = vmatprep.mubr.msk.bf16.mxu0 %vm847_vm1, %v7066_v52 }
 0x16d   : > { %7601 = vmatmul.mubr.msk.bf16.vlgmr.msra.gmra.mrb[0].mxu0 %vm847_vm1, %v7067_v59 }
 0x16e   : > { %7604 = vmatprep.mubr.msk.bf16.mxu0 %vm847_vm1, %v11185_v7 }
 0x175   : > { %7605 = vmatmul.mubr.msk.bf16.gmra.mrb[4].mxu0 %vm847_vm1, %v11186_v46  ;;  %v9896_v46 = vld [vmem:[%s11072_s5] ss:$0 sm:$0xff] }
 0x176   : > { %7608 = vmatprep.mubr.msk.bf16.mxu0 %vm847_vm1, %v11187_v1 }
 0x17d   : > { %7609 = vmatmul.mubr.msk.bf16.gmra.mrb[8].mxu0 %vm847_vm1, %v11188_v25 }
 0x17e   : > { %7612 = vmatprep.mubr.msk.bf16.mxu0 %vm847_vm1, %v11189_v11 }
 0x185   : > { %7613 = vmatmul.mubr.msk.bf16.gmra.mrb[12].mxu0 %vm847_vm1, %v11190_v31 }
 0x186   : > { %7616 = vmatprep.mubr.msk.bf16.mxu0 %vm847_vm1, %v11193_v8 }
 0x18d   : > { %7617 = vmatmul.mubr.msk.bf16.gmra.mrb[16].mxu0 %vm847_vm1, %v11196_v20 }
 0x18e   : > { %7620 = vmatprep.mubr.msk.bf16.mxu0 %vm847_vm1, %v11199_v26 }
 0x195   : > { %7621 = vmatmul.mubr.msk.bf16.gmra.mrb[20].mxu0 %vm847_vm1, %v11202_v40 }
 0x196   : > { %7624 = vmatprep.mubr.msk.bf16.mxu0 %vm847_vm1, %v11205_v47 }
 0x19d   : > { %7625 = vmatmul.mubr.msk.bf16.gmra.mrb[24].mxu0 %vm847_vm1, %v11208_v51 }
 0x19e   : > { %7628 = vmatprep.mubr.msk.bf16.mxu0 %vm847_vm1, %v7080_v48 }
 0x1a5   : > { %7629 = vmatmul.mubr.msk.bf16.gmra.mrb[28].mxu0 %vm847_vm1, %v7081_v15  ;;  %v7398_v17 = vpop.f32.mrb[0].mxu1 }
 0x1a6   : > { %v1651_v49 = vpop.f32.mrb[1].mxu1 }
 0x1a7   : > { %v7399_v54 = vpop.f32.mrb[2].mxu1 }
 0x1a8   : > { %v1654_v32 = vpop.f32.mrb[3].mxu1 }
 0x1ad   : > { %v7402_v36 = vpop.f32.mrb[4].mxu1 }
 0x1ae   : > { %v9805_v28 = vpop.f32.mrb[5].mxu1 }
 0x1af   : > { %v9807_v38 = vpop.f32.mrb[6].mxu1 }
 0x1b0   : > { %v9809_v34 = vpop.f32.mrb[7].mxu1 }
 0x1b5   : > { %v9811_v62 = vpop.f32.mrb[8].mxu1 }
 0x1b6   : > { %v9813_v16 = vpop.f32.mrb[9].mxu1 }
 0x1b7   : > { %v9815_v48 = vpop.f32.mrb[10].mxu1 }
 0x1b8   : > { %v9817_v60 = vpop.f32.mrb[11].mxu1 }
 0x1bd   : > { %v9819_v55 = vpop.f32.mrb[12].mxu1 }
 0x1be   : > { %v9821_v57 = vpop.f32.mrb[13].mxu1 }
 0x1bf   : > { %v9823_v15 = vpop.f32.mrb[14].mxu1 }
 0x1c0   : > { %v9825_v12 = vpop.f32.mrb[15].mxu1 }
 0x1e5   : > { %v9834_v42 = vpop.f32.mrb[16].mxu1 }
 0x1e6   : > { %v9836_v53 = vpop.f32.mrb[17].mxu1 }
 0x1e7   : > { %v9838_v22 = vpop.f32.mrb[18].mxu1 }
 0x1e8   : > { %v9840_v10 = vpop.f32.mrb[19].mxu1 }
 0x1ed   : > { %v9842_v35 = vpop.f32.mrb[20].mxu1 }
 0x1ee   : > { %v9844_v27 = vpop.f32.mrb[21].mxu1 }
 0x1ef   : > { %v9846_v9 = vpop.f32.mrb[22].mxu1 }
 0x1f0   : > { %v9848_v24 = vpop.f32.mrb[23].mxu1 }
 0x1f5   : > { %v9850_v23 = vpop.f32.mrb[24].mxu1 }
 0x1f6   : > { %v9852_v5 = vpop.f32.mrb[25].mxu1 }
 0x1f7   : > { %v9854_v44 = vpop.f32.mrb[26].mxu1 }
 0x1f8   : > { %v9856_v58 = vpop.f32.mrb[27].mxu1 }
 0x1fd   : > { %v9858_v19 = vpop.f32.mrb[28].mxu1 }
 0x1fe   : > { %v9860_v33 = vpop.f32.mrb[29].mxu1 }
 0x1ff   : > { %v9862_v52 = vpop.f32.mrb[30].mxu1 }
 0x200   : > { %v9864_v61 = vpop.f32.mrb[31].mxu1 }
 0x240   : > { %v7602_v2 = vpop.f32.mrb[0].mxu0 }
 0x241   : > { %v7702_v59 = vadd.f32 %v7602_v2, %v7398_v17  ;;  %v4761_v7 = vpop.f32.mrb[1].mxu0 }
 0x242   : > { %v7703_v1 = vadd.f32 %v4761_v7, %v1651_v49  ;;  %v7603_v25 = vpop.f32.mrb[2].mxu0 }
 0x243   : > { %v4929_v11 = vmul.f32 %v7702_v59, %v9891_v43  ;;  %v7704_v39 = vadd.f32 %v7603_v25, %v7399_v54  ;;  %v4764_v41 = vpop.f32.mrb[3].mxu0 }
 0x244   : > { %v4927_v31 = vmul.f32 %v7703_v1, %v9891_v43  ;;  %v7705_v3 = vadd.f32 %v4764_v41, %v1654_v32 }
 0x245   : > { %v4968_v6 = vadd.f32 %v9896_v46, %v4929_v11  ;;  %v4930_v8 = vmul.f32 %v7704_v39, %v9891_v43 }
 0x246   : > { %v4966_v50 = vadd.f32 %v9896_v46, %v4927_v31  ;;  %v4928_v37 = vmul.f32 %v7705_v3, %v9891_v43 }
 0x247   : > { %v4969_v20 = vadd.f32 %v9896_v46, %v4930_v8  ;;  %v5000_v26 = vmax.f32 %v4968_v6, 0.0 }
 0x248   : > { %v4967_v18 = vadd.f32 %v9896_v46, %v4928_v37  ;;  %v7606_v13 = vpop.f32.mrb[4].mxu0  ;;  %v4998_v0 = vmax.f32 %v4966_v50, 0.0 }
 0x249   : > { %v5001_v56 = vmax.f32 %v4969_v20, 0.0  ;;  %v7706_v63 = vadd.f32 %v7606_v13, %v7402_v36  ;;  %v4777_v40 = vpop.f32.mrb[5].mxu0 }
 0x24a   : > { %v4999_v30 = vmax.f32 %v4967_v18, 0.0  ;;  %v7707_v47 = vadd.f32 %v4777_v40, %v9805_v28  ;;  %v7607_v21 = vpop.f32.mrb[6].mxu0  ;;  %v5263_v28 = vsel %vm896_vm0, %v9830_v14, 0 }
 0x24b   : > { %v5031_v45 = vpack.c.bf16 %v5001_v56, %v5000_v26  ;;  %v4933_v51 = vmul.f32 %v7706_v63, %v9891_v43  ;;  %v7708_v17 = vadd.f32 %v7607_v21, %v9807_v38  ;;  %v4780_v49 = vpop.f32.mrb[7].mxu0 }
 0x24c   : > { %v5030_v54 = vpack.c.bf16 %v4999_v30, %v4998_v0  ;;  %v4931_v32 = vmul.f32 %v7707_v47, %v9891_v43  ;;  %v7709_v2 = vadd.f32 %v4780_v49, %v9809_v34 }
 0x24d   : > { %v4972_v36 = vadd.f32 %v9896_v46, %v4933_v51  ;;  %v4934_v59 = vmul.f32 %v7708_v17, %v9891_v43 }
 0x24e   : > { %v4970_v7 = vadd.f32 %v9896_v46, %v4931_v32  ;;  %v4932_v1 = vmul.f32 %v7709_v2, %v9891_v43  ;;  %7634 = vmatprep.mubr.msk.bf16.mxu1 %vm5047_vm9, %v5030_v54 }
 0x24f   : > { %v4973_v38 = vadd.f32 %v9896_v46, %v4934_v59  ;;  %7635 = vmatmul.mubr.msk.bf16.vlgmr.msra.gmra.mrb[32].mxu1 %vm5047_vm9, %v5031_v45  ;;  %v5004_v11 = vmax.f32 %v4972_v36, 0.0 }
 0x250   : > { %v4971_v25 = vadd.f32 %v9896_v46, %v4932_v1  ;;  %7667 = vmatpush3.bf16.msra.mxu1 %v5263_v28  ;;  %v7610_v34 = vpop.f32.mrb[8].mxu0  ;;  %v5002_v14 = vmax.f32 %v4970_v7, 0.0 }
 0x251   : > { %v5005_v39 = vmax.f32 %v4973_v38, 0.0  ;;  %v7710_v41 = vadd.f32 %v7610_v34, %v9811_v62  ;;  %v4793_v31 = vpop.f32.mrb[9].mxu0 }
 0x252   : > { %v5003_v3 = vmax.f32 %v4971_v25, 0.0  ;;  %v7711_v6 = vadd.f32 %v4793_v31, %v9813_v16  ;;  %v7611_v8 = vpop.f32.mrb[10].mxu0 }
 0x253   : > { %v5033_v50 = vpack.c.bf16 %v5005_v39, %v5004_v11  ;;  %v4937_v37 = vmul.f32 %v7710_v41, %v9891_v43  ;;  %v7712_v20 = vadd.f32 %v7611_v8, %v9815_v48  ;;  %v4796_v18 = vpop.f32.mrb[11].mxu0 }
 0x254   : > { %v5032_v13 = vpack.c.bf16 %v5003_v3, %v5002_v14  ;;  %v4935_v26 = vmul.f32 %v7711_v6, %v9891_v43  ;;  %v7713_v56 = vadd.f32 %v4796_v18, %v9817_v60 }
 0x255   : > { %v4976_v63 = vadd.f32 %v9896_v46, %v4937_v37  ;;  %v4938_v62 = vmul.f32 %v7712_v20, %v9891_v43 }
 0x256   : > { %v4974_v40 = vadd.f32 %v9896_v46, %v4935_v26  ;;  %v4936_v16 = vmul.f32 %v7713_v56, %v9891_v43  ;;  %7638 = vmatprep.mubr.msk.bf16.mxu1 %vm5047_vm9, %v5032_v13 }
 0x257   : > { %v4977_v0 = vadd.f32 %v9896_v46, %v4938_v62  ;;  %7639 = vmatmul.mubr.msk.bf16.gmra.mrb[36].mxu1 %vm5047_vm9, %v5033_v50  ;;  %v5008_v47 = vmax.f32 %v4976_v63, 0.0 }
 0x258   : > { %v4975_v48 = vadd.f32 %v9896_v46, %v4936_v16  ;;  %v7614_v30 = vpop.f32.mrb[12].mxu0  ;;  %v5006_v51 = vmax.f32 %v4974_v40, 0.0 }
 0x259   : > { %v5009_v21 = vmax.f32 %v4977_v0, 0.0  ;;  %v7714_v60 = vadd.f32 %v7614_v30, %v9819_v55  ;;  %v4809_v45 = vpop.f32.mrb[13].mxu0 }
 0x25a   : > { %v5007_v17 = vmax.f32 %v4975_v48, 0.0  ;;  %v7715_v49 = vadd.f32 %v4809_v45, %v9821_v57  ;;  %v7615_v54 = vpop.f32.mrb[14].mxu0 }
 0x25b   : > { %v5035_v32 = vpack.c.bf16 %v5009_v21, %v5008_v47  ;;  %v4941_v2 = vmul.f32 %v7714_v60, %v9891_v43  ;;  %v7716_v36 = vadd.f32 %v7615_v54, %v9823_v15  ;;  %v4812_v59 = vpop.f32.mrb[15].mxu0 }
 0x25c   : > { %v5034_v28 = vpack.c.bf16 %v5007_v17, %v5006_v51  ;;  %v4939_v7 = vmul.f32 %v7715_v49, %v9891_v43  ;;  %v7717_v1 = vadd.f32 %v4812_v59, %v9825_v12 }
 0x25d   : > { %v4980_v38 = vadd.f32 %v9896_v46, %v4941_v2  ;;  %v4942_v55 = vmul.f32 %v7716_v36, %v9891_v43 }
 0x25e   : > { %v4978_v25 = vadd.f32 %v9896_v46, %v4939_v7  ;;  %v4940_v57 = vmul.f32 %v7717_v1, %v9891_v43  ;;  %7642 = vmatprep.mubr.msk.bf16.mxu1 %vm5047_vm9, %v5034_v28 }
 0x25f   : > { %v4981_v34 = vadd.f32 %v9896_v46, %v4942_v55  ;;  %7643 = vmatmul.mubr.msk.bf16.gmra.mrb[40].mxu1 %vm5047_vm9, %v5035_v32  ;;  %v5012_v39 = vmax.f32 %v4980_v38, 0.0 }
 0x260   : > { %v4979_v15 = vadd.f32 %v9896_v46, %v4940_v57  ;;  %v7618_v11 = vpop.f32.mrb[16].mxu0  ;;  %v5010_v14 = vmax.f32 %v4978_v25, 0.0 }
 0x261   : > { %v5013_v41 = vmax.f32 %v4981_v34, 0.0  ;;  %v7718_v12 = vadd.f32 %v7618_v11, %v9834_v42  ;;  %v4825_v31 = vpop.f32.mrb[17].mxu0 }
 0x262   : > { %v5011_v3 = vmax.f32 %v4979_v15, 0.0  ;;  %v7719_v6 = vadd.f32 %v4825_v31, %v9836_v53  ;;  %v7619_v8 = vpop.f32.mrb[18].mxu0 }
 0x263   : > { %v5037_v50 = vpack.c.bf16 %v5013_v41, %v5012_v39  ;;  %v4945_v37 = vmul.f32 %v7718_v12, %v9891_v43  ;;  %v7720_v20 = vadd.f32 %v7619_v8, %v9838_v22  ;;  %v4828_v18 = vpop.f32.mrb[19].mxu0 }
 0x264   : > { %v5036_v13 = vpack.c.bf16 %v5011_v3, %v5010_v14  ;;  %v4943_v26 = vmul.f32 %v7719_v6, %v9891_v43  ;;  %v7721_v56 = vadd.f32 %v4828_v18, %v9840_v10 }
 0x265   : > { %v4984_v63 = vadd.f32 %v9896_v46, %v4945_v37  ;;  %v4946_v42 = vmul.f32 %v7720_v20, %v9891_v43 }
 0x266   : > { %v4982_v62 = vadd.f32 %v9896_v46, %v4943_v26  ;;  %v4944_v53 = vmul.f32 %v7721_v56, %v9891_v43  ;;  %7646 = vmatprep.mubr.msk.bf16.mxu1 %vm5047_vm9, %v5036_v13 }
 0x267   : > { %v4985_v40 = vadd.f32 %v9896_v46, %v4946_v42  ;;  %7647 = vmatmul.mubr.msk.bf16.gmra.mrb[44].mxu1 %vm5047_vm9, %v5037_v50  ;;  %v5016_v0 = vmax.f32 %v4984_v63, 0.0 }
 0x268   : > { %v4983_v22 = vadd.f32 %v9896_v46, %v4944_v53  ;;  %v7622_v16 = vpop.f32.mrb[20].mxu0  ;;  %v5014_v47 = vmax.f32 %v4982_v62, 0.0 }
 0x269   : > { %v5017_v48 = vmax.f32 %v4985_v40, 0.0  ;;  %v7722_v10 = vadd.f32 %v7622_v16, %v9842_v35  ;;  %v4841_v30 = vpop.f32.mrb[21].mxu0 }
 0x26a   : > { %v5015_v21 = vmax.f32 %v4983_v22, 0.0  ;;  %v7723_v60 = vadd.f32 %v4841_v30, %v9844_v27  ;;  %v7623_v45 = vpop.f32.mrb[22].mxu0 }
 0x26b   : > { %v5039_v51 = vpack.c.bf16 %v5017_v48, %v5016_v0  ;;  %v4949_v17 = vmul.f32 %v7722_v10, %v9891_v43  ;;  %v7724_v49 = vadd.f32 %v7623_v45, %v9846_v9  ;;  %v4844_v54 = vpop.f32.mrb[23].mxu0 }
 0x26c   : > { %v5038_v32 = vpack.c.bf16 %v5015_v21, %v5014_v47  ;;  %v4947_v2 = vmul.f32 %v7723_v60, %v9891_v43  ;;  %v7725_v36 = vadd.f32 %v4844_v54, %v9848_v24  ;;  %v11209_v54 = vld [vmem:[#allocation4_spill] sm:$0xff] }
 0x26d   : > { %v4988_v59 = vadd.f32 %v9896_v46, %v4949_v17  ;;  %v4950_v35 = vmul.f32 %v7724_v49, %v9891_v43 }
 0x26e   : > { %v4986_v28 = vadd.f32 %v9896_v46, %v4947_v2  ;;  %v4948_v27 = vmul.f32 %v7725_v36, %v9891_v43  ;;  %7650 = vmatprep.mubr.msk.bf16.mxu1 %vm5047_vm9, %v5038_v32  ;;  %v11211_v32 = vld [vmem:[#allocation6_spill] sm:$0xff]  ;;  %v11213_v2 = vld [vmem:[#allocation8_spill] sm:$0xff]  ;;  %v11214_v36 = vld [vmem:[#allocation9_spill] sm:$0xff] }
 0x26f   : > { %v4989_v7 = vadd.f32 %v9896_v46, %v4950_v35  ;;  %7651 = vmatmul.mubr.msk.bf16.gmra.mrb[48].mxu1 %vm5047_vm9, %v5039_v51  ;;  %v5020_v38 = vmax.f32 %v4988_v59, 0.0  ;;  %v11215_v59 = vld [vmem:[#allocation10_spill] sm:$0xff]  ;;  %v11216_v35 = vld [vmem:[#allocation11_spill] sm:$0xff] }
 0x270   : > { %v4987_v9 = vadd.f32 %v9896_v46, %v4948_v27  ;;  %v7626_v1 = vpop.f32.mrb[24].mxu0  ;;  %v5018_v57 = vmax.f32 %v4986_v28, 0.0  ;;  %v11217_v28 = vld [vmem:[#allocation12_spill] sm:$0xff]  ;;  %v11218_v27 = vld [vmem:[#allocation13_spill] sm:$0xff] }
 0x271   : > { %v5021_v55 = vmax.f32 %v4989_v7, 0.0  ;;  %v7726_v24 = vadd.f32 %v7626_v1, %v9850_v23  ;;  %v4857_v25 = vpop.f32.mrb[25].mxu0  ;;  %v11219_v7 = vld [vmem:[#allocation14_spill] sm:$0xff] }
 0x272   : > { %v5019_v34 = vmax.f32 %v4987_v9, 0.0  ;;  %v7727_v15 = vadd.f32 %v4857_v25, %v9852_v5  ;;  %v7627_v11 = vpop.f32.mrb[26].mxu0  ;;  %v11220_v9 = vld [vmem:[#allocation16_spill] sm:$0xff]  ;;  %v11221_v1 = vld [vmem:[#allocation18_spill] sm:$0xff] }
 0x273   : > { %v5041_v39 = vpack.c.bf16 %v5021_v55, %v5020_v38  ;;  %v4953_v41 = vmul.f32 %v7726_v24, %v9891_v43  ;;  %v7728_v12 = vadd.f32 %v7627_v11, %v9854_v44  ;;  %v4860_v31 = vpop.f32.mrb[27].mxu0  ;;  %v11222_v38 = vld [vmem:[#allocation19_spill] sm:$0xff]  ;;  %v11223_v55 = vld [vmem:[#allocation21_spill] sm:$0xff]  ;;  %v11224_v24 = vld [vmem:[#allocation22_spill] sm:$0xff] }
 0x274   : > { %v5040_v14 = vpack.c.bf16 %v5019_v34, %v5018_v57  ;;  %v4951_v3 = vmul.f32 %v7727_v15, %v9891_v43  ;;  %v7729_v6 = vadd.f32 %v4860_v31, %v9856_v58 }
 0x275   : > { %v4992_v8 = vadd.f32 %v9896_v46, %v4953_v41  ;;  %v4954_v23 = vmul.f32 %v7728_v12, %v9891_v43 }
 0x276   : > { %v4990_v50 = vadd.f32 %v9896_v46, %v4951_v3  ;;  %v4952_v5 = vmul.f32 %v7729_v6, %v9891_v43  ;;  %7654 = vmatprep.mubr.msk.bf16.mxu1 %vm5047_vm9, %v5040_v14 }
 0x277   : > { %v4993_v37 = vadd.f32 %v9896_v46, %v4954_v23  ;;  %7655 = vmatmul.mubr.msk.bf16.gmra.mrb[52].mxu1 %vm5047_vm9, %v5041_v39  ;;  %v5024_v18 = vmax.f32 %v4992_v8, 0.0 }
 0x278   : > { %v4991_v44 = vadd.f32 %v9896_v46, %v4952_v5  ;;  %v7630_v20 = vpop.f32.mrb[28].mxu0  ;;  %v5022_v56 = vmax.f32 %v4990_v50, 0.0 }
 0x279   : > { %v5025_v13 = vmax.f32 %v4993_v37, 0.0  ;;  %v7730_v58 = vadd.f32 %v7630_v20, %v9858_v19  ;;  %v4873_v26 = vpop.f32.mrb[29].mxu0 }
 0x27a   : > { %v5023_v63 = vmax.f32 %v4991_v44, 0.0  ;;  %v7731_v42 = vadd.f32 %v4873_v26, %v9860_v33  ;;  %v7631_v62 = vpop.f32.mrb[30].mxu0 }
 0x27b   : > { %v5043_v53 = vpack.c.bf16 %v5025_v13, %v5024_v18  ;;  %v4957_v40 = vmul.f32 %v7730_v58, %v9891_v43  ;;  %v7732_v22 = vadd.f32 %v7631_v62, %v9862_v52  ;;  %v4876_v16 = vpop.f32.mrb[31].mxu0 }
 0x27c   : > { %v5042_v0 = vpack.c.bf16 %v5023_v63, %v5022_v56  ;;  %v4955_v48 = vmul.f32 %v7731_v42, %v9891_v43  ;;  %v7733_v10 = vadd.f32 %v4876_v16, %v9864_v61 }
 0x27d   : > { %v4996_v30 = vadd.f32 %v9896_v46, %v4957_v40  ;;  %v4958_v19 = vmul.f32 %v7732_v22, %v9891_v43 }
 0x27e   : > { %v4994_v47 = vadd.f32 %v9896_v46, %v4955_v48  ;;  %v4956_v33 = vmul.f32 %v7733_v10, %v9891_v43  ;;  %7658 = vmatprep.mubr.msk.bf16.mxu1 %vm5047_vm9, %v5042_v0  ;;  %v11210_v43 = vld [vmem:[#allocation5_spill] sm:$0xff]  ;;  %v10106_v48 = vld [vmem:[%s11075_s8] ss:$0 sm:$0xff] }
 0x27f   : > { %v4997_v21 = vadd.f32 %v9896_v46, %v4958_v19  ;;  %7659 = vmatmul.mubr.msk.bf16.gmra.mrb[56].mxu1 %vm5047_vm9, %v5043_v53  ;;  %v5028_v60 = vmax.f32 %v4996_v30, 0.0 }
 0x280   : > { %v4995_v52 = vadd.f32 %v9896_v46, %v4956_v33  ;;  %v5026_v51 = vmax.f32 %v4994_v47, 0.0  ;;  %v11212_v46 = vld [vmem:[#allocation7_spill] sm:$0xff]  ;;  %v10115_v47 = vld [vmem:[%s11076_s9] ss:$0 sm:$0xff] }
 0x281   : > { %v5029_v45 = vmax.f32 %v4997_v21, 0.0 }
 0x282   : > { %v5027_v61 = vmax.f32 %v4995_v52, 0.0 }
 0x283   : > { %v5045_v17 = vpack.c.bf16 %v5029_v45, %v5028_v60 }
 0x284   : > { %v5044_v49 = vpack.c.bf16 %v5027_v61, %v5026_v51 }
 0x286   : > { %7662 = vmatprep.mubr.msk.bf16.mxu1 %vm5047_vm9, %v5044_v49 }
 0x287   : > { %7663 = vmatmul.mubr.msk.bf16.gmra.mrb[60].mxu1 %vm5047_vm9, %v5045_v17 }
 0x288   : > { %7668 = vmatprep.mubr.msk.bf16.mxu1 %vm847_vm1, %v11209_v54 }
 0x28f   : > { %7669 = vmatmul.mubr.msk.bf16.vlgmr.msra.gmra.mrb[64].mxu1 %vm847_vm1, %v11210_v43 }
 0x290   : > { %7672 = vmatprep.mubr.msk.bf16.mxu1 %vm847_vm1, %v11211_v32 }
 0x297   : > { %7673 = vmatmul.mubr.msk.bf16.gmra.mrb[68].mxu1 %vm847_vm1, %v11212_v46 }
 0x298   : > { %7676 = vmatprep.mubr.msk.bf16.mxu1 %vm847_vm1, %v11213_v2 }
 0x29f   : > { %7677 = vmatmul.mubr.msk.bf16.gmra.mrb[72].mxu1 %vm847_vm1, %v11214_v36 }
 0x2a0   : > { %7680 = vmatprep.mubr.msk.bf16.mxu1 %vm847_vm1, %v11215_v59 }
 0x2a7   : > { %7681 = vmatmul.mubr.msk.bf16.gmra.mrb[76].mxu1 %vm847_vm1, %v11216_v35 }
 0x2a8   : > { %7684 = vmatprep.mubr.msk.bf16.mxu1 %vm847_vm1, %v11217_v28 }
 0x2af   : > { %7685 = vmatmul.mubr.msk.bf16.gmra.mrb[80].mxu1 %vm847_vm1, %v11218_v27 }
 0x2b0   : > { %7688 = vmatprep.mubr.msk.bf16.mxu1 %vm847_vm1, %v11219_v7 }
 0x2b7   : > { %7689 = vmatmul.mubr.msk.bf16.gmra.mrb[84].mxu1 %vm847_vm1, %v11220_v9 }
 0x2b8   : > { %7692 = vmatprep.mubr.msk.bf16.mxu1 %vm847_vm1, %v11221_v1 }
 0x2bf   : > { %7693 = vmatmul.mubr.msk.bf16.gmra.mrb[88].mxu1 %vm847_vm1, %v11222_v38 }
 0x2c0   : > { %7696 = vmatprep.mubr.msk.bf16.mxu1 %vm847_vm1, %v11223_v55 }
 0x2c7   : > { %7697 = vmatmul.mubr.msk.bf16.gmra.mrb[92].mxu1 %vm847_vm1, %v11224_v24 }
 0x322   : > { %v10039_v25 = vpop.f32.mrb[32].mxu1 }
 0x323   : > { %v10041_v57 = vpop.f32.mrb[33].mxu1  ;;  %v5513_v10 = vmul.f32 %v10039_v25, %v9869_v4 }
 0x324   : > { %v10043_v34 = vpop.f32.mrb[34].mxu1  ;;  %v5511_v30 = vmul.f32 %v9869_v4, %v10041_v57 }
 0x325   : > { %v10045_v15 = vpop.f32.mrb[35].mxu1  ;;  %v5514_v33 = vmul.f32 %v10043_v34, %v9869_v4  ;;  %v5552_v61 = vadd.f32 %v9876_v29, %v5513_v10 }
 0x326   : > { %v5512_v60 = vmul.f32 %v9869_v4, %v10045_v15  ;;  %v5550_v43 = vadd.f32 %v9876_v29, %v5511_v30 }
 0x327   : > { %v5553_v2 = vadd.f32 %v9876_v29, %v5514_v33 }
 0x328   : > { %v5551_v35 = vadd.f32 %v9876_v29, %v5512_v60 }
 0x32a   : > { %v10047_v11 = vpop.f32.mrb[36].mxu1 }
 0x32b   : > { %v10049_v39 = vpop.f32.mrb[37].mxu1  ;;  %v5517_v7 = vmul.f32 %v10047_v11, %v9869_v4 }
 0x32c   : > { %v10051_v41 = vpop.f32.mrb[38].mxu1  ;;  %v5515_v1 = vmul.f32 %v9869_v4, %v10049_v39 }
 0x32d   : > { %v10053_v12 = vpop.f32.mrb[39].mxu1  ;;  %v5518_v24 = vmul.f32 %v10051_v41, %v9869_v4 }
 0x332   : > { %v10055_v31 = vpop.f32.mrb[40].mxu1 }
 0x333   : > { %v10057_v14 = vpop.f32.mrb[41].mxu1 }
 0x334   : > { %v10059_v3 = vpop.f32.mrb[42].mxu1 }
 0x335   : > { %v10061_v6 = vpop.f32.mrb[43].mxu1 }
 0x33a   : > { %v10063_v8 = vpop.f32.mrb[44].mxu1 }
 0x33b   : > { %v10065_v23 = vpop.f32.mrb[45].mxu1 }
 0x33c   : > { %v10067_v50 = vpop.f32.mrb[46].mxu1 }
 0x33d   : > { %v10069_v5 = vpop.f32.mrb[47].mxu1 }
 0x33e   : > { %11225 = vst [vmem:[#allocation15_spill] sm:$0xff] %v10069_v5 }
 0x342   : > { %v10071_v37 = vpop.f32.mrb[48].mxu1 }
 0x343   : > { %11226 = vst [vmem:[#allocation20_spill] sm:$0xff] %v10071_v37  ;;  %v10073_v44 = vpop.f32.mrb[49].mxu1 }
 0x344   : > { %11227 = vst [vmem:[#allocation17_spill] sm:$0xff] %v10073_v44  ;;  %v10075_v20 = vpop.f32.mrb[50].mxu1 }
 0x345   : > { %11228 = vst [vmem:[#allocation2_spill] sm:$0xff] %v10075_v20  ;;  %v10077_v18 = vpop.f32.mrb[51].mxu1 }
 0x346   : > { %11229 = vst [vmem:[#allocation23_spill] sm:$0xff] %v10077_v18 }
 0x34a   : > { %v10079_v13 = vpop.f32.mrb[52].mxu1 }
 0x34b   : > { %11230 = vst [vmem:[#allocation3_spill] sm:$0xff] %v10079_v13  ;;  %v10081_v58 = vpop.f32.mrb[53].mxu1 }
 0x34c   : > { %11231 = vst [vmem:[#allocation24_spill] sm:$0xff] %v10081_v58  ;;  %v10083_v26 = vpop.f32.mrb[54].mxu1 }
 0x34d   : > { %11232 = vst [vmem:[#allocation26_spill] sm:$0xff] %v10083_v26  ;;  %v10085_v56 = vpop.f32.mrb[55].mxu1 }
 0x34e   : > { %11233 = vst [vmem:[#allocation25_spill] sm:$0xff] %v10085_v56 }
 0x352   : > { %v10087_v63 = vpop.f32.mrb[56].mxu1 }
 0x353   : > { %11234 = vst [vmem:[#allocation28_spill] sm:$0xff] %v10087_v63  ;;  %v10089_v42 = vpop.f32.mrb[57].mxu1 }
 0x354   : > { %11235 = vst [vmem:[#allocation27_spill] sm:$0xff] %v10089_v42  ;;  %v10091_v62 = vpop.f32.mrb[58].mxu1 }
 0x355   : > { %11236 = vst [vmem:[#allocation29_spill] sm:$0xff] %v10091_v62  ;;  %v10093_v53 = vpop.f32.mrb[59].mxu1 }
 0x356   : > { %11237 = vst [vmem:[#allocation4_spill] sm:$0xff] %v10093_v53 }
 0x35a   : > { %v10095_v40 = vpop.f32.mrb[60].mxu1 }
 0x35b   : > { %11238 = vst [vmem:[#allocation5_spill] sm:$0xff] %v10095_v40  ;;  %v10097_v22 = vpop.f32.mrb[61].mxu1 }
 0x35c   : > { %11239 = vst [vmem:[#allocation6_spill] sm:$0xff] %v10097_v22  ;;  %v10099_v16 = vpop.f32.mrb[62].mxu1 }
 0x35d   : > { %11240 = vst [vmem:[#allocation7_spill] sm:$0xff] %v10099_v16  ;;  %v10101_v0 = vpop.f32.mrb[63].mxu1 }
 0x35e   : > { %11241 = vst [vmem:[#allocation8_spill] sm:$0xff] %v10101_v0 }
 0x362   : > { %v7670_v19 = vpop.f32.mrb[64].mxu1 }
 0x363   : > { %v5435_v21 = vmul.f32 %v7670_v19, %v10106_v48  ;;  %v5299_v52 = vpop.f32.mrb[65].mxu1  ;;  %v5516_v19 = vmul.f32 %v9869_v4, %v10053_v12 }
 0x364   : > { %v5433_v45 = vmul.f32 %v10106_v48, %v5299_v52  ;;  %v7671_v51 = vpop.f32.mrb[66].mxu1  ;;  %v5556_v52 = vadd.f32 %v9876_v29, %v5517_v7 }
 0x365   : > { %v5474_v17 = vadd.f32 %v10115_v47, %v5435_v21  ;;  %v5436_v49 = vmul.f32 %v7671_v51, %v10106_v48  ;;  %v5302_v54 = vpop.f32.mrb[67].mxu1 }
 0x366   : > { %v5472_v32 = vadd.f32 %v10115_v47, %v5433_v45  ;;  %v5434_v46 = vmul.f32 %v10106_v48, %v5302_v54 }
 0x367   : > { %v5475_v36 = vadd.f32 %v10115_v47, %v5436_v49  ;;  %5752 = vrot.lane.b32.xlu0 %v5474_v17, %s8092_s27  ;;  %v10132_v59 = vadd.f32 %v5552_v61, %v5474_v17  ;;  %v5554_v61 = vadd.f32 %v9876_v29, %v5515_v1 }
 0x368   : > { %v10136_v28 = vadd.f32 %v10115_v47, %v5434_v46  ;;  %5748 = vrot.lane.b32.xlu1 %v5472_v32, %s8092_s27  ;;  %v10139_v27 = vadd.f32 %v5550_v43, %v5472_v32  ;;  %v5557_v43 = vadd.f32 %v9876_v29, %v5518_v24 }
 0x369   : > { %v10143_v9 = vadd.f32 %v5553_v2, %v5475_v36 }
 0x36a   : > { %v7674_v38 = vpop.f32.mrb[68].mxu1  ;;  %v10148_v55 = vadd.f32 %v5551_v35, %v10136_v28  ;;  %v5555_v35 = vadd.f32 %v9876_v29, %v5516_v19  ;;  %v5522_v19 = vmul.f32 %v10059_v3, %v9869_v4 }
 0x36b   : > { %v5439_v10 = vmul.f32 %v7674_v38, %v10106_v48  ;;  %5982 = vrot.lane.b32.xlu0 %v5474_v17, %s8093_s30  ;;  %v5315_v30 = vpop.f32.mrb[69].mxu1  ;;  %v5521_v38 = vmul.f32 %v10055_v31, %v9869_v4 }
 0x36c   : > { %v5437_v33 = vmul.f32 %v10106_v48, %v5315_v30  ;;  %5754 = vrot.lane.b32.xlu1 %v5475_v36, %s8092_s27  ;;  %v7675_v21 = vpop.f32.mrb[70].mxu1 }
 0x36d   : > { %v10160_v60 = vadd.f32 %v10115_v47, %v5439_v10  ;;  %v5440_v45 = vmul.f32 %v7675_v21, %v10106_v48  ;;  %v5318_v51 = vpop.f32.mrb[71].mxu1 }
 0x36e   : > { %v10165_v49 = vadd.f32 %v10115_v47, %v5437_v33  ;;  %v5438_v54 = vmul.f32 %v10106_v48, %v5318_v51 }
 0x36f   : > { %v10170_v46 = vadd.f32 %v10115_v47, %v5440_v45  ;;  %6212 = vrot.lane.b32.xlu0 %v5474_v17, %s8094_s11  ;;  %v10174_v2 = vadd.f32 %v5556_v52, %v10160_v60  ;;  %v5519_v17 = vmul.f32 %v9869_v4, %v10057_v14  ;;  %v5520_v52 = vmul.f32 %v9869_v4, %v10061_v6 }
 0x370   : > { %v10178_v7 = vadd.f32 %v10115_v47, %v5438_v54  ;;  %5984 = vrot.lane.b32.xlu1 %v5475_v36, %s8093_s30  ;;  %v10182_v1 = vadd.f32 %v5554_v61, %v10165_v49  ;;  %v5560_v61 = vadd.f32 %v9876_v29, %v5521_v38 }
 0x371   : > { %v10187_v24 = vadd.f32 %v5557_v43, %v10170_v46 }
 0x372   : > { %v7678_v10 = vpop.f32.mrb[72].mxu1  ;;  %v10192_v30 = vadd.f32 %v5555_v35, %v10178_v7 }
 0x373   : > { %v5443_v33 = vmul.f32 %v7678_v10, %v10106_v48  ;;  %5978 = vrot.lane.b32.xlu0 %v5472_v32, %s8093_s30  ;;  %v5331_v21 = vpop.f32.mrb[73].mxu1  ;;  %v5558_v10 = vadd.f32 %v9876_v29, %v5519_v17 }
 0x374   : > { %v5441_v45 = vmul.f32 %v10106_v48, %v5331_v21  ;;  %6214 = vrot.lane.b32.xlu1 %v5475_v36, %s8094_s11  ;;  %v7679_v51 = vpop.f32.mrb[74].mxu1  ;;  %v5561_v21 = vadd.f32 %v9876_v29, %v5522_v19  ;;  %v5525_v19 = vmul.f32 %v10063_v8, %v9869_v4 }
 0x375   : > { %v10204_v54 = vadd.f32 %v10115_v47, %v5443_v33  ;;  %v5444_v43 = vmul.f32 %v7679_v51, %v10106_v48  ;;  %v5334_v35 = vpop.f32.mrb[75].mxu1  ;;  %v5559_v33 = vadd.f32 %v9876_v29, %v5520_v52 }
 0x376   : > { %v10209_v16 = vadd.f32 %v10115_v47, %v5441_v45  ;;  %v5442_v0 = vmul.f32 %v10106_v48, %v5334_v35  ;;  %v5564_v40 = vadd.f32 %v9876_v29, %v5525_v19 }
 0x377   : > { %v10214_v36 = vadd.f32 %v10115_v47, %v5444_v43  ;;  %6208 = vrot.lane.b32.xlu0 %v5472_v32, %s8094_s11  ;;  %v10218_v38 = vadd.f32 %v5560_v61, %v10204_v54  ;;  %v5523_v32 = vmul.f32 %v9869_v4, %v10065_v23 }
 0x378   : > { %v10222_v51 = vadd.f32 %v10115_v47, %v5442_v0  ;;  %5750 = vrot.lane.b32.xlu1 %v10136_v28, %s8092_s27  ;;  %v10227_v17 = vadd.f32 %v5558_v10, %v10209_v16  ;;  %v5526_v0 = vmul.f32 %v10067_v50, %v9869_v4 }
 0x379   : > { %v10232_v45 = vadd.f32 %v5561_v21, %v10214_v36 }
 0x37a   : > { %v7682_v61 = vpop.f32.mrb[76].mxu1  ;;  %v10237_v52 = vadd.f32 %v5559_v33, %v10222_v51 }
 0x37b   : > { %v5447_v43 = vmul.f32 %v7682_v61, %v10106_v48  ;;  %5760 = vrot.lane.b32.xlu0 %v10160_v60, %s8092_s27  ;;  %v5347_v35 = vpop.f32.mrb[77].mxu1  ;;  %v5562_v61 = vadd.f32 %v9876_v29, %v5523_v32 }
 0x37c   : > { %v5445_v10 = vmul.f32 %v10106_v48, %v5347_v35  ;;  %5980 = vrot.lane.b32.xlu1 %v10136_v28, %s8093_s30  ;;  %v7683_v21 = vpop.f32.mrb[78].mxu1  ;;  %v5565_v35 = vadd.f32 %v9876_v29, %v5526_v0 }
 0x37d   : > { %v10249_v33 = vadd.f32 %v10115_v47, %v5447_v43  ;;  %v5448_v22 = vmul.f32 %v7683_v21, %v10106_v48  ;;  %v5350_v4 = vpop.f32.mrb[79].mxu1 }
 0x37e   : > { %v10254_v53 = vadd.f32 %v10115_v47, %v5445_v10  ;;  %v5446_v42 = vmul.f32 %v10106_v48, %v5350_v4 }
 0x37f   : > { %v10259_v62 = vadd.f32 %v10115_v47, %v5448_v22  ;;  %5990 = vrot.lane.b32.xlu0 %v10160_v60, %s8093_s30  ;;  %v10264_v19 = vadd.f32 %v5564_v40, %v10249_v33 }
 0x380   : > { %v10267_v43 = vadd.f32 %v10115_v47, %v5446_v42  ;;  %6210 = vrot.lane.b32.xlu1 %v10136_v28, %s8094_s11  ;;  %v10272_v32 = vadd.f32 %v5562_v61, %v10254_v53 }
 0x381   : > { %v10275_v29 = vadd.f32 %v5565_v35, %v10259_v62 }
 0x382   : > { %11242 = vst [vmem:[#allocation9_spill] sm:$0xff] %v10267_v43  ;;  %v7686_v22 = vpop.f32.mrb[80].mxu1 }
 0x383   : > { %v5451_v0 = vmul.f32 %v7686_v22, %v10106_v48  ;;  %6220 = vrot.lane.b32.xlu0 %v10160_v60, %s8094_s11  ;;  %v5363_v40 = vpop.f32.mrb[81].mxu1 }
 0x384   : > { %v5449_v10 = vmul.f32 %v10106_v48, %v5363_v40  ;;  %5762 = vrot.lane.b32.xlu1 %v10170_v46, %s8092_s27  ;;  %v7687_v42 = vpop.f32.mrb[82].mxu1 }
 0x385   : > { %v10284_v28 = vadd.f32 %v10115_v47, %v5451_v0  ;;  %v5452_v21 = vmul.f32 %v7687_v42, %v10106_v48  ;;  %v5366_v4 = vpop.f32.mrb[83].mxu1 }
 0x386   : > { %v10288_v61 = vadd.f32 %v10115_v47, %v5449_v10  ;;  %v5450_v35 = vmul.f32 %v10106_v48, %v5366_v4 }
 0x387   : > { %11243 = vst [vmem:[#allocation10_spill] sm:$0xff] %v10284_v28  ;;  %v10292_v60 = vadd.f32 %v10115_v47, %v5452_v21  ;;  %5756 = vrot.lane.b32.xlu0 %v10165_v49, %s8092_s27 }
 0x388   : > { %11244 = vst [vmem:[#allocation11_spill] sm:$0xff] %v10288_v61  ;;  %v10297_v22 = vadd.f32 %v10115_v47, %v5450_v35  ;;  %5992 = vrot.lane.b32.xlu1 %v10170_v46, %s8093_s30 }
 0x389   : > { %11245 = vst [vmem:[#allocation12_spill] sm:$0xff] %v10292_v60 }
 0x38a   : > { %v7690_v0 = vpop.f32.mrb[84].mxu1 }
 0x38b   : > { %v5455_v40 = vmul.f32 %v7690_v0, %v10106_v48  ;;  %5986 = vrot.lane.b32.xlu0 %v10165_v49, %s8093_s30  ;;  %v5379_v10 = vpop.f32.mrb[85].mxu1 }
 0x38c   : > { %v5453_v42 = vmul.f32 %v10106_v48, %v5379_v10  ;;  %6222 = vrot.lane.b32.xlu1 %v10170_v46, %s8094_s11  ;;  %v7691_v21 = vpop.f32.mrb[86].mxu1 }
 0x38d   : > { %v10308_v4 = vadd.f32 %v10115_v47, %v5455_v40  ;;  %v5456_v35 = vmul.f32 %v7691_v21, %v10106_v48  ;;  %v5382_v63 = vpop.f32.mrb[87].mxu1 }
 0x38e   : > { %v10312_v56 = vadd.f32 %v10115_v47, %v5453_v42  ;;  %v5454_v0 = vmul.f32 %v10106_v48, %v5382_v63 }
 0x38f   : > { %v10316_v58 = vadd.f32 %v10115_v47, %v5456_v35  ;;  %6216 = vrot.lane.b32.xlu0 %v10165_v49, %s8094_s11 }
 0x390   : > { %v10321_v46 = vadd.f32 %v10115_v47, %v5454_v0  ;;  %5758 = vrot.lane.b32.xlu1 %v10178_v7, %s8092_s27 }
 0x392   : > { %v7694_v40 = vpop.f32.mrb[88].mxu1 }
 0x393   : > { %v5459_v10 = vmul.f32 %v7694_v40, %v10106_v48  ;;  %5768 = vrot.lane.b32.xlu0 %v10204_v54, %s8092_s27  ;;  %v5395_v42 = vpop.f32.mrb[89].mxu1 }
 0x394   : > { %v5457_v63 = vmul.f32 %v10106_v48, %v5395_v42  ;;  %5988 = vrot.lane.b32.xlu1 %v10178_v7, %s8093_s30  ;;  %v7695_v21 = vpop.f32.mrb[90].mxu1 }
 0x395   : > { %v10332_v49 = vadd.f32 %v10115_v47, %v5459_v10  ;;  %v5460_v35 = vmul.f32 %v7695_v21, %v10106_v48  ;;  %v5398_v0 = vpop.f32.mrb[91].mxu1 }
 0x396   : > { %v10336_v26 = vadd.f32 %v10115_v47, %v5457_v63  ;;  %v5458_v40 = vmul.f32 %v10106_v48, %v5398_v0 }
 0x397   : > { %v10340_v13 = vadd.f32 %v10115_v47, %v5460_v35  ;;  %5998 = vrot.lane.b32.xlu0 %v10204_v54, %s8093_s30 }
 0x398   : > { %v10345_v42 = vadd.f32 %v10115_v47, %v5458_v40  ;;  %6218 = vrot.lane.b32.xlu1 %v10178_v7, %s8094_s11 }
 0x39a   : > { %v7698_v10 = vpop.f32.mrb[92].mxu1 }
 0x39b   : > { %v5463_v21 = vmul.f32 %v7698_v10, %v10106_v48  ;;  %6228 = vrot.lane.b32.xlu0 %v10204_v54, %s8094_s11  ;;  %v5411_v63 = vpop.f32.mrb[93].mxu1 }
 0x39c   : > { %v5461_v0 = vmul.f32 %v10106_v48, %v5411_v63  ;;  %5770 = vrot.lane.b32.xlu1 %v10214_v36, %s8092_s27  ;;  %v7699_v35 = vpop.f32.mrb[94].mxu1 }
 0x39d   : > { %v10356_v18 = vadd.f32 %v10115_v47, %v5463_v21  ;;  %v5464_v40 = vmul.f32 %v7699_v35, %v10106_v48  ;;  %v5414_v44 = vpop.f32.mrb[95].mxu1 }
 0x39e   : > { %v10360_v7 = vadd.f32 %v10115_v47, %v5461_v0  ;;  %v5462_v10 = vmul.f32 %v10106_v48, %v5414_v44  ;;  %v10405_v44 = vpop.permute.xlu0 %5646 }
 0x39f   : > { %v10364_v54 = vadd.f32 %v10115_v47, %v5464_v40  ;;  %5764 = vrot.lane.b32.xlu0 %v10209_v16, %s8092_s27  ;;  %v5651_v48 = vmul.f32 %v10039_v25, %v10405_v44  ;;  %v5652_v40 = vmul.f32 %v10043_v34, %v10405_v44 }
 0x3a0   : > { %v10369_v63 = vadd.f32 %v10115_v47, %v5462_v10  ;;  %6000 = vrot.lane.b32.xlu1 %v10214_v36, %s8093_s30 }
 0x3a3   : > { %5994 = vrot.lane.b32.xlu0 %v10209_v16, %s8093_s30 }
 0x3a4   : > { %6230 = vrot.lane.b32.xlu1 %v10214_v36, %s8094_s11  ;;  %v5649_v36 = vmul.f32 %v10405_v44, %v10041_v57 }
 0x3a7   : > { %6224 = vrot.lane.b32.xlu0 %v10209_v16, %s8094_s11  ;;  %v10425_v16 = vpop.permute.xlu1 %5943 }
 0x3a8   : > { %5766 = vrot.lane.b32.xlu1 %v10222_v51, %s8092_s27 }
 0x3ab   : > { %5776 = vrot.lane.b32.xlu0 %v10249_v33, %s8092_s27 }
 0x3ac   : > { %5996 = vrot.lane.b32.xlu1 %v10222_v51, %s8093_s30 }
 0x3af   : > { %6006 = vrot.lane.b32.xlu0 %v10249_v33, %s8093_s30 }
 0x3b0   : > { %6226 = vrot.lane.b32.xlu1 %v10222_v51, %s8094_s11  ;;  %v10439_v51 = vpop.permute.xlu1 %6173 }
 0x3b3   : > { %6236 = vrot.lane.b32.xlu0 %v10249_v33, %s8094_s11 }
 0x3b4   : > { %5778 = vrot.lane.b32.xlu1 %v10259_v62, %s8092_s27 }
 0x3b7   : > { %5772 = vrot.lane.b32.xlu0 %v10254_v53, %s8092_s27 }
 0x3b8   : > { %6008 = vrot.lane.b32.xlu1 %v10259_v62, %s8093_s30 }
 0x3bb   : > { %6002 = vrot.lane.b32.xlu0 %v10254_v53, %s8093_s30 }
 0x3bc   : > { %6238 = vrot.lane.b32.xlu1 %v10259_v62, %s8094_s11  ;;  %v10415_v62 = vpop.permute.xlu0 %5681 }
 0x3bd   : > { %v5686_v33 = vadd.f32 %v10415_v62, %v5651_v48  ;;  %v5684_v35 = vadd.f32 %v10415_v62, %v5649_v36 }
 0x3bf   : > { %6232 = vrot.lane.b32.xlu0 %v10254_v53, %s8094_s11 }
 0x3c0   : > { %5774 = vrot.lane.b32.xlu1 %v10267_v43, %s8092_s27  ;;  %v10421_v53 = vpop.permute.xlu0 %5908 }
 0x3c1   : > { %v5913_v21 = vmul.f32 %v10039_v25, %v10421_v53 }
 0x3c3   : > { %5784 = vrot.lane.b32.xlu0 %v10284_v28, %s8092_s27  ;;  %v5948_v48 = vadd.f32 %v10425_v16, %v5913_v21 }
 0x3c4   : > { %6004 = vrot.lane.b32.xlu1 %v10267_v43, %s8093_s30  ;;  %v10435_v47 = vpop.permute.xlu0 %6138 }
 0x3c5   : > { %v6143_v36 = vmul.f32 %v10039_v25, %v10435_v47 }
 0x3c7   : > { %6014 = vrot.lane.b32.xlu0 %v10284_v28, %s8093_s30 }
 0x3c8   : > { %6234 = vrot.lane.b32.xlu1 %v10267_v43, %s8094_s11  ;;  %v5614_v43 = vmax.f32 %v10139_v27, 0.0  ;;  %v5911_v27 = vmul.f32 %v10421_v53, %v10041_v57 }
 0x3cb   : > { %6244 = vrot.lane.b32.xlu0 %v10284_v28, %s8094_s11 }
 0x3cc   : > { %5786 = vrot.lane.b32.xlu1 %v10292_v60, %s8092_s27 }
 0x3cf   : > { %5780 = vrot.lane.b32.xlu0 %v10288_v61, %s8092_s27 }
 0x3d0   : > { %6016 = vrot.lane.b32.xlu1 %v10292_v60, %s8093_s30 }
 0x3d3   : > { %6010 = vrot.lane.b32.xlu0 %v10288_v61, %s8093_s30 }
 0x3d4   : > { %6246 = vrot.lane.b32.xlu1 %v10292_v60, %s8094_s11 }
 0x3d7   : > { %6240 = vrot.lane.b32.xlu0 %v10288_v61, %s8094_s11  ;;  %v5616_v61 = vmax.f32 %v10132_v59, 0.0 }
 0x3d8   : > { %5782 = vrot.lane.b32.xlu1 %v10297_v22, %s8092_s27 }
 0x3d9   : > { %v5753_v0 = vpop.permute.xlu0 %5752 }
 0x3da   : > { %v5846_v10 = vadd.f32 %v5753_v0, %v5686_v33  ;;  %v5749_v60 = vpop.permute.xlu1 %5748  ;;  %v5914_v0 = vmul.f32 %v10043_v34, %v10421_v53 }
 0x3db   : > { %v5844_v20 = vadd.f32 %v5749_v60, %v5684_v35  ;;  %5792 = vrot.lane.b32.xlu0 %v10308_v4, %s8092_s27  ;;  %v5687_v60 = vadd.f32 %v10415_v62, %v5652_v40 }
 0x3dc   : > { %v5878_v28 = vmax.f32 %v5846_v10, 0.0  ;;  %6012 = vrot.lane.b32.xlu1 %v10297_v22, %s8093_s30 }
 0x3dd   : > { %v5876_v37 = vmax.f32 %v5844_v20, 0.0  ;;  %v5983_v33 = vpop.permute.xlu0 %5982  ;;  %v6178_v20 = vadd.f32 %v10439_v51, %v6143_v36 }
 0x3de   : > { %v6370_v59 = vsel %vm5047_vm9, %v5616_v61, %v5878_v28  ;;  %v6076_v35 = vadd.f32 %v5983_v33, %v5948_v48  ;;  %v5755_v10 = vpop.permute.xlu1 %5754  ;;  %v5617_v28 = vmax.f32 %v10143_v9, 0.0 }
 0x3df   : > { %v6368_v5 = vsel %vm5047_vm9, %v5614_v43, %v5876_v37  ;;  %v5847_v21 = vadd.f32 %v5755_v10, %v5687_v60  ;;  %6022 = vrot.lane.b32.xlu0 %v10308_v4, %s8093_s30  ;;  %v5949_v37 = vadd.f32 %v10425_v16, %v5914_v0  ;;  %v6144_v43 = vmul.f32 %v10043_v34, %v10435_v47 }
 0x3e0   : > { %v6108_v25 = vmax.f32 %v6076_v35, 0.0  ;;  %6242 = vrot.lane.b32.xlu1 %v10297_v22, %s8094_s11  ;;  %v5946_v34 = vadd.f32 %v10425_v16, %v5911_v27  ;;  %v6141_v0 = vmul.f32 %v10435_v47, %v10041_v57 }
 0x3e1   : > { %v5879_v61 = vmax.f32 %v5847_v21, 0.0  ;;  %v6213_v40 = vpop.permute.xlu0 %6212  ;;  %v6179_v21 = vadd.f32 %v10439_v51, %v6144_v43  ;;  %v5655_v43 = vmul.f32 %v10047_v11, %v10405_v44 }
 0x3e2   : > { %v6403_v48 = vsel %vm6400_vm10, %v6370_v59, %v6108_v25  ;;  %v6306_v33 = vadd.f32 %v6213_v40, %v6178_v20  ;;  %v5985_v60 = vpop.permute.xlu1 %5984  ;;  %v5650_v25 = vmul.f32 %v10405_v44, %v10045_v15  ;;  %v6176_v27 = vadd.f32 %v10439_v51, %v6141_v0 }
 0x3e3   : > { %v6371_v35 = vsel %vm5047_vm9, %v5617_v28, %v5879_v61  ;;  %v6077_v36 = vadd.f32 %v5985_v60, %v5949_v37  ;;  %6252 = vrot.lane.b32.xlu0 %v10308_v4, %s8094_s11 }
 0x3e4   : > { %v6338_v9 = vmax.f32 %v6306_v33, 0.0  ;;  %5794 = vrot.lane.b32.xlu1 %v10316_v58, %s8092_s27  ;;  %v5685_v60 = vadd.f32 %v10415_v62, %v5650_v25  ;;  %v5615_v25 = vmax.f32 %v10148_v55, 0.0  ;;  %v5620_v55 = vmax.f32 %v10174_v2, 0.0 }
 0x3e5   : > { %v6109_v59 = vmax.f32 %v6077_v36, 0.0  ;;  %v5979_v10 = vpop.permute.xlu0 %5978 }
 0x3e6   : > { %v6436_v20 = vsel %vm6433_vm11, %v6403_v48, %v6338_v9  ;;  %v6074_v28 = vadd.f32 %v5979_v10, %v5946_v34  ;;  %v6215_v61 = vpop.permute.xlu1 %6214 }
 0x3e7   : > { %6469 = vst.msk [vmem:[%s10484_s14 + $0x10] sm:$0xff] %vm6466_vm12, %v6436_v20  ;;  %v6404_v40 = vsel %vm6400_vm10, %v6371_v35, %v6109_v59  ;;  %v6307_v37 = vadd.f32 %v6215_v61, %v6179_v21  ;;  %5788 = vrot.lane.b32.xlu0 %v10312_v56, %s8092_s27  ;;  %v5912_v35 = vmul.f32 %v10421_v53, %v10045_v15 }
 0x3e8   : > { %v6106_v57 = vmax.f32 %v6074_v28, 0.0  ;;  %6024 = vrot.lane.b32.xlu1 %v10316_v58, %s8093_s30  ;;  %v5690_v21 = vadd.f32 %v10415_v62, %v5655_v43 }
 0x3e9   : > { %v6339_v48 = vmax.f32 %v6307_v37, 0.0  ;;  %v6209_v33 = vpop.permute.xlu0 %6208  ;;  %v5947_v61 = vadd.f32 %v10425_v16, %v5912_v35 }
 0x3ea   : > { %v6401_v36 = vsel %vm6400_vm10, %v6368_v5, %v6106_v57  ;;  %v6304_v9 = vadd.f32 %v6209_v33, %v6176_v27  ;;  %v5751_v34 = vpop.permute.xlu1 %5750  ;;  %v5917_v5 = vmul.f32 %v10047_v11, %v10421_v53 }
 0x3eb   : > { %v6437_v59 = vsel %vm6433_vm11, %v6404_v40, %v6339_v48  ;;  %v5845_v10 = vadd.f32 %v5751_v34, %v5685_v60  ;;  %6018 = vrot.lane.b32.xlu0 %v10312_v56, %s8093_s30  ;;  %v6142_v40 = vmul.f32 %v10435_v47, %v10045_v15  ;;  %v6147_v60 = vmul.f32 %v10047_v11, %v10435_v47 }
 0x3ec   : > { %6470 = vst.msk [vmem:[%s10484_s14 + $0x18] sm:$0xff] %vm6466_vm12, %v6437_v59  ;;  %v6336_v0 = vmax.f32 %v6304_v9, 0.0  ;;  %6254 = vrot.lane.b32.xlu1 %v10316_v58, %s8094_s11  ;;  %v5952_v15 = vadd.f32 %v10425_v16, %v5917_v5  ;;  %v5656_v34 = vmul.f32 %v10051_v41, %v10405_v44 }
 0x3ed   : > { %v5877_v20 = vmax.f32 %v5845_v10, 0.0  ;;  %v5761_v28 = vpop.permute.xlu0 %5760  ;;  %v6177_v9 = vadd.f32 %v10439_v51, %v6142_v40  ;;  %v6182_v11 = vadd.f32 %v10439_v51, %v6147_v60  ;;  %v5918_v40 = vmul.f32 %v10051_v41, %v10421_v53 }
 0x3ee   : > { %v6434_v37 = vsel %vm6433_vm11, %v6401_v36, %v6336_v0  ;;  %v5850_v57 = vadd.f32 %v5761_v28, %v5690_v21  ;;  %v5981_v27 = vpop.permute.xlu1 %5980  ;;  %v5621_v60 = vmax.f32 %v10187_v24, 0.0  ;;  %v5618_v24 = vmax.f32 %v10182_v1, 0.0 }
 0x3ef   : > { %6467 = vst.msk [vmem:[%s10484_s14] sm:$0xff] %vm6466_vm12, %v6434_v37  ;;  %v6369_v43 = vsel %vm5047_vm9, %v5615_v25, %v5877_v20  ;;  %v6075_v48 = vadd.f32 %v5981_v27, %v5947_v61  ;;  %6248 = vrot.lane.b32.xlu0 %v10312_v56, %s8094_s11  ;;  %v5653_v25 = vmul.f32 %v10405_v44, %v10049_v39 }
 0x3f0   : > { %v5882_v33 = vmax.f32 %v5850_v57, 0.0  ;;  %5790 = vrot.lane.b32.xlu1 %v10321_v46, %s8092_s27  ;;  %v5691_v61 = vadd.f32 %v10415_v62, %v5656_v34  ;;  %v6148_v34 = vmul.f32 %v10051_v41, %v10435_v47 }
 0x3f1   : > { %v6107_v35 = vmax.f32 %v6075_v48, 0.0  ;;  %v5991_v36 = vpop.permute.xlu0 %5990 }
 0x3f2   : > { %v6374_v59 = vsel %vm5047_vm9, %v5620_v55, %v5882_v33  ;;  %v6080_v10 = vadd.f32 %v5991_v36, %v5952_v15  ;;  %v6211_v2 = vpop.permute.xlu1 %6210  ;;  %v5688_v33 = vadd.f32 %v10415_v62, %v5653_v25  ;;  %v5915_v15 = vmul.f32 %v10421_v53, %v10049_v39 }
 0x3f3   : > { %v6402_v0 = vsel %vm6400_vm10, %v6369_v43, %v6107_v35  ;;  %v6305_v21 = vadd.f32 %v6211_v2, %v6177_v9  ;;  %5800 = vrot.lane.b32.xlu0 %v10332_v49, %s8092_s27  ;;  %v5953_v9 = vadd.f32 %v10425_v16, %v5918_v40 }
 0x3f4   : > { %v6112_v5 = vmax.f32 %v6080_v10, 0.0  ;;  %6020 = vrot.lane.b32.xlu1 %v10321_v46, %s8093_s30  ;;  %v5950_v41 = vadd.f32 %v10425_v16, %v5915_v15 }
 0x3f5   : > { %v6337_v20 = vmax.f32 %v6305_v21, 0.0  ;;  %v6221_v28 = vpop.permute.xlu0 %6220 }
 0x3f6   : > { %v6407_v37 = vsel %vm6400_vm10, %v6374_v59, %v6112_v5  ;;  %v6310_v57 = vadd.f32 %v6221_v28, %v6182_v11  ;;  %v5763_v27 = vpop.permute.xlu1 %5762  ;;  %v6145_v11 = vmul.f32 %v10435_v47, %v10049_v39  ;;  %v6183_v28 = vadd.f32 %v10439_v51, %v6148_v34 }
 0x3f7   : > { %v6435_v43 = vsel %vm6433_vm11, %v6402_v0, %v6337_v20  ;;  %v5851_v48 = vadd.f32 %v5763_v27, %v5691_v61  ;;  %6030 = vrot.lane.b32.xlu0 %v10332_v49, %s8093_s30  ;;  %v5654_v61 = vmul.f32 %v10405_v44, %v10053_v12 }
 0x3f8   : > { %6468 = vst.msk [vmem:[%s10484_s14 + $0x8] sm:$0xff] %vm6466_vm12, %v6435_v43  ;;  %v6342_v55 = vmax.f32 %v6310_v57, 0.0  ;;  %6250 = vrot.lane.b32.xlu1 %v10321_v46, %s8094_s11  ;;  %v6180_v39 = vadd.f32 %v10439_v51, %v6145_v11  ;;  %v6146_v11 = vmul.f32 %v10435_v47, %v10053_v12 }
 0x3f9   : > { %v5883_v35 = vmax.f32 %v5851_v48, 0.0  ;;  %v5757_v36 = vpop.permute.xlu0 %5756  ;;  %v5659_v48 = vmul.f32 %v10055_v31, %v10405_v44  ;;  %v5689_v15 = vadd.f32 %v10415_v62, %v5654_v61 }
 0x3fa   : > { %v6440_v59 = vsel %vm6433_vm11, %v6407_v37, %v6342_v55  ;;  %v5848_v10 = vadd.f32 %v5757_v36, %v5688_v33  ;;  %v5993_v2 = vpop.permute.xlu1 %5992 }
 0x3fb   : > { %6473 = vst.msk [vmem:[%s10484_s14 + $0x30] sm:$0xff] %vm6466_vm12, %v6440_v59  ;;  %v6375_v0 = vsel %vm5047_vm9, %v5621_v60, %v5883_v35  ;;  %v6081_v21 = vadd.f32 %v5993_v2, %v5953_v9  ;;  %6260 = vrot.lane.b32.xlu0 %v10332_v49, %s8094_s11  ;;  %v5916_v60 = vmul.f32 %v10421_v53, %v10053_v12 }
 0x3fc   : > { %v5880_v5 = vmax.f32 %v5848_v10, 0.0  ;;  %5802 = vrot.lane.b32.xlu1 %v10340_v13, %s8092_s27  ;;  %v5694_v2 = vadd.f32 %v10415_v62, %v5659_v48 }
 0x3fd   : > { %v6113_v25 = vmax.f32 %v6081_v21, 0.0  ;;  %v5987_v20 = vpop.permute.xlu0 %5986  ;;  %v5619_v21 = vmax.f32 %v10192_v30, 0.0  ;;  %v5624_v30 = vmax.f32 %v10218_v38, 0.0 }
 0x3fe   : > { %v6372_v40 = vsel %vm5047_vm9, %v5618_v24, %v5880_v5  ;;  %v6078_v37 = vadd.f32 %v5987_v20, %v5950_v41  ;;  %v6223_v1 = vpop.permute.xlu1 %6222  ;;  %v5951_v41 = vadd.f32 %v10425_v16, %v5916_v60 }
 0x3ff   : > { %v6408_v57 = vsel %vm6400_vm10, %v6375_v0, %v6113_v25  ;;  %v6311_v27 = vadd.f32 %v6223_v1, %v6183_v28  ;;  %5796 = vrot.lane.b32.xlu0 %v10336_v26, %s8092_s27  ;;  %v5921_v0 = vmul.f32 %v10055_v31, %v10421_v53  ;;  %v6151_v1 = vmul.f32 %v10055_v31, %v10435_v47 }
 0x400   : > { %v6110_v43 = vmax.f32 %v6078_v37, 0.0  ;;  %6032 = vrot.lane.b32.xlu1 %v10340_v13, %s8093_s30 }
 0x401   : > { %v6343_v55 = vmax.f32 %v6311_v27, 0.0  ;;  %v6217_v33 = vpop.permute.xlu0 %6216  ;;  %v5956_v12 = vadd.f32 %v10425_v16, %v5921_v0  ;;  %v6186_v31 = vadd.f32 %v10439_v51, %v6151_v1 }
 0x402   : > { %v6405_v35 = vsel %vm6400_vm10, %v6372_v40, %v6110_v43  ;;  %v6308_v36 = vadd.f32 %v6217_v33, %v6180_v39  ;;  %v5759_v9 = vpop.permute.xlu1 %5758  ;;  %v6181_v43 = vadd.f32 %v10439_v51, %v6146_v11  ;;  %v5660_v39 = vmul.f32 %v10059_v3, %v10405_v44 }
 0x403   : > { %v6441_v34 = vsel %vm6433_vm11, %v6408_v57, %v6343_v55  ;;  %v5849_v59 = vadd.f32 %v5759_v9, %v5689_v15  ;;  %6026 = vrot.lane.b32.xlu0 %v10336_v26, %s8093_s30  ;;  %v5919_v11 = vmul.f32 %v10421_v53, %v10057_v14 }
 0x404   : > { %6474 = vst.msk [vmem:[%s10484_s14 + $0x38] sm:$0xff] %vm6466_vm12, %v6441_v34  ;;  %v6340_v10 = vmax.f32 %v6308_v36, 0.0  ;;  %6262 = vrot.lane.b32.xlu1 %v10340_v13, %s8094_s11  ;;  %v5695_v34 = vadd.f32 %v10415_v62, %v5660_v39 }
 0x405   : > { %v5881_v24 = vmax.f32 %v5849_v59, 0.0  ;;  %v5769_v5 = vpop.permute.xlu0 %5768  ;;  %v5922_v59 = vmul.f32 %v10059_v3, %v10421_v53 }
 0x406   : > { %v6438_v25 = vsel %vm6433_vm11, %v6405_v35, %v6340_v10  ;;  %v5854_v20 = vadd.f32 %v5769_v5, %v5694_v2  ;;  %v5989_v28 = vpop.permute.xlu1 %5988  ;;  %v5657_v35 = vmul.f32 %v10405_v44, %v10057_v14 }
 0x407   : > { %6471 = vst.msk [vmem:[%s10484_s14 + $0x20] sm:$0xff] %vm6466_vm12, %v6438_v25  ;;  %v6373_v61 = vsel %vm5047_vm9, %v5619_v21, %v5881_v24  ;;  %v6079_v40 = vadd.f32 %v5989_v28, %v5951_v41  ;;  %6256 = vrot.lane.b32.xlu0 %v10336_v26, %s8094_s11  ;;  %v5625_v25 = vmax.f32 %v10232_v45, 0.0  ;;  %v5622_v45 = vmax.f32 %v10227_v17, 0.0 }
 0x408   : > { %v5886_v37 = vmax.f32 %v5854_v20, 0.0  ;;  %5798 = vrot.lane.b32.xlu1 %v10345_v42, %s8092_s27  ;;  %v5692_v41 = vadd.f32 %v10415_v62, %v5657_v35 }
 0x409   : > { %v6111_v57 = vmax.f32 %v6079_v40, 0.0  ;;  %v5999_v27 = vpop.permute.xlu0 %5998  ;;  %v6152_v40 = vmul.f32 %v10059_v3, %v10435_v47  ;;  %v5954_v3 = vadd.f32 %v10425_v16, %v5919_v11 }
 0x40a   : > { %v6378_v48 = vsel %vm5047_vm9, %v5624_v30, %v5886_v37  ;;  %v6084_v55 = vadd.f32 %v5999_v27, %v5956_v12  ;;  %v6219_v38 = vpop.permute.xlu1 %6218 }
 0x40b   : > { %v6406_v33 = vsel %vm6400_vm10, %v6373_v61, %v6111_v57  ;;  %v6309_v15 = vadd.f32 %v6219_v38, %v6181_v43  ;;  %5808 = vrot.lane.b32.xlu0 %v10356_v18, %s8092_s27  ;;  %v5957_v61 = vadd.f32 %v10425_v16, %v5922_v59  ;;  %v6149_v43 = vmul.f32 %v10435_v47, %v10057_v14 }
 0x40c   : > { %v6116_v60 = vmax.f32 %v6084_v55, 0.0  ;;  %6028 = vrot.lane.b32.xlu1 %v10345_v42, %s8093_s30  ;;  %v6187_v55 = vadd.f32 %v10439_v51, %v6152_v40  ;;  %v5658_v38 = vmul.f32 %v10405_v44, %v10061_v6 }
 0x40d   : > { %v6341_v36 = vmax.f32 %v6309_v15, 0.0  ;;  %v6229_v9 = vpop.permute.xlu0 %6228  ;;  %v6184_v14 = vadd.f32 %v10439_v51, %v6149_v43 }
 0x40e   : > { %v6411_v10 = vsel %vm6400_vm10, %v6378_v48, %v6116_v60  ;;  %v6314_v2 = vadd.f32 %v6229_v9, %v6186_v31  ;;  %v5771_v0 = vpop.permute.xlu1 %5770  ;;  %v5693_v59 = vadd.f32 %v10415_v62, %v5658_v38 }
 0x40f   : > { %v6439_v21 = vsel %vm6433_vm11, %v6406_v33, %v6341_v36  ;;  %v5855_v24 = vadd.f32 %v5771_v0, %v5695_v34  ;;  %6038 = vrot.lane.b32.xlu0 %v10356_v18, %s8093_s30  ;;  %v5663_v36 = vmul.f32 %v10063_v8, %v10405_v44 }
 0x410   : > { %6472 = vst.msk [vmem:[%s10484_s14 + $0x28] sm:$0xff] %vm6466_vm12, %v6439_v21  ;;  %v6346_v5 = vmax.f32 %v6314_v2, 0.0  ;;  %6258 = vrot.lane.b32.xlu1 %v10345_v42, %s8094_s11 }
 0x411   : > { %v5887_v20 = vmax.f32 %v5855_v24, 0.0  ;;  %v5765_v28 = vpop.permute.xlu0 %5764  ;;  %v5698_v11 = vadd.f32 %v10415_v62, %v5663_v36 }
 0x412   : > { %v6444_v30 = vsel %vm6433_vm11, %v6411_v10, %v6346_v5  ;;  %v5852_v37 = vadd.f32 %v5765_v28, %v5692_v41  ;;  %v6001_v12 = vpop.permute.xlu1 %6000  ;;  %v5920_v10 = vmul.f32 %v10421_v53, %v10061_v6 }
 0x413   : > { %6477 = vst.msk [vmem:[%s10484_s14 + $0x50] sm:$0xff] %vm6466_vm12, %v6444_v30  ;;  %v6379_v1 = vsel %vm5047_vm9, %v5625_v25, %v5887_v20  ;;  %v6085_v57 = vadd.f32 %v6001_v12, %v5957_v61  ;;  %5804 = vrot.lane.b32.xlu0 %v10360_v7, %s8092_s27  ;;  %v5925_v25 = vmul.f32 %v10063_v8, %v10421_v53  ;;  %v5623_v20 = vmax.f32 %v10237_v52, 0.0 }
 0x414   : > { %v5884_v27 = vmax.f32 %v5852_v37, 0.0  ;;  %5810 = vrot.lane.b32.xlu1 %v10364_v54, %s8092_s27  ;;  %v5955_v40 = vadd.f32 %v10425_v16, %v5920_v10  ;;  %v6150_v30 = vmul.f32 %v10435_v47, %v10061_v6  ;;  %v5628_v52 = vmax.f32 %v10264_v19, 0.0 }
 0x415   : > { %v6117_v39 = vmax.f32 %v6085_v57, 0.0  ;;  %v5995_v48 = vpop.permute.xlu0 %5994  ;;  %v5960_v6 = vadd.f32 %v10425_v16, %v5925_v25 }
 0x416   : > { %v6376_v33 = vsel %vm5047_vm9, %v5622_v45, %v5884_v27  ;;  %v6082_v15 = vadd.f32 %v5995_v48, %v5954_v3  ;;  %v6231_v17 = vpop.permute.xlu1 %6230  ;;  %v6155_v3 = vmul.f32 %v10063_v8, %v10435_v47  ;;  %v6185_v48 = vadd.f32 %v10439_v51, %v6150_v30 }
 0x417   : > { %v6412_v60 = vsel %vm6400_vm10, %v6379_v1, %v6117_v39  ;;  %v6315_v31 = vadd.f32 %v6231_v17, %v6187_v55  ;;  %6034 = vrot.lane.b32.xlu0 %v10360_v7, %s8093_s30  ;;  %v5664_v55 = vmul.f32 %v10067_v50, %v10405_v44 }
 0x418   : > { %v6114_v35 = vmax.f32 %v6082_v15, 0.0  ;;  %6040 = vrot.lane.b32.xlu1 %v10364_v54, %s8093_s30  ;;  %v6190_v8 = vadd.f32 %v10439_v51, %v6155_v3 }
 0x419   : > { %v6347_v9 = vmax.f32 %v6315_v31, 0.0  ;;  %v6225_v34 = vpop.permute.xlu0 %6224  ;;  %v5661_v31 = vmul.f32 %v10405_v44, %v10065_v23  ;;  %v5699_v36 = vadd.f32 %v10415_v62, %v5664_v55  ;;  %v11246_v55 = vld [vmem:[#allocation15_spill] sm:$0xff] }
 0x41a   : > { %v6409_v2 = vsel %vm6400_vm10, %v6376_v33, %v6114_v35  ;;  %v6312_v0 = vadd.f32 %v6225_v34, %v6184_v14  ;;  %v5767_v21 = vpop.permute.xlu1 %5766 }
 0x41b   : > { %v6445_v24 = vsel %vm6433_vm11, %v6412_v60, %v6347_v9  ;;  %v5853_v5 = vadd.f32 %v5767_v21, %v5693_v59  ;;  %6264 = vrot.lane.b32.xlu0 %v10360_v7, %s8094_s11  ;;  %v5926_v9 = vmul.f32 %v10067_v50, %v10421_v53 }
 0x41c   : > { %6478 = vst.msk [vmem:[%s10484_s14 + $0x58] sm:$0xff] %vm6466_vm12, %v6445_v24  ;;  %v6344_v41 = vmax.f32 %v6312_v0, 0.0  ;;  %5806 = vrot.lane.b32.xlu1 %v10369_v63, %s8092_s27  ;;  %v5696_v24 = vadd.f32 %v10415_v62, %v5661_v31 }
 0x41d   : > { %v5885_v28 = vmax.f32 %v5853_v5, 0.0  ;;  %v5777_v61 = vpop.permute.xlu0 %5776  ;;  %v5923_v5 = vmul.f32 %v10421_v53, %v10065_v23 }
 0x41e   : > { %v6442_v37 = vsel %vm6433_vm11, %v6409_v2, %v6344_v41  ;;  %v5858_v12 = vadd.f32 %v5777_v61, %v5698_v11  ;;  %v5997_v1 = vpop.permute.xlu1 %5996  ;;  %v5629_v41 = vmax.f32 %v10275_v29, 0.0 }
 0x41f   : > { %6475 = vst.msk [vmem:[%s10484_s14 + $0x40] sm:$0xff] %vm6466_vm12, %v6442_v37  ;;  %v6377_v57 = vsel %vm5047_vm9, %v5623_v20, %v5885_v28  ;;  %v6083_v45 = vadd.f32 %v5997_v1, %v5955_v40  ;;  %6268 = vrot.lane.b32.xlu0 %v10356_v18, %s8094_s11  ;;  %v5961_v20 = vadd.f32 %v10425_v16, %v5926_v9  ;;  %v5626_v1 = vmax.f32 %v10272_v32, 0.0 }
 0x420   : > { %v5890_v27 = vmax.f32 %v5858_v12, 0.0  ;;  %6036 = vrot.lane.b32.xlu1 %v10369_v63, %s8093_s30  ;;  %v6156_v28 = vmul.f32 %v10067_v50, %v10435_v47  ;;  %v5958_v29 = vadd.f32 %v10425_v16, %v5923_v5  ;;  %v5662_v32 = vmul.f32 %v10405_v44, %v11246_v55 }
 0x421   : > { %v6115_v43 = vmax.f32 %v6083_v45, 0.0  ;;  %v6007_v39 = vpop.permute.xlu0 %6006  ;;  %v6153_v45 = vmul.f32 %v10435_v47, %v10065_v23  ;;  %v10746_v23 = vld [vmem:[%s11073_s6] ss:$0 sm:$0xff] }
 0x422   : > { %v6382_v38 = vsel %vm5047_vm9, %v5628_v52, %v5890_v27  ;;  %v6088_v33 = vadd.f32 %v6007_v39, %v5960_v6  ;;  %v6227_v19 = vpop.permute.xlu1 %6226  ;;  %v6191_v50 = vadd.f32 %v10439_v51, %v6156_v28 }
 0x423   : > { %v6410_v15 = vsel %vm6400_vm10, %v6377_v57, %v6115_v43  ;;  %v6313_v17 = vadd.f32 %v6227_v19, %v6185_v48  ;;  %v5524_v19 = vmul.f32 %v10746_v23, %v11246_v55 }
 0x424   : > { %v6120_v60 = vmax.f32 %v6088_v33, 0.0  ;;  %6266 = vrot.lane.b32.xlu1 %v10369_v63, %s8094_s11  ;;  %v6188_v33 = vadd.f32 %v10439_v51, %v6153_v45 }
 0x425   : > { %v6345_v35 = vmax.f32 %v6313_v17, 0.0  ;;  %v6237_v14 = vpop.permute.xlu0 %6236 }
 0x426   : > { %v6415_v34 = vsel %vm6400_vm10, %v6382_v38, %v6120_v60  ;;  %v6318_v59 = vadd.f32 %v6237_v14, %v6190_v8  ;;  %v5779_v10 = vpop.permute.xlu1 %5778  ;;  %v5924_v60 = vmul.f32 %v10421_v53, %v11246_v55  ;;  %v11247_v14 = vld [vmem:[#allocation20_spill] sm:$0xff] }
 0x427   : > { %v6443_v2 = vsel %vm6433_vm11, %v6410_v15, %v6345_v35  ;;  %v5859_v0 = vadd.f32 %v5779_v10, %v5699_v36  ;;  %v5667_v36 = vmul.f32 %v11247_v14, %v10405_v44 }
 0x428   : > { %6476 = vst.msk [vmem:[%s10484_s14 + $0x48] sm:$0xff] %vm6466_vm12, %v6443_v2  ;;  %v6350_v21 = vmax.f32 %v6318_v59, 0.0  ;;  %6270 = vrot.lane.b32.xlu1 %v10364_v54, %s8094_s11  ;;  %v5529_v59 = vmul.f32 %v10746_v23, %v11247_v14  ;;  %v5929_v2 = vmul.f32 %v11247_v14, %v10421_v53 }
 0x429   : > { %v5891_v11 = vmax.f32 %v5859_v0, 0.0  ;;  %v5773_v25 = vpop.permute.xlu0 %5772  ;;  %v10766_v0 = vld [vmem:[%s11074_s7] ss:$0 sm:$0xff] }
 0x42a   : > { %v6448_v61 = vsel %vm6433_vm11, %v6415_v34, %v6350_v21  ;;  %v5856_v40 = vadd.f32 %v5773_v25, %v5696_v24  ;;  %v6009_v30 = vpop.permute.xlu1 %6008  ;;  %v5697_v34 = vadd.f32 %v10415_v62, %v5662_v32  ;;  %v5563_v21 = vadd.f32 %v10766_v0, %v5524_v19 }
 0x42b   : > { %6481 = vst.msk [vmem:[%s10484_s14 + $0x70] sm:$0xff] %vm6466_vm12, %v6448_v61  ;;  %v6383_v37 = vsel %vm5047_vm9, %v5629_v41, %v5891_v11  ;;  %v6089_v12 = vadd.f32 %v6009_v30, %v5961_v20  ;;  %v5959_v41 = vadd.f32 %v10425_v16, %v5924_v60  ;;  %v6154_v11 = vmul.f32 %v10435_v47, %v11246_v55  ;;  %v11248_v61 = vld [vmem:[#allocation9_spill] sm:$0xff]  ;;  %v11250_v55 = vld [vmem:[#allocation2_spill] sm:$0xff] }
 0x42c   : > { %v5888_v57 = vmax.f32 %v5856_v40, 0.0  ;;  %v5702_v20 = vadd.f32 %v10415_v62, %v5667_v36  ;;  %v5595_v40 = vadd.f32 %v5563_v21, %v11248_v61  ;;  %v5668_v32 = vmul.f32 %v11250_v55, %v10405_v44 }
 0x42d   : > { %v6121_v52 = vmax.f32 %v6089_v12, 0.0  ;;  %v6003_v27 = vpop.permute.xlu0 %6002 }
 0x42e   : > { %v6380_v6 = vsel %vm5047_vm9, %v5626_v1, %v5888_v57  ;;  %v6086_v3 = vadd.f32 %v6003_v27, %v5958_v29  ;;  %v6239_v43 = vpop.permute.xlu1 %6238  ;;  %v5964_v1 = vadd.f32 %v10425_v16, %v5929_v2  ;;  %v6159_v57 = vmul.f32 %v11247_v14, %v10435_v47  ;;  %v11249_v27 = vld [vmem:[#allocation10_spill] sm:$0xff] }
 0x42f   : > { %v6416_v39 = vsel %vm6400_vm10, %v6383_v37, %v6121_v52  ;;  %v6319_v48 = vadd.f32 %v6239_v43, %v6191_v50  ;;  %v5568_v37 = vadd.f32 %v10766_v0, %v5529_v59  ;;  %v6189_v52 = vadd.f32 %v10439_v51, %v6154_v11 }
 0x430   : > { %v6118_v38 = vmax.f32 %v6086_v3, 0.0  ;;  %v6194_v19 = vadd.f32 %v10439_v51, %v6159_v57  ;;  %v5703_v21 = vadd.f32 %v10415_v62, %v5668_v32 }
 0x431   : > { %v6351_v15 = vmax.f32 %v6319_v48, 0.0  ;;  %v6233_v17 = vpop.permute.xlu0 %6232  ;;  %v5600_v50 = vadd.f32 %v5568_v37, %v11249_v27 }
 0x432   : > { %v6413_v8 = vsel %vm6400_vm10, %v6380_v6, %v6118_v38  ;;  %v6316_v31 = vadd.f32 %v6233_v17, %v6188_v33  ;;  %v5775_v35 = vpop.permute.xlu1 %5774  ;;  %v5530_v38 = vmul.f32 %v10746_v23, %v11250_v55 }
 0x433   : > { %v6449_v9 = vsel %vm6433_vm11, %v6416_v39, %v6351_v15  ;;  %v5857_v24 = vadd.f32 %v5775_v35, %v5697_v34  ;;  %v5627_v39 = vmax.f32 %v5595_v40, 0.0  ;;  %v5632_v35 = vmax.f32 %v5600_v50, 0.0  ;;  %v11251_v34 = vld [vmem:[#allocation17_spill] sm:$0xff] }
 0x434   : > { %6482 = vst.msk [vmem:[%s10484_s14 + $0x78] sm:$0xff] %vm6466_vm12, %v6449_v9  ;;  %v6348_v10 = vmax.f32 %v6316_v31, 0.0  ;;  %v5930_v31 = vmul.f32 %v11250_v55, %v10421_v53  ;;  %v5665_v59 = vmul.f32 %v10405_v44, %v11251_v34  ;;  %v5927_v11 = vmul.f32 %v10421_v53, %v11251_v34 }
 0x435   : > { %v5785_v5 = vpop.permute.xlu0 %5784  ;;  %v5889_v29 = vmax.f32 %v5857_v24, 0.0  ;;  %v5569_v24 = vadd.f32 %v10766_v0, %v5530_v38  ;;  %v6160_v40 = vmul.f32 %v11250_v55, %v10435_v47  ;;  %v6157_v50 = vmul.f32 %v10435_v47, %v11251_v34 }
 0x436   : > { %v6446_v25 = vsel %vm6433_vm11, %v6413_v8, %v6348_v10  ;;  %v6005_v28 = vpop.permute.xlu1 %6004  ;;  %v5862_v12 = vadd.f32 %v5785_v5, %v5702_v20  ;;  %v5527_v10 = vmul.f32 %v10746_v23, %v11251_v34  ;;  %v5965_v61 = vadd.f32 %v10425_v16, %v5930_v31 }
 0x437   : > { %6479 = vst.msk [vmem:[%s10484_s14 + $0x60] sm:$0xff] %vm6466_vm12, %v6446_v25  ;;  %v6087_v30 = vadd.f32 %v6005_v28, %v5959_v41  ;;  %v6381_v15 = vsel %vm5047_vm9, %v5627_v39, %v5889_v29  ;;  %v5700_v37 = vadd.f32 %v10415_v62, %v5665_v59  ;;  %v5962_v27 = vadd.f32 %v10425_v16, %v5927_v11  ;;  %v11253_v39 = vld [vmem:[#allocation11_spill] sm:$0xff] }
 0x438   : > { %v5894_v33 = vmax.f32 %v5862_v12, 0.0  ;;  %v6192_v31 = vadd.f32 %v10439_v51, %v6157_v50 }
 0x439   : > { %v6015_v45 = vpop.permute.xlu0 %6014  ;;  %v6119_v6 = vmax.f32 %v6087_v30, 0.0 }
 0x43a   : > { %v6092_v3 = vadd.f32 %v6015_v45, %v5964_v1  ;;  %v6235_v43 = vpop.permute.xlu1 %6234  ;;  %v6386_v5 = vsel %vm5047_vm9, %v5632_v35, %v5894_v33  ;;  %v11252_v1 = vld [vmem:[#allocation12_spill] sm:$0xff]  ;;  %v5566_v45 = vadd.f32 %v10766_v0, %v5527_v10  ;;  %v11254_v33 = vld [vmem:[#allocation23_spill] sm:$0xff] }
 0x43b   : > { %v6317_v48 = vadd.f32 %v6235_v43, %v6189_v52  ;;  %v6414_v14 = vsel %vm6400_vm10, %v6381_v15, %v6119_v6  ;;  %v5601_v57 = vadd.f32 %v5569_v24, %v11252_v1  ;;  %v6195_v43 = vadd.f32 %v10439_v51, %v6160_v40  ;;  %v11255_v24 = vld [vmem:[#allocation3_spill] sm:$0xff] }
 0x43c   : > { %v6124_v17 = vmax.f32 %v6092_v3, 0.0  ;;  %v5928_v34 = vmul.f32 %v10421_v53, %v11254_v33  ;;  %v5933_v40 = vmul.f32 %v11255_v24, %v10421_v53 }
 0x43d   : > { %v6349_v60 = vmax.f32 %v6317_v48, 0.0  ;;  %v6245_v8 = vpop.permute.xlu0 %6244  ;;  %v5598_v48 = vadd.f32 %v5566_v45, %v11253_v39  ;;  %v5633_v15 = vmax.f32 %v5601_v57, 0.0  ;;  %v6158_v57 = vmul.f32 %v10435_v47, %v11254_v33 }
 0x43e   : > { %v6322_v36 = vadd.f32 %v6245_v8, %v6194_v19  ;;  %v5787_v9 = vpop.permute.xlu1 %5786  ;;  %v6419_v25 = vsel %vm6400_vm10, %v6386_v5, %v6124_v17  ;;  %v5528_v19 = vmul.f32 %v10746_v23, %v11254_v33  ;;  %v5671_v5 = vmul.f32 %v11255_v24, %v10405_v44 }
 0x43f   : > { %v6447_v2 = vsel %vm6433_vm11, %v6414_v14, %v6349_v60  ;;  %v5863_v20 = vadd.f32 %v5787_v9, %v5703_v21  ;;  %v5666_v60 = vmul.f32 %v10405_v44, %v11254_v33  ;;  %v5630_v59 = vmax.f32 %v5598_v48, 0.0 }
 0x440   : > { %6480 = vst.msk [vmem:[%s10484_s14 + $0x68] sm:$0xff] %vm6466_vm12, %v6447_v2  ;;  %v6354_v41 = vmax.f32 %v6322_v36, 0.0  ;;  %v5963_v1 = vadd.f32 %v10425_v16, %v5928_v34  ;;  %v5706_v45 = vadd.f32 %v10415_v62, %v5671_v5  ;;  %v6163_v39 = vmul.f32 %v11255_v24, %v10435_v47  ;;  %v11257_v5 = vld [vmem:[#allocation24_spill] sm:$0xff] }
 0x441   : > { %v5781_v28 = vpop.permute.xlu0 %5780  ;;  %v5895_v6 = vmax.f32 %v5863_v20, 0.0  ;;  %v5533_v20 = vmul.f32 %v10746_v23, %v11255_v24 }
 0x442   : > { %v6452_v30 = vsel %vm6433_vm11, %v6419_v25, %v6354_v41  ;;  %v6017_v12 = vpop.permute.xlu1 %6016  ;;  %v5860_v52 = vadd.f32 %v5781_v28, %v5700_v37  ;;  %v5567_v41 = vadd.f32 %v10766_v0, %v5528_v19  ;;  %v5701_v25 = vadd.f32 %v10415_v62, %v5666_v60  ;;  %v11256_v60 = vld [vmem:[#allocation26_spill] sm:$0xff] }
 0x443   : > { %6485 = vst.msk [vmem:[%s10484_s14 + $0x90] sm:$0xff] %vm6466_vm12, %v6452_v30  ;;  %v6093_v29 = vadd.f32 %v6017_v12, %v5965_v61  ;;  %v6387_v35 = vsel %vm5047_vm9, %v5633_v15, %v5895_v6  ;;  %v5572_v6 = vadd.f32 %v10766_v0, %v5533_v20 }
 0x444   : > { %v5892_v8 = vmax.f32 %v5860_v52, 0.0 }
 0x445   : > { %v6011_v3 = vpop.permute.xlu0 %6010  ;;  %v6125_v55 = vmax.f32 %v6093_v29, 0.0 }
 0x446   : > { %v6090_v32 = vadd.f32 %v6011_v3, %v5962_v27  ;;  %v6247_v38 = vpop.permute.xlu1 %6246  ;;  %v6384_v28 = vsel %vm5047_vm9, %v5630_v59, %v5892_v8  ;;  %v5599_v27 = vadd.f32 %v5567_v41, %v10297_v22  ;;  %v5672_v8 = vmul.f32 %v11256_v60, %v10405_v44 }
 0x447   : > { %v6323_v17 = vadd.f32 %v6247_v38, %v6195_v43  ;;  %v6420_v10 = vsel %vm6400_vm10, %v6387_v35, %v6125_v55  ;;  %v5968_v43 = vadd.f32 %v10425_v16, %v5933_v40  ;;  %v5604_v38 = vadd.f32 %v5572_v6, %v10308_v4 }
 0x448   : > { %v6122_v14 = vmax.f32 %v6090_v32, 0.0  ;;  %v6193_v32 = vadd.f32 %v10439_v51, %v6158_v57  ;;  %v5934_v59 = vmul.f32 %v11256_v60, %v10421_v53  ;;  %v5669_v41 = vmul.f32 %v10405_v44, %v11257_v5 }
 0x449   : > { %v6355_v36 = vmax.f32 %v6323_v17, 0.0  ;;  %v6241_v9 = vpop.permute.xlu0 %6240  ;;  %v5631_v17 = vmax.f32 %v5599_v27, 0.0  ;;  %v5707_v20 = vadd.f32 %v10415_v62, %v5672_v8 }
 0x44a   : > { %v6320_v2 = vadd.f32 %v6241_v9, %v6192_v31  ;;  %v5783_v21 = vpop.permute.xlu1 %5782  ;;  %v6417_v30 = vsel %vm6400_vm10, %v6384_v28, %v6122_v14  ;;  %v5534_v31 = vmul.f32 %v10746_v23, %v11256_v60  ;;  %v6198_v14 = vadd.f32 %v10439_v51, %v6163_v39 }
 0x44b   : > { %v6453_v11 = vsel %vm6433_vm11, %v6420_v10, %v6355_v36  ;;  %v5861_v37 = vadd.f32 %v5783_v21, %v5701_v25  ;;  %v5636_v10 = vmax.f32 %v5604_v38, 0.0  ;;  %v5969_v57 = vadd.f32 %v10425_v16, %v5934_v59 }
 0x44c   : > { %6486 = vst.msk [vmem:[%s10484_s14 + $0x98] sm:$0xff] %vm6466_vm12, %v6453_v11  ;;  %v6352_v61 = vmax.f32 %v6320_v2, 0.0  ;;  %v5531_v11 = vmul.f32 %v10746_v23, %v11257_v5  ;;  %v5573_v28 = vadd.f32 %v10766_v0, %v5534_v31 }
 0x44d   : > { %v5793_v12 = vpop.permute.xlu0 %5792  ;;  %v5893_v48 = vmax.f32 %v5861_v37, 0.0 }
 0x44e   : > { %v6450_v29 = vsel %vm6433_vm11, %v6417_v30, %v6352_v61  ;;  %v6013_v52 = vpop.permute.xlu1 %6012  ;;  %v5866_v3 = vadd.f32 %v5793_v12, %v5706_v45  ;;  %v5931_v30 = vmul.f32 %v10421_v53, %v11257_v5 }
 0x44f   : > { %6483 = vst.msk [vmem:[%s10484_s14 + $0x80] sm:$0xff] %vm6466_vm12, %v6450_v29  ;;  %v6091_v50 = vadd.f32 %v6013_v52, %v5963_v1  ;;  %v6385_v36 = vsel %vm5047_vm9, %v5631_v17, %v5893_v48  ;;  %v6164_v29 = vmul.f32 %v11256_v60, %v10435_v47  ;;  %v5704_v52 = vadd.f32 %v10415_v62, %v5669_v41 }
 0x450   : > { %v5898_v35 = vmax.f32 %v5866_v3, 0.0  ;;  %v5570_v3 = vadd.f32 %v10766_v0, %v5531_v11  ;;  %v5966_v39 = vadd.f32 %v10425_v16, %v5931_v30  ;;  %v6161_v48 = vmul.f32 %v10435_v47, %v11257_v5 }
 0x451   : > { %v6023_v55 = vpop.permute.xlu0 %6022  ;;  %v6123_v33 = vmax.f32 %v6091_v50, 0.0  ;;  %v5605_v50 = vadd.f32 %v5573_v28, %v10316_v58  ;;  %v6199_v38 = vadd.f32 %v10439_v51, %v6164_v29 }
 0x452   : > { %v6096_v19 = vadd.f32 %v6023_v55, %v5968_v43  ;;  %v6243_v15 = vpop.permute.xlu1 %6242  ;;  %v6390_v61 = vsel %vm5047_vm9, %v5636_v10, %v5898_v35 }
 0x453   : > { %v6321_v22 = vadd.f32 %v6243_v15, %v6193_v32  ;;  %v6418_v2 = vsel %vm6400_vm10, %v6385_v36, %v6123_v33  ;;  %v5602_v33 = vadd.f32 %v5570_v3, %v10312_v56  ;;  %v5637_v60 = vmax.f32 %v5605_v50, 0.0 }
 0x454   : > { %v6128_v9 = vmax.f32 %v6096_v19, 0.0 }
 0x455   : > { %v6353_v34 = vmax.f32 %v6321_v22, 0.0  ;;  %v6253_v4 = vpop.permute.xlu0 %6252  ;;  %v11258_v22 = vld [vmem:[#allocation25_spill] sm:$0xff]  ;;  %v5634_v59 = vmax.f32 %v5602_v33, 0.0 }
 0x456   : > { %v6326_v21 = vadd.f32 %v6253_v4, %v6198_v14  ;;  %v5795_v24 = vpop.permute.xlu1 %5794  ;;  %v6423_v37 = vsel %vm6400_vm10, %v6390_v61, %v6128_v9  ;;  %v5532_v58 = vmul.f32 %v10746_v23, %v11258_v22  ;;  %v5670_v31 = vmul.f32 %v10405_v44, %v11258_v22 }
 0x457   : > { %v6451_v25 = vsel %vm6433_vm11, %v6418_v2, %v6353_v34  ;;  %v5867_v12 = vadd.f32 %v5795_v24, %v5707_v20  ;;  %v6196_v14 = vadd.f32 %v10439_v51, %v6161_v48  ;;  %v5932_v4 = vmul.f32 %v10421_v53, %v11258_v22  ;;  %v11259_v24 = vld [vmem:[#allocation28_spill] sm:$0xff] }
 0x458   : > { %6484 = vst.msk [vmem:[%s10484_s14 + $0x88] sm:$0xff] %vm6466_vm12, %v6451_v25  ;;  %v6358_v40 = vmax.f32 %v6326_v21, 0.0  ;;  %v5675_v5 = vmul.f32 %v11259_v24, %v10405_v44  ;;  %v5571_v41 = vadd.f32 %v10766_v0, %v5532_v58  ;;  %v5705_v25 = vadd.f32 %v10415_v62, %v5670_v31 }
 0x459   : > { %v5789_v1 = vpop.permute.xlu0 %5788  ;;  %v5899_v55 = vmax.f32 %v5867_v12, 0.0  ;;  %v5537_v20 = vmul.f32 %v10746_v23, %v11259_v24 }
 0x45a   : > { %v6456_v45 = vsel %vm6433_vm11, %v6423_v37, %v6358_v40  ;;  %v6025_v27 = vpop.permute.xlu1 %6024  ;;  %v5864_v43 = vadd.f32 %v5789_v1, %v5704_v52  ;;  %v5937_v40 = vmul.f32 %v11259_v24, %v10421_v53  ;;  %v5967_v1 = vadd.f32 %v10425_v16, %v5932_v4 }
 0x45b   : > { %6489 = vst.msk [vmem:[%s10484_s14 + $0xb0] sm:$0xff] %vm6466_vm12, %v6456_v45  ;;  %v6097_v6 = vadd.f32 %v6025_v27, %v5969_v57  ;;  %v6391_v36 = vsel %vm5047_vm9, %v5637_v60, %v5899_v55  ;;  %v6162_v57 = vmul.f32 %v10435_v47, %v11258_v22  ;;  %v5710_v45 = vadd.f32 %v10415_v62, %v5675_v5  ;;  %v11260_v22 = vld [vmem:[#allocation29_spill] sm:$0xff] }
 0x45c   : > { %v5896_v35 = vmax.f32 %v5864_v43, 0.0  ;;  %v5603_v27 = vadd.f32 %v5571_v41, %v10321_v46  ;;  %v5972_v43 = vadd.f32 %v10425_v16, %v5937_v40  ;;  %v5676_v58 = vmul.f32 %v11260_v22, %v10405_v44 }
 0x45d   : > { %v6019_v32 = vpop.permute.xlu0 %6018  ;;  %v6129_v19 = vmax.f32 %v6097_v6, 0.0  ;;  %v5576_v6 = vadd.f32 %v10766_v0, %v5537_v20  ;;  %v5538_v60 = vmul.f32 %v10746_v23, %v11260_v22 }
 0x45e   : > { %v6094_v15 = vadd.f32 %v6019_v32, %v5966_v39  ;;  %v6255_v17 = vpop.permute.xlu1 %6254  ;;  %v6388_v28 = vsel %vm5047_vm9, %v5634_v59, %v5896_v35  ;;  %v6167_v39 = vmul.f32 %v11259_v24, %v10435_v47  ;;  %v6197_v32 = vadd.f32 %v10439_v51, %v6162_v57 }
 0x45f   : > { %v6327_v8 = vadd.f32 %v6255_v17, %v6199_v38  ;;  %v6424_v10 = vsel %vm6400_vm10, %v6391_v36, %v6129_v19  ;;  %v5608_v38 = vadd.f32 %v5576_v6, %v10332_v49  ;;  %v5635_v17 = vmax.f32 %v5603_v27, 0.0 }
 0x460   : > { %v6126_v9 = vmax.f32 %v6094_v15, 0.0  ;;  %v6202_v31 = vadd.f32 %v10439_v51, %v6167_v39  ;;  %v5711_v5 = vadd.f32 %v10415_v62, %v5676_v58  ;;  %v5577_v41 = vadd.f32 %v10766_v0, %v5538_v60 }
 0x461   : > { %v6359_v34 = vmax.f32 %v6327_v8, 0.0  ;;  %v6249_v56 = vpop.permute.xlu0 %6248 }
 0x462   : > { %v6324_v2 = vadd.f32 %v6249_v56, %v6196_v14  ;;  %v5791_v21 = vpop.permute.xlu1 %5790  ;;  %v6421_v30 = vsel %vm6400_vm10, %v6388_v28, %v6126_v9  ;;  %v5938_v9 = vmul.f32 %v11260_v22, %v10421_v53 }
 0x463   : > { %v6457_v11 = vsel %vm6433_vm11, %v6424_v10, %v6359_v34  ;;  %v5865_v37 = vadd.f32 %v5791_v21, %v5705_v25  ;;  %v5640_v34 = vmax.f32 %v5608_v38, 0.0  ;;  %v11261_v10 = vld [vmem:[#allocation27_spill] sm:$0xff] }
 0x464   : > { %6490 = vst.msk [vmem:[%s10484_s14 + $0xb8] sm:$0xff] %vm6466_vm12, %v6457_v11  ;;  %v6356_v61 = vmax.f32 %v6324_v2, 0.0  ;;  %v5673_v2 = vmul.f32 %v10405_v44, %v11261_v10  ;;  %v5535_v21 = vmul.f32 %v10746_v23, %v11261_v10  ;;  %v5935_v20 = vmul.f32 %v10421_v53, %v11261_v10 }
 0x465   : > { %v5801_v12 = vpop.permute.xlu0 %5800  ;;  %v5897_v48 = vmax.f32 %v5865_v37, 0.0  ;;  %v6168_v37 = vmul.f32 %v11260_v22, %v10435_v47  ;;  %v6165_v6 = vmul.f32 %v10435_v47, %v11261_v10 }
 0x466   : > { %v6454_v29 = vsel %vm6433_vm11, %v6421_v30, %v6356_v61  ;;  %v6021_v52 = vpop.permute.xlu1 %6020  ;;  %v5870_v3 = vadd.f32 %v5801_v12, %v5710_v45  ;;  %v5973_v30 = vadd.f32 %v10425_v16, %v5938_v9 }
 0x467   : > { %6487 = vst.msk [vmem:[%s10484_s14 + $0xa0] sm:$0xff] %vm6466_vm12, %v6454_v29  ;;  %v6095_v50 = vadd.f32 %v6021_v52, %v5967_v1  ;;  %v6389_v35 = vsel %vm5047_vm9, %v5635_v17, %v5897_v48  ;;  %v5708_v1 = vadd.f32 %v10415_v62, %v5673_v2  ;;  %v5609_v29 = vadd.f32 %v5577_v41, %v10340_v13 }
 0x468   : > { %v5902_v8 = vmax.f32 %v5870_v3, 0.0  ;;  %v5574_v52 = vadd.f32 %v10766_v0, %v5535_v21  ;;  %v6203_v39 = vadd.f32 %v10439_v51, %v6168_v37  ;;  %v6200_v22 = vadd.f32 %v10439_v51, %v6165_v6  ;;  %v11264_v6 = vld [vmem:[#allocation5_spill] sm:$0xff] }
 0x469   : > { %v6031_v55 = vpop.permute.xlu0 %6030  ;;  %v6127_v33 = vmax.f32 %v6095_v50, 0.0  ;;  %v5970_v50 = vadd.f32 %v10425_v16, %v5935_v20 }
 0x46a   : > { %v6100_v19 = vadd.f32 %v6031_v55, %v5972_v43  ;;  %v6251_v15 = vpop.permute.xlu1 %6250  ;;  %v6394_v11 = vsel %vm5047_vm9, %v5640_v34, %v5902_v8  ;;  %v5606_v48 = vadd.f32 %v5574_v52, %v10336_v26 }
 0x46b   : > { %v6325_v46 = vadd.f32 %v6251_v15, %v6197_v32  ;;  %v6422_v56 = vsel %vm6400_vm10, %v6389_v35, %v6127_v33  ;;  %v5641_v33 = vmax.f32 %v5609_v29, 0.0 }
 0x46c   : > { %v6132_v14 = vmax.f32 %v6100_v19, 0.0  ;;  %v11262_v19 = vld [vmem:[#allocation4_spill] sm:$0xff]  ;;  %v5638_v35 = vmax.f32 %v5606_v48, 0.0 }
 0x46d   : > { %v6357_v36 = vmax.f32 %v6325_v46, 0.0  ;;  %v6261_v49 = vpop.permute.xlu0 %6260  ;;  %v5674_v15 = vmul.f32 %v10405_v44, %v11262_v19  ;;  %v5536_v17 = vmul.f32 %v10746_v23, %v11262_v19 }
 0x46e   : > { %v6330_v4 = vadd.f32 %v6261_v49, %v6202_v31  ;;  %v5803_v59 = vpop.permute.xlu1 %5802  ;;  %v6427_v28 = vsel %vm6400_vm10, %v6394_v11, %v6132_v14  ;;  %v5936_v31 = vmul.f32 %v10421_v53, %v11262_v19 }
 0x46f   : > { %v6455_v24 = vsel %vm6433_vm11, %v6422_v56, %v6357_v36  ;;  %v5871_v61 = vadd.f32 %v5803_v59, %v5711_v5  ;;  %v5709_v34 = vadd.f32 %v10415_v62, %v5674_v15  ;;  %v5575_v56 = vadd.f32 %v10766_v0, %v5536_v17 }
 0x470   : > { %6488 = vst.msk [vmem:[%s10484_s14 + $0xa8] sm:$0xff] %vm6466_vm12, %v6455_v24  ;;  %v6362_v25 = vmax.f32 %v6330_v4, 0.0  ;;  %v5971_v24 = vadd.f32 %v10425_v16, %v5936_v31  ;;  %v6166_v5 = vmul.f32 %v10435_v47, %v11262_v19 }
 0x471   : > { %v5797_v40 = vpop.permute.xlu0 %5796  ;;  %v5903_v3 = vmax.f32 %v5871_v61, 0.0 }
 0x472   : > { %v6460_v12 = vsel %vm6433_vm11, %v6427_v28, %v6362_v25  ;;  %v6033_v57 = vpop.permute.xlu1 %6032  ;;  %v5868_v27 = vadd.f32 %v5797_v40, %v5708_v1  ;;  %v5607_v25 = vadd.f32 %v5575_v56, %v10345_v42  ;;  %v6201_v40 = vadd.f32 %v10439_v51, %v6166_v5 }
 0x473   : > { %6493 = vst.msk [vmem:[%s10484_s14 + $0xd0] sm:$0xff] %vm6466_vm12, %v6460_v12  ;;  %v6101_v45 = vadd.f32 %v6033_v57, %v5973_v30  ;;  %v6395_v58 = vsel %vm5047_vm9, %v5641_v33, %v5903_v3  ;;  %v11263_v12 = vld [vmem:[#allocation6_spill] sm:$0xff]  ;;  %v5679_v3 = vmul.f32 %v11264_v6, %v10405_v44 }
 0x474   : > { %v5900_v46 = vmax.f32 %v5868_v27, 0.0  ;;  %v5677_v1 = vmul.f32 %v10405_v44, %v11263_v12  ;;  %v5639_v57 = vmax.f32 %v5607_v25, 0.0  ;;  %v5939_v52 = vmul.f32 %v10421_v53, %v11263_v12 }
 0x475   : > { %v6027_v43 = vpop.permute.xlu0 %6026  ;;  %v6133_v55 = vmax.f32 %v6101_v45, 0.0  ;;  %v5539_v45 = vmul.f32 %v10746_v23, %v11263_v12  ;;  %v6169_v15 = vmul.f32 %v10435_v47, %v11263_v12 }
 0x476   : > { %v6098_v32 = vadd.f32 %v6027_v43, %v5970_v50  ;;  %v6263_v38 = vpop.permute.xlu1 %6262  ;;  %v6392_v4 = vsel %vm5047_vm9, %v5638_v35, %v5900_v46  ;;  %v5974_v19 = vadd.f32 %v10425_v16, %v5939_v52  ;;  %v5714_v46 = vadd.f32 %v10415_v62, %v5679_v3 }
 0x477   : > { %v6331_v13 = vadd.f32 %v6263_v38, %v6203_v39  ;;  %v6428_v14 = vsel %vm6400_vm10, %v6395_v58, %v6133_v55  ;;  %v5712_v39 = vadd.f32 %v10415_v62, %v5677_v1  ;;  %v5541_v55 = vmul.f32 %v10746_v23, %v11264_v6 }
 0x478   : > { %v6130_v60 = vmax.f32 %v6098_v32, 0.0  ;;  %v5941_v32 = vmul.f32 %v11264_v6, %v10421_v53  ;;  %v5578_v33 = vadd.f32 %v10766_v0, %v5539_v45 }
 0x479   : > { %v6363_v8 = vmax.f32 %v6331_v13, 0.0  ;;  %v6257_v26 = vpop.permute.xlu0 %6256 }
 0x47a   : > { %v6328_v36 = vadd.f32 %v6257_v26, %v6200_v22  ;;  %v5799_v49 = vpop.permute.xlu1 %5798  ;;  %v6425_v10 = vsel %vm6400_vm10, %v6392_v4, %v6130_v60  ;;  %v5610_v22 = vadd.f32 %v5578_v33, %v10360_v7  ;;  %v11265_v26 = vld [vmem:[#allocation8_spill] sm:$0xff]  ;;  %v5976_v35 = vadd.f32 %v10425_v16, %v5941_v32  ;;  %v11266_v7 = vld [vmem:[#allocation7_spill] sm:$0xff] }
 0x47b   : > { %v6461_v9 = vsel %vm6433_vm11, %v6428_v14, %v6363_v8  ;;  %v5869_v2 = vadd.f32 %v5799_v49, %v5709_v34  ;;  %v5580_v8 = vadd.f32 %v10766_v0, %v5541_v55  ;;  %v5540_v31 = vmul.f32 %v10746_v23, %v11265_v26 }
 0x47c   : > { %6494 = vst.msk [vmem:[%s10484_s14 + $0xd8] sm:$0xff] %vm6466_vm12, %v6461_v9  ;;  %v6360_v59 = vmax.f32 %v6328_v36, 0.0  ;;  %v5678_v14 = vmul.f32 %v10405_v44, %v11265_v26  ;;  %v6204_v9 = vadd.f32 %v10439_v51, %v6169_v15  ;;  %v6171_v34 = vmul.f32 %v11264_v6, %v10435_v47 }
 0x47d   : > { %v5809_v21 = vpop.permute.xlu0 %5808  ;;  %v5901_v28 = vmax.f32 %v5869_v2, 0.0  ;;  %v5542_v56 = vmul.f32 %v10746_v23, %v11266_v7  ;;  %v5940_v2 = vmul.f32 %v10421_v53, %v11265_v26  ;;  %v5642_v5 = vmax.f32 %v5610_v22, 0.0 }
 0x47e   : > { %v6458_v41 = vsel %vm6433_vm11, %v6425_v10, %v6360_v59  ;;  %v6029_v11 = vpop.permute.xlu1 %6028  ;;  %v5874_v36 = vadd.f32 %v5809_v21, %v5714_v46  ;;  %v5680_v21 = vmul.f32 %v11266_v7, %v10405_v44  ;;  %v5579_v25 = vadd.f32 %v10766_v0, %v5540_v31 }
 0x47f   : > { %6491 = vst.msk [vmem:[%s10484_s14 + $0xc0] sm:$0xff] %vm6466_vm12, %v6458_v41  ;;  %v6099_v20 = vadd.f32 %v6029_v11, %v5971_v24  ;;  %v6393_v42 = vsel %vm5047_vm9, %v5639_v57, %v5901_v28  ;;  %v5612_v24 = vadd.f32 %v5580_v8, %v10356_v18  ;;  %v5713_v23 = vadd.f32 %v10415_v62, %v5678_v14 }
 0x480   : > { %v6170_v28 = vmul.f32 %v10435_v47, %v11265_v26  ;;  %v5975_v57 = vadd.f32 %v10425_v16, %v5940_v2  ;;  %v6172_v55 = vmul.f32 %v11266_v7, %v10435_v47 }
 0x481   : > { %v6039_v61 = vpop.permute.xlu0 %6038  ;;  %v6131_v30 = vmax.f32 %v6099_v20, 0.0  ;;  %v5942_v20 = vmul.f32 %v11266_v7, %v10421_v53  ;;  %v5644_v53 = vmax.f32 %v5612_v24, 0.0 }
 0x482   : > { %v6259_v37 = vpop.permute.xlu1 %6258  ;;  %v6104_v4 = vadd.f32 %v6039_v61, %v5976_v35  ;;  %v5906_v61 = vmax.f32 %v5874_v36, 0.0  ;;  %v6207_v22 = vadd.f32 %v10439_v51, %v6172_v55 }
 0x483   : > { %v6329_v29 = vadd.f32 %v6259_v37, %v6201_v40  ;;  %v6426_v43 = vsel %vm6400_vm10, %v6393_v42, %v6131_v30  ;;  %v6206_v30 = vadd.f32 %v10439_v51, %v6171_v34  ;;  %v5581_v42 = vadd.f32 %v10766_v0, %v5542_v56 }
 0x484   : > { %v6136_v44 = vmax.f32 %v6104_v4, 0.0  ;;  %v6398_v3 = vsel %vm5047_vm9, %v5644_v53, %v5906_v61 }
 0x485   : > { %v6361_v27 = vmax.f32 %v6329_v29, 0.0  ;;  %v5805_v50 = vpop.permute.xlu0 %5804  ;;  %v5613_v15 = vadd.f32 %v5581_v42, %v10364_v54 }
 0x486   : > { %v5811_v48 = vpop.permute.xlu1 %5810  ;;  %v5872_v13 = vadd.f32 %v5805_v50, %v5712_v39  ;;  %v5611_v50 = vadd.f32 %v5579_v25, %v10369_v63  ;;  %v6431_v32 = vsel %vm6400_vm10, %v6398_v3, %v6136_v44 }
 0x487   : > { %v6459_v38 = vsel %vm6433_vm11, %v6426_v43, %v6361_v27  ;;  %v5715_v27 = vadd.f32 %v10415_v62, %v5680_v21  ;;  %v5977_v43 = vadd.f32 %v10425_v16, %v5942_v20  ;;  %v6205_v62 = vadd.f32 %v10439_v51, %v6170_v28 }
 0x488   : > { %6492 = vst.msk [vmem:[%s10484_s14 + $0xc8] sm:$0xff] %vm6466_vm12, %v6459_v38  ;;  %v5904_v49 = vmax.f32 %v5872_v13, 0.0  ;;  %v5645_v26 = vmax.f32 %v5613_v15, 0.0 }
 0x489   : > { %v6035_v17 = vpop.permute.xlu0 %6034  ;;  %v5875_v38 = vadd.f32 %v5811_v48, %v5715_v27 }
 0x48a   : > { %v6102_v58 = vadd.f32 %v6035_v17, %v5974_v19  ;;  %v6041_v60 = vpop.permute.xlu1 %6040  ;;  %v6396_v18 = vsel %vm5047_vm9, %v5642_v5, %v5904_v49  ;;  %v5643_v17 = vmax.f32 %v5611_v50, 0.0 }
 0x48b   : > { %v6105_v33 = vadd.f32 %v6041_v60, %v5977_v43  ;;  %v5907_v47 = vmax.f32 %v5875_v38, 0.0 }
 0x48c   : > { %v6134_v59 = vmax.f32 %v6102_v58, 0.0 }
 0x48d   : > { %v6265_v10 = vpop.permute.xlu0 %6264  ;;  %v6137_v58 = vmax.f32 %v6105_v33, 0.0  ;;  %v6399_v54 = vsel %vm5047_vm9, %v5645_v26, %v5907_v47 }
 0x48e   : > { %v6332_v41 = vadd.f32 %v6265_v10, %v6204_v9  ;;  %v5807_v11 = vpop.permute.xlu1 %5806  ;;  %v6429_v37 = vsel %vm6400_vm10, %v6396_v18, %v6134_v59 }
 0x48f   : > { %v5873_v12 = vadd.f32 %v5807_v11, %v5713_v23  ;;  %v6432_v36 = vsel %vm6400_vm10, %v6399_v54, %v6137_v58 }
 0x490   : > { %v6364_v40 = vmax.f32 %v6332_v41, 0.0 }
 0x491   : > { %v6269_v1 = vpop.permute.xlu0 %6268  ;;  %v5905_v0 = vmax.f32 %v5873_v12, 0.0 }
 0x492   : > { %v6462_v29 = vsel %vm6433_vm11, %v6429_v37, %v6364_v40  ;;  %v6334_v45 = vadd.f32 %v6269_v1, %v6206_v30  ;;  %v6037_v52 = vpop.permute.xlu1 %6036 }
 0x493   : > { %6495 = vst.msk [vmem:[%s10484_s14 + $0xe0] sm:$0xff] %vm6466_vm12, %v6462_v29  ;;  %v6103_v6 = vadd.f32 %v6037_v52, %v5975_v57  ;;  %v6397_v46 = vsel %vm5047_vm9, %v5643_v17, %v5905_v0 }
 0x494   : > { %v6366_v39 = vmax.f32 %v6334_v45, 0.0 }
 0x495   : > { %v6135_v63 = vmax.f32 %v6103_v6, 0.0 }
 0x496   : > { %v6464_v13 = vsel %vm6433_vm11, %v6431_v32, %v6366_v39  ;;  %v6267_v19 = vpop.permute.xlu1 %6266 }
 0x497   : > { %6497 = vst.msk [vmem:[%s10484_s14 + $0xf0] sm:$0xff] %vm6466_vm12, %v6464_v13  ;;  %v6333_v16 = vadd.f32 %v6267_v19, %v6205_v62  ;;  %v6430_v60 = vsel %vm6400_vm10, %v6397_v46, %v6135_v63 }
 0x499   : > { %v6365_v48 = vmax.f32 %v6333_v16, 0.0 }
 0x49a   : > { %v6271_v8 = vpop.permute.xlu1 %6270 }
 0x49b   : > { %v6463_v31 = vsel %vm6433_vm11, %v6430_v60, %v6365_v48  ;;  %v6335_v35 = vadd.f32 %v6271_v8, %v6207_v22 }
 0x49c   : > { %6496 = vst.msk [vmem:[%s10484_s14 + $0xe8] sm:$0xff] %vm6466_vm12, %v6463_v31 }
 0x49d   : > { %v6367_v14 = vmax.f32 %v6335_v35, 0.0 }
 0x49f   : > { %v6465_v49 = vsel %vm6433_vm11, %v6432_v36, %v6367_v14 }
 0x4a0   : > { %6498 = vst.msk [vmem:[%s10484_s14 + $0xf8] sm:$0xff] %vm6466_vm12, %v6465_v49 }
 0x4a1 PF: > { %s20_s13 = sadd.s32 1, %s8090_s13  }
 0x4a2   : > { %p17_p4 = scmp.ge.s32.totalorder %s20_s13, 4  }
 0x4a4   :  { %19 = sbr.rel (!%p17_p4) target bundleno = 1 (0x1), region = 100 }

</bundles_post_ra>
